<compile_context>
chip_gen: v7x
topology: tpu7x:2x2x1
jax: 0.10.0
libtpu: 0.0.40
codegen_flags: <defaults>
</compile_context>

<pallas_src>
import jax
import jax.numpy as jnp
from jax.experimental import pallas as pl
from jax.experimental.pallas import tpu as pltpu  # noqa: F401  (not needed at these sizes)

OUT_LANES = 128  # lane-dense padded width of the prediction-head output


# ------------------------------ fused kernel ------------------------------- #
def fused_forward_kernel(x_ref, idx1_ref, idx2_ref, nsr_ref, nsc_ref,
                         wemb_ref, wstruct_ref, posT_ref,
                         k1s_ref, b1s_ref, k2s_ref, b2s_ref,
                         wl1s_ref, bl1s_ref, wl2s_ref, bl2s_ref,
                         wpred_ref, bpred_ref, o_ref):
    N = x_ref.shape[0]
    NL, L = idx1_ref.shape
    Q = k1s_ref.shape[0]

    # --- embedding: h = relu(X @ W_emb)   (Dropout is identity in eval mode)
    h = jnp.maximum(
        jnp.dot(x_ref[...], wemb_ref[...], preferred_element_type=jnp.float32),
        0.0)                                                          # (N, C)

    # --- in-kernel gather matrices from the walk indices:
    #   g1[w*N + n, m] = #{h' : node_image[n, h', w] == m}
    #   g2[h*N + n, m] = #{w' : node_image[n, h, w'] == m}
    # so g1 @ h is the gather h[node_image] already summed over the first walk
    # axis, and g2 @ h over the second (exactly what the depthwise convs need).
    # TODO(synk): g1/g2 are O(N*L x N); for large graphs tile over nodes and
    # use an in-kernel DMA gather instead of the count-matrix matmul.
    iota_m = jax.lax.broadcasted_iota(jnp.int32, (NL, N), 1)
    g1 = jnp.zeros((NL, N), jnp.float32)
    g2 = jnp.zeros((NL, N), jnp.float32)
    for j in range(L):
        g1 = g1 + (idx1_ref[:, j:j + 1] == iota_m).astype(jnp.float32)
        g2 = g2 + (idx2_ref[:, j:j + 1] == iota_m).astype(jnp.float32)

    # --- layer-0 struct 1x1 conv on pre-summed node_struct, plus the position
    #     embedding folded into two per-channel constants.
    srow = jnp.dot(nsr_ref[...], wstruct_ref[...],
                   preferred_element_type=jnp.float32)                # (NL, C)
    scol = jnp.dot(nsc_ref[...], wstruct_ref[...],
                   preferred_element_type=jnp.float32)                # (NL, C)
    posT = posT_ref[...]                                              # (L, C)
    pos1 = L * jnp.sum(posT * k1s_ref[0], axis=0, keepdims=True)      # (1, C)
    pos2 = (jnp.sum(posT, axis=0, keepdims=True)
            * jnp.sum(k2s_ref[0], axis=0, keepdims=True))             # (1, C)

    # --- PathGCN layers (layer count is small & static -> unrolled).
    for q in range(Q):
        hs = jnp.dot(g1, h, preferred_element_type=jnp.float32)      # (NL, C)
        ws = jnp.dot(g2, h, preferred_element_type=jnp.float32)      # (NL, C)
        pre1 = b1s_ref[q]                                            # (1, C)
        pre2 = b2s_ref[q]
        if q == 0:
            hs = hs + srow
            ws = ws + scol
            pre1 = pre1 + pos1
            pre2 = pre2 + pos2
        # factored depthwise conv + mean: per-channel weighted sum over the
        # remaining walk axis using the natural (L, C) kernels (1/L folded).
        for j in range(L):
            pre1 = pre1 + hs[j * N:(j + 1) * N, :] * k1s_ref[q, j:j + 1, :]
            pre2 = pre2 + ws[j * N:(j + 1) * N, :] * k2s_ref[q, j:j + 1, :]
        h1 = jnp.maximum(
            jnp.dot(pre1, wl1s_ref[q], preferred_element_type=jnp.float32)
            + bl1s_ref[q], 0.0)
        h2 = jnp.maximum(
            jnp.dot(pre2, wl2s_ref[q], preferred_element_type=jnp.float32)
            + bl2s_ref[q], 0.0)
        # bigram branch (h3) is unused in the PyTorch output -> skipped.
        h = h1 + h2 + h

    # --- prediction head, lane-dense (padded to OUT_LANES columns).
    o_ref[...] = (jnp.dot(h, wpred_ref[...], preferred_element_type=jnp.float32)
                  + bpred_ref[...])


# -------------------------------- wrapper ----------------------------------- #
def _model_forward_impl(X, node_image, node_struct, params):
    N = X.shape[0]
    L = node_image.shape[1]
    S = node_struct.shape[1]
    C = params["W_emb"].shape[1]
    O = params["W_pred"].shape[1]
    NL = N * L
    layers = params["layers"]

    # Walk indices, rows ordered r = walk_position * N + node (so the kernel's
    # per-position slices hs[j*N:(j+1)*N] are contiguous, 8-aligned blocks):
    #   idx1[w*N + n, :] = node_image[n, :, w]
    #   idx2[h*N + n, :] = node_image[n, h, :]
    idx1 = jnp.transpose(node_image, (2, 0, 1)).reshape(NL, L).astype(jnp.int32)
    idx2 = jnp.transpose(node_image, (1, 0, 2)).reshape(NL, L).astype(jnp.int32)

    # node_struct pre-summed over each walk axis (layout prep only; the 1x1
    # struct-conv matmul itself runs inside the kernel).
    nsr = jnp.transpose(jnp.sum(node_struct, axis=2), (2, 0, 1)).reshape(NL, S)
    nsc = jnp.transpose(jnp.sum(node_struct, axis=3), (2, 0, 1)).reshape(NL, S)

    # Stacked per-layer parameters; mean(dim=-1) folded into the depthwise conv
    # kernels as a 1/L scale; kernels kept at their natural (L, C) size.
    k1s = jnp.stack([lp["k1"].T / L for lp in layers])                # (Q, L, C)
    k2s = jnp.stack([lp["k2"].T / L for lp in layers])                # (Q, L, C)
    b1s = jnp.stack([lp["b1"].reshape(1, C) for lp in layers])        # (Q, 1, C)
    b2s = jnp.stack([lp["b2"].reshape(1, C) for lp in layers])
    wl1s = jnp.stack([lp["W_l1"] for lp in layers])                   # (Q, C, C)
    bl1s = jnp.stack([lp["b_l1"].reshape(1, C) for lp in layers])
    wl2s = jnp.stack([lp["W_l2"] for lp in layers])
    bl2s = jnp.stack([lp["b_l2"].reshape(1, C) for lp in layers])

    # Lane-dense prediction head: zero-pad out_dim -> OUT_LANES columns.
    wpred = jnp.zeros((C, OUT_LANES), jnp.float32).at[:, :O].set(params["W_pred"])
    bpred = jnp.zeros((1, OUT_LANES), jnp.float32).at[:, :O].set(
        params["b_pred"].reshape(1, O))

    out_padded = pl.pallas_call(
        fused_forward_kernel,
        out_shape=jax.ShapeDtypeStruct((N, OUT_LANES), jnp.float32),
    )(X, idx1, idx2, nsr, nsc,
      params["W_emb"], layers[0]["W_struct"], layers[0]["pos_emb"].T,
      k1s, b1s, k2s, b2s, wl1s, bl1s, wl2s, bl2s, wpred, bpred)
    return out_padded[:, :O]


model_forward = jax.jit(_model_forward_impl)


# --------------------------- pure-JAX reference ----------------------------- #
def reference_forward(X, node_image, node_struct, params):
    h = jax.nn.relu(X @ params["W_emb"])
    for q, lp in enumerate(params["layers"]):
        g = jnp.transpose(h[node_image], (0, 3, 1, 2))            # (N, C, L, L)
        if q == 0:
            st = jnp.einsum("nshw,sc->nchw", node_struct, lp["W_struct"])
            g = g + st + lp["pos_emb"][None, :, None, :]
        c1 = jnp.einsum("nchw,cw->nch", g, lp["k1"]) + lp["b1"][None, :, None]
        h1 = jax.nn.relu(jnp.mean(c1, axis=-1) @ lp["W_l1"] + lp["b_l1"])
        c2 = jnp.einsum("nchw,ch->ncw", g, lp["k2"]) + lp["b2"][None, :, None]
        h2 = jax.nn.relu(jnp.mean(c2, axis=-1) @ lp["W_l2"] + lp["b_l2"])
        h = h1 + h2 + h
    return h @ params["W_pred"] + params["b_pred"]


# --------------------------------- params ----------------------------------- #
def make_params(key, in_dim, hidden_dim, struct_dim, out_dim, walk_len, layer_num):
    keys = iter(jax.random.split(key, 64))
    nrm = lambda shape, s=0.1: (s * jax.random.normal(next(keys), shape)).astype(jnp.float32)
    layers = []
    for q in range(layer_num):
        lp = dict(
            k1=nrm((hidden_dim, walk_len)),        # depthwise conv (1, L) weights
            b1=nrm((hidden_dim,)),
            k2=nrm((hidden_dim, walk_len)),        # depthwise conv (L, 1) weights
            b2=nrm((hidden_dim,)),
            W_l1=nrm((hidden_dim, hidden_dim)),
            b_l1=nrm((hidden_dim,)),
            W_l2=nrm((hidden_dim, hidden_dim)),
            b_l2=nrm((hidden_dim,)),
        )
        if q == 0:                                  # first_layer-only params
            lp["W_struct"] = nrm((struct_dim, hidden_dim))   # 1x1 conv, no bias
            lp["pos_emb"] = nrm((hidden_dim, walk_len))
        layers.append(lp)
    return dict(
        W_emb=nrm((in_dim, hidden_dim)),
        W_pred=nrm((hidden_dim, out_dim)),
        b_pred=nrm((out_dim,)),
        layers=layers,
    )


# ---------------------------------- main ------------------------------------ #
if __name__ == "__main__":
    N, in_dim, hidden_dim, struct_dim, out_dim, walk_len, layer_num = 16, 24, 32, 6, 5, 8, 3
    key = jax.random.PRNGKey(0)
    k_x, k_idx, k_ns, k_p = jax.random.split(key, 4)

    X = jax.random.normal(k_x, (N, in_dim), dtype=jnp.float32)
    node_image = jax.random.randint(k_idx, (N, walk_len, walk_len), 0, N, dtype=jnp.int32)
    node_struct = jax.random.normal(k_ns, (N, struct_dim, walk_len, walk_len), dtype=jnp.float32)
    params = make_params(k_p, in_dim, hidden_dim, struct_dim, out_dim, walk_len, layer_num)

    out = jax.block_until_ready(model_forward(X, node_image, node_struct, params))
    ref = jax.block_until_ready(reference_forward(X, node_image, node_struct, params))

    assert out.shape == (N, out_dim)
    assert jnp.allclose(out, ref, rtol=1e-4, atol=1e-4), "mismatch vs pure-JAX reference"
    print("KERNEL_OK")
</pallas_src>

<mosaic_0001>
module attributes {stable_mosaic.version = 11 : i64} {
  func.func @fused_forward_kernel(%arg0: memref<16x24xf32, #tpu.memory_space<vmem>>, %arg1: memref<128x8xi32, #tpu.memory_space<vmem>>, %arg2: memref<128x8xi32, #tpu.memory_space<vmem>>, %arg3: memref<128x6xf32, #tpu.memory_space<vmem>>, %arg4: memref<128x6xf32, #tpu.memory_space<vmem>>, %arg5: memref<24x32xf32, #tpu.memory_space<vmem>>, %arg6: memref<6x32xf32, #tpu.memory_space<vmem>>, %arg7: memref<8x32xf32, #tpu.memory_space<vmem>>, %arg8: memref<3x8x32xf32, #tpu.memory_space<vmem>>, %arg9: memref<3x1x32xf32, #tpu.memory_space<vmem>>, %arg10: memref<3x8x32xf32, #tpu.memory_space<vmem>>, %arg11: memref<3x1x32xf32, #tpu.memory_space<vmem>>, %arg12: memref<3x32x32xf32, #tpu.memory_space<vmem>>, %arg13: memref<3x1x32xf32, #tpu.memory_space<vmem>>, %arg14: memref<3x32x32xf32, #tpu.memory_space<vmem>>, %arg15: memref<3x1x32xf32, #tpu.memory_space<vmem>>, %arg16: memref<32x128xf32, #tpu.memory_space<vmem>>, %arg17: memref<1x128xf32, #tpu.memory_space<vmem>>, %arg18: memref<16x128xf32, #tpu.memory_space<vmem>>) attributes {dimension_semantics = [], scalar_prefetch = 0 : i64, scratch_operands = 0 : i64, tpu.core_type = #tpu.core_type<tc>} {
    %c0 = arith.constant 0 : index
    %c0_0 = arith.constant 0 : index
    %0 = vector.load %arg0[%c0, %c0_0] : memref<16x24xf32, #tpu.memory_space<vmem>>, vector<16x24xf32>
    %c0_1 = arith.constant 0 : index
    %c0_2 = arith.constant 0 : index
    %1 = vector.load %arg5[%c0_1, %c0_2] : memref<24x32xf32, #tpu.memory_space<vmem>>, vector<24x32xf32>
    %cst = arith.constant dense<0.000000e+00> : vector<16x32xf32>
    %2 = tpu.matmul %0, %1, %cst {dimension_numbers = #tpu.dot_dimension_numbers<[1], [0], [0], [1], [0, 0, 1, 1], [], []>} : vector<16x24xf32>, vector<24x32xf32>, vector<16x32xf32> -> vector<16x32xf32>
    %cst_3 = arith.constant 0.000000e+00 : f32
    %3 = vector.broadcast %cst_3 : f32 to vector<16x32xf32>
    %4 = arith.maximumf %2, %3 : vector<16x32xf32>
    %5 = tpu.iota {dimensions = array<i32: 1>} : vector<128x16xi32>
    %cst_4 = arith.constant 0.000000e+00 : f32
    %6 = vector.broadcast %cst_4 : f32 to vector<128x16xf32>
    %cst_5 = arith.constant 0.000000e+00 : f32
    %7 = vector.broadcast %cst_5 : f32 to vector<128x16xf32>
    %c0_6 = arith.constant 0 : index
    %c0_7 = arith.constant 0 : index
    %8 = vector.load %arg1[%c0_6, %c0_7] : memref<128x8xi32, #tpu.memory_space<vmem>>, vector<128x1xi32>
    %9 = vector.broadcast %8 : vector<128x1xi32> to vector<128x16xi32>
    %10 = arith.cmpi eq, %9, %5 : vector<128x16xi32>
    %11 = arith.extui %10 : vector<128x16xi1> to vector<128x16xi32>
    %12 = arith.sitofp %11 : vector<128x16xi32> to vector<128x16xf32>
    %13 = arith.addf %6, %12 : vector<128x16xf32>
    %c0_8 = arith.constant 0 : index
    %c0_9 = arith.constant 0 : index
    %14 = vector.load %arg2[%c0_8, %c0_9] : memref<128x8xi32, #tpu.memory_space<vmem>>, vector<128x1xi32>
    %15 = vector.broadcast %14 : vector<128x1xi32> to vector<128x16xi32>
    %16 = arith.cmpi eq, %15, %5 : vector<128x16xi32>
    %17 = arith.extui %16 : vector<128x16xi1> to vector<128x16xi32>
    %18 = arith.sitofp %17 : vector<128x16xi32> to vector<128x16xf32>
    %19 = arith.addf %7, %18 : vector<128x16xf32>
    %c0_10 = arith.constant 0 : index
    %c1 = arith.constant 1 : index
    %20 = vector.load %arg1[%c0_10, %c1] : memref<128x8xi32, #tpu.memory_space<vmem>>, vector<128x1xi32>
    %21 = vector.broadcast %20 : vector<128x1xi32> to vector<128x16xi32>
    %22 = arith.cmpi eq, %21, %5 : vector<128x16xi32>
    %23 = arith.extui %22 : vector<128x16xi1> to vector<128x16xi32>
    %24 = arith.sitofp %23 : vector<128x16xi32> to vector<128x16xf32>
    %25 = arith.addf %13, %24 : vector<128x16xf32>
    %c0_11 = arith.constant 0 : index
    %c1_12 = arith.constant 1 : index
    %26 = vector.load %arg2[%c0_11, %c1_12] : memref<128x8xi32, #tpu.memory_space<vmem>>, vector<128x1xi32>
    %27 = vector.broadcast %26 : vector<128x1xi32> to vector<128x16xi32>
    %28 = arith.cmpi eq, %27, %5 : vector<128x16xi32>
    %29 = arith.extui %28 : vector<128x16xi1> to vector<128x16xi32>
    %30 = arith.sitofp %29 : vector<128x16xi32> to vector<128x16xf32>
    %31 = arith.addf %19, %30 : vector<128x16xf32>
    %c0_13 = arith.constant 0 : index
    %c2 = arith.constant 2 : index
    %32 = vector.load %arg1[%c0_13, %c2] : memref<128x8xi32, #tpu.memory_space<vmem>>, vector<128x1xi32>
    %33 = vector.broadcast %32 : vector<128x1xi32> to vector<128x16xi32>
    %34 = arith.cmpi eq, %33, %5 : vector<128x16xi32>
    %35 = arith.extui %34 : vector<128x16xi1> to vector<128x16xi32>
    %36 = arith.sitofp %35 : vector<128x16xi32> to vector<128x16xf32>
    %37 = arith.addf %25, %36 : vector<128x16xf32>
    %c0_14 = arith.constant 0 : index
    %c2_15 = arith.constant 2 : index
    %38 = vector.load %arg2[%c0_14, %c2_15] : memref<128x8xi32, #tpu.memory_space<vmem>>, vector<128x1xi32>
    %39 = vector.broadcast %38 : vector<128x1xi32> to vector<128x16xi32>
    %40 = arith.cmpi eq, %39, %5 : vector<128x16xi32>
    %41 = arith.extui %40 : vector<128x16xi1> to vector<128x16xi32>
    %42 = arith.sitofp %41 : vector<128x16xi32> to vector<128x16xf32>
    %43 = arith.addf %31, %42 : vector<128x16xf32>
    %c0_16 = arith.constant 0 : index
    %c3 = arith.constant 3 : index
    %44 = vector.load %arg1[%c0_16, %c3] : memref<128x8xi32, #tpu.memory_space<vmem>>, vector<128x1xi32>
    %45 = vector.broadcast %44 : vector<128x1xi32> to vector<128x16xi32>
    %46 = arith.cmpi eq, %45, %5 : vector<128x16xi32>
    %47 = arith.extui %46 : vector<128x16xi1> to vector<128x16xi32>
    %48 = arith.sitofp %47 : vector<128x16xi32> to vector<128x16xf32>
    %49 = arith.addf %37, %48 : vector<128x16xf32>
    %c0_17 = arith.constant 0 : index
    %c3_18 = arith.constant 3 : index
    %50 = vector.load %arg2[%c0_17, %c3_18] : memref<128x8xi32, #tpu.memory_space<vmem>>, vector<128x1xi32>
    %51 = vector.broadcast %50 : vector<128x1xi32> to vector<128x16xi32>
    %52 = arith.cmpi eq, %51, %5 : vector<128x16xi32>
    %53 = arith.extui %52 : vector<128x16xi1> to vector<128x16xi32>
    %54 = arith.sitofp %53 : vector<128x16xi32> to vector<128x16xf32>
    %55 = arith.addf %43, %54 : vector<128x16xf32>
    %c0_19 = arith.constant 0 : index
    %c4 = arith.constant 4 : index
    %56 = vector.load %arg1[%c0_19, %c4] : memref<128x8xi32, #tpu.memory_space<vmem>>, vector<128x1xi32>
    %57 = vector.broadcast %56 : vector<128x1xi32> to vector<128x16xi32>
    %58 = arith.cmpi eq, %57, %5 : vector<128x16xi32>
    %59 = arith.extui %58 : vector<128x16xi1> to vector<128x16xi32>
    %60 = arith.sitofp %59 : vector<128x16xi32> to vector<128x16xf32>
    %61 = arith.addf %49, %60 : vector<128x16xf32>
    %c0_20 = arith.constant 0 : index
    %c4_21 = arith.constant 4 : index
    %62 = vector.load %arg2[%c0_20, %c4_21] : memref<128x8xi32, #tpu.memory_space<vmem>>, vector<128x1xi32>
    %63 = vector.broadcast %62 : vector<128x1xi32> to vector<128x16xi32>
    %64 = arith.cmpi eq, %63, %5 : vector<128x16xi32>
    %65 = arith.extui %64 : vector<128x16xi1> to vector<128x16xi32>
    %66 = arith.sitofp %65 : vector<128x16xi32> to vector<128x16xf32>
    %67 = arith.addf %55, %66 : vector<128x16xf32>
    %c0_22 = arith.constant 0 : index
    %c5 = arith.constant 5 : index
    %68 = vector.load %arg1[%c0_22, %c5] : memref<128x8xi32, #tpu.memory_space<vmem>>, vector<128x1xi32>
    %69 = vector.broadcast %68 : vector<128x1xi32> to vector<128x16xi32>
    %70 = arith.cmpi eq, %69, %5 : vector<128x16xi32>
    %71 = arith.extui %70 : vector<128x16xi1> to vector<128x16xi32>
    %72 = arith.sitofp %71 : vector<128x16xi32> to vector<128x16xf32>
    %73 = arith.addf %61, %72 : vector<128x16xf32>
    %c0_23 = arith.constant 0 : index
    %c5_24 = arith.constant 5 : index
    %74 = vector.load %arg2[%c0_23, %c5_24] : memref<128x8xi32, #tpu.memory_space<vmem>>, vector<128x1xi32>
    %75 = vector.broadcast %74 : vector<128x1xi32> to vector<128x16xi32>
    %76 = arith.cmpi eq, %75, %5 : vector<128x16xi32>
    %77 = arith.extui %76 : vector<128x16xi1> to vector<128x16xi32>
    %78 = arith.sitofp %77 : vector<128x16xi32> to vector<128x16xf32>
    %79 = arith.addf %67, %78 : vector<128x16xf32>
    %c0_25 = arith.constant 0 : index
    %c6 = arith.constant 6 : index
    %80 = vector.load %arg1[%c0_25, %c6] : memref<128x8xi32, #tpu.memory_space<vmem>>, vector<128x1xi32>
    %81 = vector.broadcast %80 : vector<128x1xi32> to vector<128x16xi32>
    %82 = arith.cmpi eq, %81, %5 : vector<128x16xi32>
    %83 = arith.extui %82 : vector<128x16xi1> to vector<128x16xi32>
    %84 = arith.sitofp %83 : vector<128x16xi32> to vector<128x16xf32>
    %85 = arith.addf %73, %84 : vector<128x16xf32>
    %c0_26 = arith.constant 0 : index
    %c6_27 = arith.constant 6 : index
    %86 = vector.load %arg2[%c0_26, %c6_27] : memref<128x8xi32, #tpu.memory_space<vmem>>, vector<128x1xi32>
    %87 = vector.broadcast %86 : vector<128x1xi32> to vector<128x16xi32>
    %88 = arith.cmpi eq, %87, %5 : vector<128x16xi32>
    %89 = arith.extui %88 : vector<128x16xi1> to vector<128x16xi32>
    %90 = arith.sitofp %89 : vector<128x16xi32> to vector<128x16xf32>
    %91 = arith.addf %79, %90 : vector<128x16xf32>
    %c0_28 = arith.constant 0 : index
    %c7 = arith.constant 7 : index
    %92 = vector.load %arg1[%c0_28, %c7] : memref<128x8xi32, #tpu.memory_space<vmem>>, vector<128x1xi32>
    %93 = vector.broadcast %92 : vector<128x1xi32> to vector<128x16xi32>
    %94 = arith.cmpi eq, %93, %5 : vector<128x16xi32>
    %95 = arith.extui %94 : vector<128x16xi1> to vector<128x16xi32>
    %96 = arith.sitofp %95 : vector<128x16xi32> to vector<128x16xf32>
    %97 = arith.addf %85, %96 : vector<128x16xf32>
    %c0_29 = arith.constant 0 : index
    %c7_30 = arith.constant 7 : index
    %98 = vector.load %arg2[%c0_29, %c7_30] : memref<128x8xi32, #tpu.memory_space<vmem>>, vector<128x1xi32>
    %99 = vector.broadcast %98 : vector<128x1xi32> to vector<128x16xi32>
    %100 = arith.cmpi eq, %99, %5 : vector<128x16xi32>
    %101 = arith.extui %100 : vector<128x16xi1> to vector<128x16xi32>
    %102 = arith.sitofp %101 : vector<128x16xi32> to vector<128x16xf32>
    %103 = arith.addf %91, %102 : vector<128x16xf32>
    %c0_31 = arith.constant 0 : index
    %c0_32 = arith.constant 0 : index
    %104 = vector.load %arg3[%c0_31, %c0_32] : memref<128x6xf32, #tpu.memory_space<vmem>>, vector<128x6xf32>
    %c0_33 = arith.constant 0 : index
    %c0_34 = arith.constant 0 : index
    %105 = vector.load %arg6[%c0_33, %c0_34] : memref<6x32xf32, #tpu.memory_space<vmem>>, vector<6x32xf32>
    %cst_35 = arith.constant dense<0.000000e+00> : vector<128x32xf32>
    %106 = tpu.matmul %104, %105, %cst_35 {dimension_numbers = #tpu.dot_dimension_numbers<[1], [0], [0], [1], [0, 0, 1, 1], [], []>} : vector<128x6xf32>, vector<6x32xf32>, vector<128x32xf32> -> vector<128x32xf32>
    %c0_36 = arith.constant 0 : index
    %c0_37 = arith.constant 0 : index
    %107 = vector.load %arg4[%c0_36, %c0_37] : memref<128x6xf32, #tpu.memory_space<vmem>>, vector<128x6xf32>
    %c0_38 = arith.constant 0 : index
    %c0_39 = arith.constant 0 : index
    %108 = vector.load %arg6[%c0_38, %c0_39] : memref<6x32xf32, #tpu.memory_space<vmem>>, vector<6x32xf32>
    %cst_40 = arith.constant dense<0.000000e+00> : vector<128x32xf32>
    %109 = tpu.matmul %107, %108, %cst_40 {dimension_numbers = #tpu.dot_dimension_numbers<[1], [0], [0], [1], [0, 0, 1, 1], [], []>} : vector<128x6xf32>, vector<6x32xf32>, vector<128x32xf32> -> vector<128x32xf32>
    %c0_41 = arith.constant 0 : index
    %c0_42 = arith.constant 0 : index
    %110 = vector.load %arg7[%c0_41, %c0_42] : memref<8x32xf32, #tpu.memory_space<vmem>>, vector<8x32xf32>
    %c0_43 = arith.constant 0 : index
    %c0_44 = arith.constant 0 : index
    %c0_45 = arith.constant 0 : index
    %111 = vector.load %arg8[%c0_43, %c0_44, %c0_45] : memref<3x8x32xf32, #tpu.memory_space<vmem>>, vector<1x8x32xf32>
    %112 = vector.shape_cast %111 : vector<1x8x32xf32> to vector<8x32xf32>
    %113 = arith.mulf %110, %112 : vector<8x32xf32>
    %cst_46 = arith.constant dense<0.000000e+00> : vector<32xf32>
    %114 = vector.multi_reduction <add>, %113, %cst_46 [0] : vector<8x32xf32> to vector<32xf32>
    %115 = vector.shape_cast %114 : vector<32xf32> to vector<1x32xf32>
    %cst_47 = arith.constant 8.000000e+00 : f32
    %116 = vector.broadcast %cst_47 : f32 to vector<1x32xf32>
    %117 = arith.mulf %116, %115 : vector<1x32xf32>
    %cst_48 = arith.constant dense<0.000000e+00> : vector<32xf32>
    %118 = vector.multi_reduction <add>, %110, %cst_48 [0] : vector<8x32xf32> to vector<32xf32>
    %119 = vector.shape_cast %118 : vector<32xf32> to vector<1x32xf32>
    %c0_49 = arith.constant 0 : index
    %c0_50 = arith.constant 0 : index
    %c0_51 = arith.constant 0 : index
    %120 = vector.load %arg10[%c0_49, %c0_50, %c0_51] : memref<3x8x32xf32, #tpu.memory_space<vmem>>, vector<1x8x32xf32>
    %121 = vector.shape_cast %120 : vector<1x8x32xf32> to vector<8x32xf32>
    %cst_52 = arith.constant dense<0.000000e+00> : vector<32xf32>
    %122 = vector.multi_reduction <add>, %121, %cst_52 [0] : vector<8x32xf32> to vector<32xf32>
    %123 = vector.shape_cast %122 : vector<32xf32> to vector<1x32xf32>
    %124 = arith.mulf %119, %123 : vector<1x32xf32>
    %cst_53 = arith.constant dense<0.000000e+00> : vector<128x32xf32>
    %125 = tpu.matmul %97, %4, %cst_53 {dimension_numbers = #tpu.dot_dimension_numbers<[1], [0], [0], [1], [0, 0, 1, 1], [], []>} : vector<128x16xf32>, vector<16x32xf32>, vector<128x32xf32> -> vector<128x32xf32>
    %cst_54 = arith.constant dense<0.000000e+00> : vector<128x32xf32>
    %126 = tpu.matmul %103, %4, %cst_54 {dimension_numbers = #tpu.dot_dimension_numbers<[1], [0], [0], [1], [0, 0, 1, 1], [], []>} : vector<128x16xf32>, vector<16x32xf32>, vector<128x32xf32> -> vector<128x32xf32>
    %c0_55 = arith.constant 0 : index
    %c0_56 = arith.constant 0 : index
    %c0_57 = arith.constant 0 : index
    %127 = vector.load %arg9[%c0_55, %c0_56, %c0_57] : memref<3x1x32xf32, #tpu.memory_space<vmem>>, vector<1x1x32xf32>
    %128 = vector.shape_cast %127 : vector<1x1x32xf32> to vector<1x32xf32>
    %c0_58 = arith.constant 0 : index
    %c0_59 = arith.constant 0 : index
    %c0_60 = arith.constant 0 : index
    %129 = vector.load %arg11[%c0_58, %c0_59, %c0_60] : memref<3x1x32xf32, #tpu.memory_space<vmem>>, vector<1x1x32xf32>
    %130 = vector.shape_cast %129 : vector<1x1x32xf32> to vector<1x32xf32>
    %131 = arith.addf %125, %106 : vector<128x32xf32>
    %132 = arith.addf %126, %109 : vector<128x32xf32>
    %133 = arith.addf %128, %117 : vector<1x32xf32>
    %134 = arith.addf %130, %124 : vector<1x32xf32>
    %135 = vector.extract_strided_slice %131 {offsets = [0, 0], sizes = [16, 32], strides = [1, 1]} : vector<128x32xf32> to vector<16x32xf32>
    %c0_61 = arith.constant 0 : index
    %c0_62 = arith.constant 0 : index
    %c0_63 = arith.constant 0 : index
    %136 = vector.load %arg8[%c0_61, %c0_62, %c0_63] : memref<3x8x32xf32, #tpu.memory_space<vmem>>, vector<1x1x32xf32>
    %137 = vector.shape_cast %136 : vector<1x1x32xf32> to vector<1x32xf32>
    %138 = vector.broadcast %137 : vector<1x32xf32> to vector<16x32xf32>
    %139 = arith.mulf %135, %138 : vector<16x32xf32>
    %140 = vector.broadcast %133 : vector<1x32xf32> to vector<16x32xf32>
    %141 = arith.addf %140, %139 : vector<16x32xf32>
    %142 = vector.extract_strided_slice %132 {offsets = [0, 0], sizes = [16, 32], strides = [1, 1]} : vector<128x32xf32> to vector<16x32xf32>
    %c0_64 = arith.constant 0 : index
    %c0_65 = arith.constant 0 : index
    %c0_66 = arith.constant 0 : index
    %143 = vector.load %arg10[%c0_64, %c0_65, %c0_66] : memref<3x8x32xf32, #tpu.memory_space<vmem>>, vector<1x1x32xf32>
    %144 = vector.shape_cast %143 : vector<1x1x32xf32> to vector<1x32xf32>
    %145 = vector.broadcast %144 : vector<1x32xf32> to vector<16x32xf32>
    %146 = arith.mulf %142, %145 : vector<16x32xf32>
    %147 = vector.broadcast %134 : vector<1x32xf32> to vector<16x32xf32>
    %148 = arith.addf %147, %146 : vector<16x32xf32>
    %149 = vector.extract_strided_slice %131 {offsets = [16, 0], sizes = [16, 32], strides = [1, 1]} : vector<128x32xf32> to vector<16x32xf32>
    %c0_67 = arith.constant 0 : index
    %c1_68 = arith.constant 1 : index
    %c0_69 = arith.constant 0 : index
    %150 = vector.load %arg8[%c0_67, %c1_68, %c0_69] : memref<3x8x32xf32, #tpu.memory_space<vmem>>, vector<1x1x32xf32>
    %151 = vector.shape_cast %150 : vector<1x1x32xf32> to vector<1x32xf32>
    %152 = vector.broadcast %151 : vector<1x32xf32> to vector<16x32xf32>
    %153 = arith.mulf %149, %152 : vector<16x32xf32>
    %154 = arith.addf %141, %153 : vector<16x32xf32>
    %155 = vector.extract_strided_slice %132 {offsets = [16, 0], sizes = [16, 32], strides = [1, 1]} : vector<128x32xf32> to vector<16x32xf32>
    %c0_70 = arith.constant 0 : index
    %c1_71 = arith.constant 1 : index
    %c0_72 = arith.constant 0 : index
    %156 = vector.load %arg10[%c0_70, %c1_71, %c0_72] : memref<3x8x32xf32, #tpu.memory_space<vmem>>, vector<1x1x32xf32>
    %157 = vector.shape_cast %156 : vector<1x1x32xf32> to vector<1x32xf32>
    %158 = vector.broadcast %157 : vector<1x32xf32> to vector<16x32xf32>
    %159 = arith.mulf %155, %158 : vector<16x32xf32>
    %160 = arith.addf %148, %159 : vector<16x32xf32>
    %161 = vector.extract_strided_slice %131 {offsets = [32, 0], sizes = [16, 32], strides = [1, 1]} : vector<128x32xf32> to vector<16x32xf32>
    %c0_73 = arith.constant 0 : index
    %c2_74 = arith.constant 2 : index
    %c0_75 = arith.constant 0 : index
    %162 = vector.load %arg8[%c0_73, %c2_74, %c0_75] : memref<3x8x32xf32, #tpu.memory_space<vmem>>, vector<1x1x32xf32>
    %163 = vector.shape_cast %162 : vector<1x1x32xf32> to vector<1x32xf32>
    %164 = vector.broadcast %163 : vector<1x32xf32> to vector<16x32xf32>
    %165 = arith.mulf %161, %164 : vector<16x32xf32>
    %166 = arith.addf %154, %165 : vector<16x32xf32>
    %167 = vector.extract_strided_slice %132 {offsets = [32, 0], sizes = [16, 32], strides = [1, 1]} : vector<128x32xf32> to vector<16x32xf32>
    %c0_76 = arith.constant 0 : index
    %c2_77 = arith.constant 2 : index
    %c0_78 = arith.constant 0 : index
    %168 = vector.load %arg10[%c0_76, %c2_77, %c0_78] : memref<3x8x32xf32, #tpu.memory_space<vmem>>, vector<1x1x32xf32>
    %169 = vector.shape_cast %168 : vector<1x1x32xf32> to vector<1x32xf32>
    %170 = vector.broadcast %169 : vector<1x32xf32> to vector<16x32xf32>
    %171 = arith.mulf %167, %170 : vector<16x32xf32>
    %172 = arith.addf %160, %171 : vector<16x32xf32>
    %173 = vector.extract_strided_slice %131 {offsets = [48, 0], sizes = [16, 32], strides = [1, 1]} : vector<128x32xf32> to vector<16x32xf32>
    %c0_79 = arith.constant 0 : index
    %c3_80 = arith.constant 3 : index
    %c0_81 = arith.constant 0 : index
    %174 = vector.load %arg8[%c0_79, %c3_80, %c0_81] : memref<3x8x32xf32, #tpu.memory_space<vmem>>, vector<1x1x32xf32>
    %175 = vector.shape_cast %174 : vector<1x1x32xf32> to vector<1x32xf32>
    %176 = vector.broadcast %175 : vector<1x32xf32> to vector<16x32xf32>
    %177 = arith.mulf %173, %176 : vector<16x32xf32>
    %178 = arith.addf %166, %177 : vector<16x32xf32>
    %179 = vector.extract_strided_slice %132 {offsets = [48, 0], sizes = [16, 32], strides = [1, 1]} : vector<128x32xf32> to vector<16x32xf32>
    %c0_82 = arith.constant 0 : index
    %c3_83 = arith.constant 3 : index
    %c0_84 = arith.constant 0 : index
    %180 = vector.load %arg10[%c0_82, %c3_83, %c0_84] : memref<3x8x32xf32, #tpu.memory_space<vmem>>, vector<1x1x32xf32>
    %181 = vector.shape_cast %180 : vector<1x1x32xf32> to vector<1x32xf32>
    %182 = vector.broadcast %181 : vector<1x32xf32> to vector<16x32xf32>
    %183 = arith.mulf %179, %182 : vector<16x32xf32>
    %184 = arith.addf %172, %183 : vector<16x32xf32>
    %185 = vector.extract_strided_slice %131 {offsets = [64, 0], sizes = [16, 32], strides = [1, 1]} : vector<128x32xf32> to vector<16x32xf32>
    %c0_85 = arith.constant 0 : index
    %c4_86 = arith.constant 4 : index
    %c0_87 = arith.constant 0 : index
    %186 = vector.load %arg8[%c0_85, %c4_86, %c0_87] : memref<3x8x32xf32, #tpu.memory_space<vmem>>, vector<1x1x32xf32>
    %187 = vector.shape_cast %186 : vector<1x1x32xf32> to vector<1x32xf32>
    %188 = vector.broadcast %187 : vector<1x32xf32> to vector<16x32xf32>
    %189 = arith.mulf %185, %188 : vector<16x32xf32>
    %190 = arith.addf %178, %189 : vector<16x32xf32>
    %191 = vector.extract_strided_slice %132 {offsets = [64, 0], sizes = [16, 32], strides = [1, 1]} : vector<128x32xf32> to vector<16x32xf32>
    %c0_88 = arith.constant 0 : index
    %c4_89 = arith.constant 4 : index
    %c0_90 = arith.constant 0 : index
    %192 = vector.load %arg10[%c0_88, %c4_89, %c0_90] : memref<3x8x32xf32, #tpu.memory_space<vmem>>, vector<1x1x32xf32>
    %193 = vector.shape_cast %192 : vector<1x1x32xf32> to vector<1x32xf32>
    %194 = vector.broadcast %193 : vector<1x32xf32> to vector<16x32xf32>
    %195 = arith.mulf %191, %194 : vector<16x32xf32>
    %196 = arith.addf %184, %195 : vector<16x32xf32>
    %197 = vector.extract_strided_slice %131 {offsets = [80, 0], sizes = [16, 32], strides = [1, 1]} : vector<128x32xf32> to vector<16x32xf32>
    %c0_91 = arith.constant 0 : index
    %c5_92 = arith.constant 5 : index
    %c0_93 = arith.constant 0 : index
    %198 = vector.load %arg8[%c0_91, %c5_92, %c0_93] : memref<3x8x32xf32, #tpu.memory_space<vmem>>, vector<1x1x32xf32>
    %199 = vector.shape_cast %198 : vector<1x1x32xf32> to vector<1x32xf32>
    %200 = vector.broadcast %199 : vector<1x32xf32> to vector<16x32xf32>
    %201 = arith.mulf %197, %200 : vector<16x32xf32>
    %202 = arith.addf %190, %201 : vector<16x32xf32>
    %203 = vector.extract_strided_slice %132 {offsets = [80, 0], sizes = [16, 32], strides = [1, 1]} : vector<128x32xf32> to vector<16x32xf32>
    %c0_94 = arith.constant 0 : index
    %c5_95 = arith.constant 5 : index
    %c0_96 = arith.constant 0 : index
    %204 = vector.load %arg10[%c0_94, %c5_95, %c0_96] : memref<3x8x32xf32, #tpu.memory_space<vmem>>, vector<1x1x32xf32>
    %205 = vector.shape_cast %204 : vector<1x1x32xf32> to vector<1x32xf32>
    %206 = vector.broadcast %205 : vector<1x32xf32> to vector<16x32xf32>
    %207 = arith.mulf %203, %206 : vector<16x32xf32>
    %208 = arith.addf %196, %207 : vector<16x32xf32>
    %209 = vector.extract_strided_slice %131 {offsets = [96, 0], sizes = [16, 32], strides = [1, 1]} : vector<128x32xf32> to vector<16x32xf32>
    %c0_97 = arith.constant 0 : index
    %c6_98 = arith.constant 6 : index
    %c0_99 = arith.constant 0 : index
    %210 = vector.load %arg8[%c0_97, %c6_98, %c0_99] : memref<3x8x32xf32, #tpu.memory_space<vmem>>, vector<1x1x32xf32>
    %211 = vector.shape_cast %210 : vector<1x1x32xf32> to vector<1x32xf32>
    %212 = vector.broadcast %211 : vector<1x32xf32> to vector<16x32xf32>
    %213 = arith.mulf %209, %212 : vector<16x32xf32>
    %214 = arith.addf %202, %213 : vector<16x32xf32>
    %215 = vector.extract_strided_slice %132 {offsets = [96, 0], sizes = [16, 32], strides = [1, 1]} : vector<128x32xf32> to vector<16x32xf32>
    %c0_100 = arith.constant 0 : index
    %c6_101 = arith.constant 6 : index
    %c0_102 = arith.constant 0 : index
    %216 = vector.load %arg10[%c0_100, %c6_101, %c0_102] : memref<3x8x32xf32, #tpu.memory_space<vmem>>, vector<1x1x32xf32>
    %217 = vector.shape_cast %216 : vector<1x1x32xf32> to vector<1x32xf32>
    %218 = vector.broadcast %217 : vector<1x32xf32> to vector<16x32xf32>
    %219 = arith.mulf %215, %218 : vector<16x32xf32>
    %220 = arith.addf %208, %219 : vector<16x32xf32>
    %221 = vector.extract_strided_slice %131 {offsets = [112, 0], sizes = [16, 32], strides = [1, 1]} : vector<128x32xf32> to vector<16x32xf32>
    %c0_103 = arith.constant 0 : index
    %c7_104 = arith.constant 7 : index
    %c0_105 = arith.constant 0 : index
    %222 = vector.load %arg8[%c0_103, %c7_104, %c0_105] : memref<3x8x32xf32, #tpu.memory_space<vmem>>, vector<1x1x32xf32>
    %223 = vector.shape_cast %222 : vector<1x1x32xf32> to vector<1x32xf32>
    %224 = vector.broadcast %223 : vector<1x32xf32> to vector<16x32xf32>
    %225 = arith.mulf %221, %224 : vector<16x32xf32>
    %226 = arith.addf %214, %225 : vector<16x32xf32>
    %227 = vector.extract_strided_slice %132 {offsets = [112, 0], sizes = [16, 32], strides = [1, 1]} : vector<128x32xf32> to vector<16x32xf32>
    %c0_106 = arith.constant 0 : index
    %c7_107 = arith.constant 7 : index
    %c0_108 = arith.constant 0 : index
    %228 = vector.load %arg10[%c0_106, %c7_107, %c0_108] : memref<3x8x32xf32, #tpu.memory_space<vmem>>, vector<1x1x32xf32>
    %229 = vector.shape_cast %228 : vector<1x1x32xf32> to vector<1x32xf32>
    %230 = vector.broadcast %229 : vector<1x32xf32> to vector<16x32xf32>
    %231 = arith.mulf %227, %230 : vector<16x32xf32>
    %232 = arith.addf %220, %231 : vector<16x32xf32>
    %c0_109 = arith.constant 0 : index
    %c0_110 = arith.constant 0 : index
    %c0_111 = arith.constant 0 : index
    %233 = vector.load %arg12[%c0_109, %c0_110, %c0_111] : memref<3x32x32xf32, #tpu.memory_space<vmem>>, vector<1x32x32xf32>
    %234 = vector.shape_cast %233 : vector<1x32x32xf32> to vector<32x32xf32>
    %cst_112 = arith.constant dense<0.000000e+00> : vector<16x32xf32>
    %235 = tpu.matmul %226, %234, %cst_112 {dimension_numbers = #tpu.dot_dimension_numbers<[1], [0], [0], [1], [0, 0, 1, 1], [], []>} : vector<16x32xf32>, vector<32x32xf32>, vector<16x32xf32> -> vector<16x32xf32>
    %c0_113 = arith.constant 0 : index
    %c0_114 = arith.constant 0 : index
    %c0_115 = arith.constant 0 : index
    %236 = vector.load %arg13[%c0_113, %c0_114, %c0_115] : memref<3x1x32xf32, #tpu.memory_space<vmem>>, vector<1x1x32xf32>
    %237 = vector.shape_cast %236 : vector<1x1x32xf32> to vector<1x32xf32>
    %238 = vector.broadcast %237 : vector<1x32xf32> to vector<16x32xf32>
    %239 = arith.addf %235, %238 : vector<16x32xf32>
    %cst_116 = arith.constant 0.000000e+00 : f32
    %240 = vector.broadcast %cst_116 : f32 to vector<16x32xf32>
    %241 = arith.maximumf %239, %240 : vector<16x32xf32>
    %c0_117 = arith.constant 0 : index
    %c0_118 = arith.constant 0 : index
    %c0_119 = arith.constant 0 : index
    %242 = vector.load %arg14[%c0_117, %c0_118, %c0_119] : memref<3x32x32xf32, #tpu.memory_space<vmem>>, vector<1x32x32xf32>
    %243 = vector.shape_cast %242 : vector<1x32x32xf32> to vector<32x32xf32>
    %cst_120 = arith.constant dense<0.000000e+00> : vector<16x32xf32>
    %244 = tpu.matmul %232, %243, %cst_120 {dimension_numbers = #tpu.dot_dimension_numbers<[1], [0], [0], [1], [0, 0, 1, 1], [], []>} : vector<16x32xf32>, vector<32x32xf32>, vector<16x32xf32> -> vector<16x32xf32>
    %c0_121 = arith.constant 0 : index
    %c0_122 = arith.constant 0 : index
    %c0_123 = arith.constant 0 : index
    %245 = vector.load %arg15[%c0_121, %c0_122, %c0_123] : memref<3x1x32xf32, #tpu.memory_space<vmem>>, vector<1x1x32xf32>
    %246 = vector.shape_cast %245 : vector<1x1x32xf32> to vector<1x32xf32>
    %247 = vector.broadcast %246 : vector<1x32xf32> to vector<16x32xf32>
    %248 = arith.addf %244, %247 : vector<16x32xf32>
    %cst_124 = arith.constant 0.000000e+00 : f32
    %249 = vector.broadcast %cst_124 : f32 to vector<16x32xf32>
    %250 = arith.maximumf %248, %249 : vector<16x32xf32>
    %251 = arith.addf %241, %250 : vector<16x32xf32>
    %252 = arith.addf %251, %4 : vector<16x32xf32>
    %cst_125 = arith.constant dense<0.000000e+00> : vector<128x32xf32>
    %253 = tpu.matmul %97, %252, %cst_125 {dimension_numbers = #tpu.dot_dimension_numbers<[1], [0], [0], [1], [0, 0, 1, 1], [], []>} : vector<128x16xf32>, vector<16x32xf32>, vector<128x32xf32> -> vector<128x32xf32>
    %cst_126 = arith.constant dense<0.000000e+00> : vector<128x32xf32>
    %254 = tpu.matmul %103, %252, %cst_126 {dimension_numbers = #tpu.dot_dimension_numbers<[1], [0], [0], [1], [0, 0, 1, 1], [], []>} : vector<128x16xf32>, vector<16x32xf32>, vector<128x32xf32> -> vector<128x32xf32>
    %c1_127 = arith.constant 1 : index
    %c0_128 = arith.constant 0 : index
    %c0_129 = arith.constant 0 : index
    %255 = vector.load %arg9[%c1_127, %c0_128, %c0_129] : memref<3x1x32xf32, #tpu.memory_space<vmem>>, vector<1x1x32xf32>
    %256 = vector.shape_cast %255 : vector<1x1x32xf32> to vector<1x32xf32>
    %c1_130 = arith.constant 1 : index
    %c0_131 = arith.constant 0 : index
    %c0_132 = arith.constant 0 : index
    %257 = vector.load %arg11[%c1_130, %c0_131, %c0_132] : memref<3x1x32xf32, #tpu.memory_space<vmem>>, vector<1x1x32xf32>
    %258 = vector.shape_cast %257 : vector<1x1x32xf32> to vector<1x32xf32>
    %259 = vector.extract_strided_slice %253 {offsets = [0, 0], sizes = [16, 32], strides = [1, 1]} : vector<128x32xf32> to vector<16x32xf32>
    %c1_133 = arith.constant 1 : index
    %c0_134 = arith.constant 0 : index
    %c0_135 = arith.constant 0 : index
    %260 = vector.load %arg8[%c1_133, %c0_134, %c0_135] : memref<3x8x32xf32, #tpu.memory_space<vmem>>, vector<1x1x32xf32>
    %261 = vector.shape_cast %260 : vector<1x1x32xf32> to vector<1x32xf32>
    %262 = vector.broadcast %261 : vector<1x32xf32> to vector<16x32xf32>
    %263 = arith.mulf %259, %262 : vector<16x32xf32>
    %264 = vector.broadcast %256 : vector<1x32xf32> to vector<16x32xf32>
    %265 = arith.addf %264, %263 : vector<16x32xf32>
    %266 = vector.extract_strided_slice %254 {offsets = [0, 0], sizes = [16, 32], strides = [1, 1]} : vector<128x32xf32> to vector<16x32xf32>
    %c1_136 = arith.constant 1 : index
    %c0_137 = arith.constant 0 : index
    %c0_138 = arith.constant 0 : index
    %267 = vector.load %arg10[%c1_136, %c0_137, %c0_138] : memref<3x8x32xf32, #tpu.memory_space<vmem>>, vector<1x1x32xf32>
    %268 = vector.shape_cast %267 : vector<1x1x32xf32> to vector<1x32xf32>
    %269 = vector.broadcast %268 : vector<1x32xf32> to vector<16x32xf32>
    %270 = arith.mulf %266, %269 : vector<16x32xf32>
    %271 = vector.broadcast %258 : vector<1x32xf32> to vector<16x32xf32>
    %272 = arith.addf %271, %270 : vector<16x32xf32>
    %273 = vector.extract_strided_slice %253 {offsets = [16, 0], sizes = [16, 32], strides = [1, 1]} : vector<128x32xf32> to vector<16x32xf32>
    %c1_139 = arith.constant 1 : index
    %c1_140 = arith.constant 1 : index
    %c0_141 = arith.constant 0 : index
    %274 = vector.load %arg8[%c1_139, %c1_140, %c0_141] : memref<3x8x32xf32, #tpu.memory_space<vmem>>, vector<1x1x32xf32>
    %275 = vector.shape_cast %274 : vector<1x1x32xf32> to vector<1x32xf32>
    %276 = vector.broadcast %275 : vector<1x32xf32> to vector<16x32xf32>
    %277 = arith.mulf %273, %276 : vector<16x32xf32>
    %278 = arith.addf %265, %277 : vector<16x32xf32>
    %279 = vector.extract_strided_slice %254 {offsets = [16, 0], sizes = [16, 32], strides = [1, 1]} : vector<128x32xf32> to vector<16x32xf32>
    %c1_142 = arith.constant 1 : index
    %c1_143 = arith.constant 1 : index
    %c0_144 = arith.constant 0 : index
    %280 = vector.load %arg10[%c1_142, %c1_143, %c0_144] : memref<3x8x32xf32, #tpu.memory_space<vmem>>, vector<1x1x32xf32>
    %281 = vector.shape_cast %280 : vector<1x1x32xf32> to vector<1x32xf32>
    %282 = vector.broadcast %281 : vector<1x32xf32> to vector<16x32xf32>
    %283 = arith.mulf %279, %282 : vector<16x32xf32>
    %284 = arith.addf %272, %283 : vector<16x32xf32>
    %285 = vector.extract_strided_slice %253 {offsets = [32, 0], sizes = [16, 32], strides = [1, 1]} : vector<128x32xf32> to vector<16x32xf32>
    %c1_145 = arith.constant 1 : index
    %c2_146 = arith.constant 2 : index
    %c0_147 = arith.constant 0 : index
    %286 = vector.load %arg8[%c1_145, %c2_146, %c0_147] : memref<3x8x32xf32, #tpu.memory_space<vmem>>, vector<1x1x32xf32>
    %287 = vector.shape_cast %286 : vector<1x1x32xf32> to vector<1x32xf32>
    %288 = vector.broadcast %287 : vector<1x32xf32> to vector<16x32xf32>
    %289 = arith.mulf %285, %288 : vector<16x32xf32>
    %290 = arith.addf %278, %289 : vector<16x32xf32>
    %291 = vector.extract_strided_slice %254 {offsets = [32, 0], sizes = [16, 32], strides = [1, 1]} : vector<128x32xf32> to vector<16x32xf32>
    %c1_148 = arith.constant 1 : index
    %c2_149 = arith.constant 2 : index
    %c0_150 = arith.constant 0 : index
    %292 = vector.load %arg10[%c1_148, %c2_149, %c0_150] : memref<3x8x32xf32, #tpu.memory_space<vmem>>, vector<1x1x32xf32>
    %293 = vector.shape_cast %292 : vector<1x1x32xf32> to vector<1x32xf32>
    %294 = vector.broadcast %293 : vector<1x32xf32> to vector<16x32xf32>
    %295 = arith.mulf %291, %294 : vector<16x32xf32>
    %296 = arith.addf %284, %295 : vector<16x32xf32>
    %297 = vector.extract_strided_slice %253 {offsets = [48, 0], sizes = [16, 32], strides = [1, 1]} : vector<128x32xf32> to vector<16x32xf32>
    %c1_151 = arith.constant 1 : index
    %c3_152 = arith.constant 3 : index
    %c0_153 = arith.constant 0 : index
    %298 = vector.load %arg8[%c1_151, %c3_152, %c0_153] : memref<3x8x32xf32, #tpu.memory_space<vmem>>, vector<1x1x32xf32>
    %299 = vector.shape_cast %298 : vector<1x1x32xf32> to vector<1x32xf32>
    %300 = vector.broadcast %299 : vector<1x32xf32> to vector<16x32xf32>
    %301 = arith.mulf %297, %300 : vector<16x32xf32>
    %302 = arith.addf %290, %301 : vector<16x32xf32>
    %303 = vector.extract_strided_slice %254 {offsets = [48, 0], sizes = [16, 32], strides = [1, 1]} : vector<128x32xf32> to vector<16x32xf32>
    %c1_154 = arith.constant 1 : index
    %c3_155 = arith.constant 3 : index
    %c0_156 = arith.constant 0 : index
    %304 = vector.load %arg10[%c1_154, %c3_155, %c0_156] : memref<3x8x32xf32, #tpu.memory_space<vmem>>, vector<1x1x32xf32>
    %305 = vector.shape_cast %304 : vector<1x1x32xf32> to vector<1x32xf32>
    %306 = vector.broadcast %305 : vector<1x32xf32> to vector<16x32xf32>
    %307 = arith.mulf %303, %306 : vector<16x32xf32>
    %308 = arith.addf %296, %307 : vector<16x32xf32>
    %309 = vector.extract_strided_slice %253 {offsets = [64, 0], sizes = [16, 32], strides = [1, 1]} : vector<128x32xf32> to vector<16x32xf32>
    %c1_157 = arith.constant 1 : index
    %c4_158 = arith.constant 4 : index
    %c0_159 = arith.constant 0 : index
    %310 = vector.load %arg8[%c1_157, %c4_158, %c0_159] : memref<3x8x32xf32, #tpu.memory_space<vmem>>, vector<1x1x32xf32>
    %311 = vector.shape_cast %310 : vector<1x1x32xf32> to vector<1x32xf32>
    %312 = vector.broadcast %311 : vector<1x32xf32> to vector<16x32xf32>
    %313 = arith.mulf %309, %312 : vector<16x32xf32>
    %314 = arith.addf %302, %313 : vector<16x32xf32>
    %315 = vector.extract_strided_slice %254 {offsets = [64, 0], sizes = [16, 32], strides = [1, 1]} : vector<128x32xf32> to vector<16x32xf32>
    %c1_160 = arith.constant 1 : index
    %c4_161 = arith.constant 4 : index
    %c0_162 = arith.constant 0 : index
    %316 = vector.load %arg10[%c1_160, %c4_161, %c0_162] : memref<3x8x32xf32, #tpu.memory_space<vmem>>, vector<1x1x32xf32>
    %317 = vector.shape_cast %316 : vector<1x1x32xf32> to vector<1x32xf32>
    %318 = vector.broadcast %317 : vector<1x32xf32> to vector<16x32xf32>
    %319 = arith.mulf %315, %318 : vector<16x32xf32>
    %320 = arith.addf %308, %319 : vector<16x32xf32>
    %321 = vector.extract_strided_slice %253 {offsets = [80, 0], sizes = [16, 32], strides = [1, 1]} : vector<128x32xf32> to vector<16x32xf32>
    %c1_163 = arith.constant 1 : index
    %c5_164 = arith.constant 5 : index
    %c0_165 = arith.constant 0 : index
    %322 = vector.load %arg8[%c1_163, %c5_164, %c0_165] : memref<3x8x32xf32, #tpu.memory_space<vmem>>, vector<1x1x32xf32>
    %323 = vector.shape_cast %322 : vector<1x1x32xf32> to vector<1x32xf32>
    %324 = vector.broadcast %323 : vector<1x32xf32> to vector<16x32xf32>
    %325 = arith.mulf %321, %324 : vector<16x32xf32>
    %326 = arith.addf %314, %325 : vector<16x32xf32>
    %327 = vector.extract_strided_slice %254 {offsets = [80, 0], sizes = [16, 32], strides = [1, 1]} : vector<128x32xf32> to vector<16x32xf32>
    %c1_166 = arith.constant 1 : index
    %c5_167 = arith.constant 5 : index
    %c0_168 = arith.constant 0 : index
    %328 = vector.load %arg10[%c1_166, %c5_167, %c0_168] : memref<3x8x32xf32, #tpu.memory_space<vmem>>, vector<1x1x32xf32>
    %329 = vector.shape_cast %328 : vector<1x1x32xf32> to vector<1x32xf32>
    %330 = vector.broadcast %329 : vector<1x32xf32> to vector<16x32xf32>
    %331 = arith.mulf %327, %330 : vector<16x32xf32>
    %332 = arith.addf %320, %331 : vector<16x32xf32>
    %333 = vector.extract_strided_slice %253 {offsets = [96, 0], sizes = [16, 32], strides = [1, 1]} : vector<128x32xf32> to vector<16x32xf32>
    %c1_169 = arith.constant 1 : index
    %c6_170 = arith.constant 6 : index
    %c0_171 = arith.constant 0 : index
    %334 = vector.load %arg8[%c1_169, %c6_170, %c0_171] : memref<3x8x32xf32, #tpu.memory_space<vmem>>, vector<1x1x32xf32>
    %335 = vector.shape_cast %334 : vector<1x1x32xf32> to vector<1x32xf32>
    %336 = vector.broadcast %335 : vector<1x32xf32> to vector<16x32xf32>
    %337 = arith.mulf %333, %336 : vector<16x32xf32>
    %338 = arith.addf %326, %337 : vector<16x32xf32>
    %339 = vector.extract_strided_slice %254 {offsets = [96, 0], sizes = [16, 32], strides = [1, 1]} : vector<128x32xf32> to vector<16x32xf32>
    %c1_172 = arith.constant 1 : index
    %c6_173 = arith.constant 6 : index
    %c0_174 = arith.constant 0 : index
    %340 = vector.load %arg10[%c1_172, %c6_173, %c0_174] : memref<3x8x32xf32, #tpu.memory_space<vmem>>, vector<1x1x32xf32>
    %341 = vector.shape_cast %340 : vector<1x1x32xf32> to vector<1x32xf32>
    %342 = vector.broadcast %341 : vector<1x32xf32> to vector<16x32xf32>
    %343 = arith.mulf %339, %342 : vector<16x32xf32>
    %344 = arith.addf %332, %343 : vector<16x32xf32>
    %345 = vector.extract_strided_slice %253 {offsets = [112, 0], sizes = [16, 32], strides = [1, 1]} : vector<128x32xf32> to vector<16x32xf32>
    %c1_175 = arith.constant 1 : index
    %c7_176 = arith.constant 7 : index
    %c0_177 = arith.constant 0 : index
    %346 = vector.load %arg8[%c1_175, %c7_176, %c0_177] : memref<3x8x32xf32, #tpu.memory_space<vmem>>, vector<1x1x32xf32>
    %347 = vector.shape_cast %346 : vector<1x1x32xf32> to vector<1x32xf32>
    %348 = vector.broadcast %347 : vector<1x32xf32> to vector<16x32xf32>
    %349 = arith.mulf %345, %348 : vector<16x32xf32>
    %350 = arith.addf %338, %349 : vector<16x32xf32>
    %351 = vector.extract_strided_slice %254 {offsets = [112, 0], sizes = [16, 32], strides = [1, 1]} : vector<128x32xf32> to vector<16x32xf32>
    %c1_178 = arith.constant 1 : index
    %c7_179 = arith.constant 7 : index
    %c0_180 = arith.constant 0 : index
    %352 = vector.load %arg10[%c1_178, %c7_179, %c0_180] : memref<3x8x32xf32, #tpu.memory_space<vmem>>, vector<1x1x32xf32>
    %353 = vector.shape_cast %352 : vector<1x1x32xf32> to vector<1x32xf32>
    %354 = vector.broadcast %353 : vector<1x32xf32> to vector<16x32xf32>
    %355 = arith.mulf %351, %354 : vector<16x32xf32>
    %356 = arith.addf %344, %355 : vector<16x32xf32>
    %c1_181 = arith.constant 1 : index
    %c0_182 = arith.constant 0 : index
    %c0_183 = arith.constant 0 : index
    %357 = vector.load %arg12[%c1_181, %c0_182, %c0_183] : memref<3x32x32xf32, #tpu.memory_space<vmem>>, vector<1x32x32xf32>
    %358 = vector.shape_cast %357 : vector<1x32x32xf32> to vector<32x32xf32>
    %cst_184 = arith.constant dense<0.000000e+00> : vector<16x32xf32>
    %359 = tpu.matmul %350, %358, %cst_184 {dimension_numbers = #tpu.dot_dimension_numbers<[1], [0], [0], [1], [0, 0, 1, 1], [], []>} : vector<16x32xf32>, vector<32x32xf32>, vector<16x32xf32> -> vector<16x32xf32>
    %c1_185 = arith.constant 1 : index
    %c0_186 = arith.constant 0 : index
    %c0_187 = arith.constant 0 : index
    %360 = vector.load %arg13[%c1_185, %c0_186, %c0_187] : memref<3x1x32xf32, #tpu.memory_space<vmem>>, vector<1x1x32xf32>
    %361 = vector.shape_cast %360 : vector<1x1x32xf32> to vector<1x32xf32>
    %362 = vector.broadcast %361 : vector<1x32xf32> to vector<16x32xf32>
    %363 = arith.addf %359, %362 : vector<16x32xf32>
    %cst_188 = arith.constant 0.000000e+00 : f32
    %364 = vector.broadcast %cst_188 : f32 to vector<16x32xf32>
    %365 = arith.maximumf %363, %364 : vector<16x32xf32>
    %c1_189 = arith.constant 1 : index
    %c0_190 = arith.constant 0 : index
    %c0_191 = arith.constant 0 : index
    %366 = vector.load %arg14[%c1_189, %c0_190, %c0_191] : memref<3x32x32xf32, #tpu.memory_space<vmem>>, vector<1x32x32xf32>
    %367 = vector.shape_cast %366 : vector<1x32x32xf32> to vector<32x32xf32>
    %cst_192 = arith.constant dense<0.000000e+00> : vector<16x32xf32>
    %368 = tpu.matmul %356, %367, %cst_192 {dimension_numbers = #tpu.dot_dimension_numbers<[1], [0], [0], [1], [0, 0, 1, 1], [], []>} : vector<16x32xf32>, vector<32x32xf32>, vector<16x32xf32> -> vector<16x32xf32>
    %c1_193 = arith.constant 1 : index
    %c0_194 = arith.constant 0 : index
    %c0_195 = arith.constant 0 : index
    %369 = vector.load %arg15[%c1_193, %c0_194, %c0_195] : memref<3x1x32xf32, #tpu.memory_space<vmem>>, vector<1x1x32xf32>
    %370 = vector.shape_cast %369 : vector<1x1x32xf32> to vector<1x32xf32>
    %371 = vector.broadcast %370 : vector<1x32xf32> to vector<16x32xf32>
    %372 = arith.addf %368, %371 : vector<16x32xf32>
    %cst_196 = arith.constant 0.000000e+00 : f32
    %373 = vector.broadcast %cst_196 : f32 to vector<16x32xf32>
    %374 = arith.maximumf %372, %373 : vector<16x32xf32>
    %375 = arith.addf %365, %374 : vector<16x32xf32>
    %376 = arith.addf %375, %252 : vector<16x32xf32>
    %cst_197 = arith.constant dense<0.000000e+00> : vector<128x32xf32>
    %377 = tpu.matmul %97, %376, %cst_197 {dimension_numbers = #tpu.dot_dimension_numbers<[1], [0], [0], [1], [0, 0, 1, 1], [], []>} : vector<128x16xf32>, vector<16x32xf32>, vector<128x32xf32> -> vector<128x32xf32>
    %cst_198 = arith.constant dense<0.000000e+00> : vector<128x32xf32>
    %378 = tpu.matmul %103, %376, %cst_198 {dimension_numbers = #tpu.dot_dimension_numbers<[1], [0], [0], [1], [0, 0, 1, 1], [], []>} : vector<128x16xf32>, vector<16x32xf32>, vector<128x32xf32> -> vector<128x32xf32>
    %c2_199 = arith.constant 2 : index
    %c0_200 = arith.constant 0 : index
    %c0_201 = arith.constant 0 : index
    %379 = vector.load %arg9[%c2_199, %c0_200, %c0_201] : memref<3x1x32xf32, #tpu.memory_space<vmem>>, vector<1x1x32xf32>
    %380 = vector.shape_cast %379 : vector<1x1x32xf32> to vector<1x32xf32>
    %c2_202 = arith.constant 2 : index
    %c0_203 = arith.constant 0 : index
    %c0_204 = arith.constant 0 : index
    %381 = vector.load %arg11[%c2_202, %c0_203, %c0_204] : memref<3x1x32xf32, #tpu.memory_space<vmem>>, vector<1x1x32xf32>
    %382 = vector.shape_cast %381 : vector<1x1x32xf32> to vector<1x32xf32>
    %383 = vector.extract_strided_slice %377 {offsets = [0, 0], sizes = [16, 32], strides = [1, 1]} : vector<128x32xf32> to vector<16x32xf32>
    %c2_205 = arith.constant 2 : index
    %c0_206 = arith.constant 0 : index
    %c0_207 = arith.constant 0 : index
    %384 = vector.load %arg8[%c2_205, %c0_206, %c0_207] : memref<3x8x32xf32, #tpu.memory_space<vmem>>, vector<1x1x32xf32>
    %385 = vector.shape_cast %384 : vector<1x1x32xf32> to vector<1x32xf32>
    %386 = vector.broadcast %385 : vector<1x32xf32> to vector<16x32xf32>
    %387 = arith.mulf %383, %386 : vector<16x32xf32>
    %388 = vector.broadcast %380 : vector<1x32xf32> to vector<16x32xf32>
    %389 = arith.addf %388, %387 : vector<16x32xf32>
    %390 = vector.extract_strided_slice %378 {offsets = [0, 0], sizes = [16, 32], strides = [1, 1]} : vector<128x32xf32> to vector<16x32xf32>
    %c2_208 = arith.constant 2 : index
    %c0_209 = arith.constant 0 : index
    %c0_210 = arith.constant 0 : index
    %391 = vector.load %arg10[%c2_208, %c0_209, %c0_210] : memref<3x8x32xf32, #tpu.memory_space<vmem>>, vector<1x1x32xf32>
    %392 = vector.shape_cast %391 : vector<1x1x32xf32> to vector<1x32xf32>
    %393 = vector.broadcast %392 : vector<1x32xf32> to vector<16x32xf32>
    %394 = arith.mulf %390, %393 : vector<16x32xf32>
    %395 = vector.broadcast %382 : vector<1x32xf32> to vector<16x32xf32>
    %396 = arith.addf %395, %394 : vector<16x32xf32>
    %397 = vector.extract_strided_slice %377 {offsets = [16, 0], sizes = [16, 32], strides = [1, 1]} : vector<128x32xf32> to vector<16x32xf32>
    %c2_211 = arith.constant 2 : index
    %c1_212 = arith.constant 1 : index
    %c0_213 = arith.constant 0 : index
    %398 = vector.load %arg8[%c2_211, %c1_212, %c0_213] : memref<3x8x32xf32, #tpu.memory_space<vmem>>, vector<1x1x32xf32>
    %399 = vector.shape_cast %398 : vector<1x1x32xf32> to vector<1x32xf32>
    %400 = vector.broadcast %399 : vector<1x32xf32> to vector<16x32xf32>
    %401 = arith.mulf %397, %400 : vector<16x32xf32>
    %402 = arith.addf %389, %401 : vector<16x32xf32>
    %403 = vector.extract_strided_slice %378 {offsets = [16, 0], sizes = [16, 32], strides = [1, 1]} : vector<128x32xf32> to vector<16x32xf32>
    %c2_214 = arith.constant 2 : index
    %c1_215 = arith.constant 1 : index
    %c0_216 = arith.constant 0 : index
    %404 = vector.load %arg10[%c2_214, %c1_215, %c0_216] : memref<3x8x32xf32, #tpu.memory_space<vmem>>, vector<1x1x32xf32>
    %405 = vector.shape_cast %404 : vector<1x1x32xf32> to vector<1x32xf32>
    %406 = vector.broadcast %405 : vector<1x32xf32> to vector<16x32xf32>
    %407 = arith.mulf %403, %406 : vector<16x32xf32>
    %408 = arith.addf %396, %407 : vector<16x32xf32>
    %409 = vector.extract_strided_slice %377 {offsets = [32, 0], sizes = [16, 32], strides = [1, 1]} : vector<128x32xf32> to vector<16x32xf32>
    %c2_217 = arith.constant 2 : index
    %c2_218 = arith.constant 2 : index
    %c0_219 = arith.constant 0 : index
    %410 = vector.load %arg8[%c2_217, %c2_218, %c0_219] : memref<3x8x32xf32, #tpu.memory_space<vmem>>, vector<1x1x32xf32>
    %411 = vector.shape_cast %410 : vector<1x1x32xf32> to vector<1x32xf32>
    %412 = vector.broadcast %411 : vector<1x32xf32> to vector<16x32xf32>
    %413 = arith.mulf %409, %412 : vector<16x32xf32>
    %414 = arith.addf %402, %413 : vector<16x32xf32>
    %415 = vector.extract_strided_slice %378 {offsets = [32, 0], sizes = [16, 32], strides = [1, 1]} : vector<128x32xf32> to vector<16x32xf32>
    %c2_220 = arith.constant 2 : index
    %c2_221 = arith.constant 2 : index
    %c0_222 = arith.constant 0 : index
    %416 = vector.load %arg10[%c2_220, %c2_221, %c0_222] : memref<3x8x32xf32, #tpu.memory_space<vmem>>, vector<1x1x32xf32>
    %417 = vector.shape_cast %416 : vector<1x1x32xf32> to vector<1x32xf32>
    %418 = vector.broadcast %417 : vector<1x32xf32> to vector<16x32xf32>
    %419 = arith.mulf %415, %418 : vector<16x32xf32>
    %420 = arith.addf %408, %419 : vector<16x32xf32>
    %421 = vector.extract_strided_slice %377 {offsets = [48, 0], sizes = [16, 32], strides = [1, 1]} : vector<128x32xf32> to vector<16x32xf32>
    %c2_223 = arith.constant 2 : index
    %c3_224 = arith.constant 3 : index
    %c0_225 = arith.constant 0 : index
    %422 = vector.load %arg8[%c2_223, %c3_224, %c0_225] : memref<3x8x32xf32, #tpu.memory_space<vmem>>, vector<1x1x32xf32>
    %423 = vector.shape_cast %422 : vector<1x1x32xf32> to vector<1x32xf32>
    %424 = vector.broadcast %423 : vector<1x32xf32> to vector<16x32xf32>
    %425 = arith.mulf %421, %424 : vector<16x32xf32>
    %426 = arith.addf %414, %425 : vector<16x32xf32>
    %427 = vector.extract_strided_slice %378 {offsets = [48, 0], sizes = [16, 32], strides = [1, 1]} : vector<128x32xf32> to vector<16x32xf32>
    %c2_226 = arith.constant 2 : index
    %c3_227 = arith.constant 3 : index
    %c0_228 = arith.constant 0 : index
    %428 = vector.load %arg10[%c2_226, %c3_227, %c0_228] : memref<3x8x32xf32, #tpu.memory_space<vmem>>, vector<1x1x32xf32>
    %429 = vector.shape_cast %428 : vector<1x1x32xf32> to vector<1x32xf32>
    %430 = vector.broadcast %429 : vector<1x32xf32> to vector<16x32xf32>
    %431 = arith.mulf %427, %430 : vector<16x32xf32>
    %432 = arith.addf %420, %431 : vector<16x32xf32>
    %433 = vector.extract_strided_slice %377 {offsets = [64, 0], sizes = [16, 32], strides = [1, 1]} : vector<128x32xf32> to vector<16x32xf32>
    %c2_229 = arith.constant 2 : index
    %c4_230 = arith.constant 4 : index
    %c0_231 = arith.constant 0 : index
    %434 = vector.load %arg8[%c2_229, %c4_230, %c0_231] : memref<3x8x32xf32, #tpu.memory_space<vmem>>, vector<1x1x32xf32>
    %435 = vector.shape_cast %434 : vector<1x1x32xf32> to vector<1x32xf32>
    %436 = vector.broadcast %435 : vector<1x32xf32> to vector<16x32xf32>
    %437 = arith.mulf %433, %436 : vector<16x32xf32>
    %438 = arith.addf %426, %437 : vector<16x32xf32>
    %439 = vector.extract_strided_slice %378 {offsets = [64, 0], sizes = [16, 32], strides = [1, 1]} : vector<128x32xf32> to vector<16x32xf32>
    %c2_232 = arith.constant 2 : index
    %c4_233 = arith.constant 4 : index
    %c0_234 = arith.constant 0 : index
    %440 = vector.load %arg10[%c2_232, %c4_233, %c0_234] : memref<3x8x32xf32, #tpu.memory_space<vmem>>, vector<1x1x32xf32>
    %441 = vector.shape_cast %440 : vector<1x1x32xf32> to vector<1x32xf32>
    %442 = vector.broadcast %441 : vector<1x32xf32> to vector<16x32xf32>
    %443 = arith.mulf %439, %442 : vector<16x32xf32>
    %444 = arith.addf %432, %443 : vector<16x32xf32>
    %445 = vector.extract_strided_slice %377 {offsets = [80, 0], sizes = [16, 32], strides = [1, 1]} : vector<128x32xf32> to vector<16x32xf32>
    %c2_235 = arith.constant 2 : index
    %c5_236 = arith.constant 5 : index
    %c0_237 = arith.constant 0 : index
    %446 = vector.load %arg8[%c2_235, %c5_236, %c0_237] : memref<3x8x32xf32, #tpu.memory_space<vmem>>, vector<1x1x32xf32>
    %447 = vector.shape_cast %446 : vector<1x1x32xf32> to vector<1x32xf32>
    %448 = vector.broadcast %447 : vector<1x32xf32> to vector<16x32xf32>
    %449 = arith.mulf %445, %448 : vector<16x32xf32>
    %450 = arith.addf %438, %449 : vector<16x32xf32>
    %451 = vector.extract_strided_slice %378 {offsets = [80, 0], sizes = [16, 32], strides = [1, 1]} : vector<128x32xf32> to vector<16x32xf32>
    %c2_238 = arith.constant 2 : index
    %c5_239 = arith.constant 5 : index
    %c0_240 = arith.constant 0 : index
    %452 = vector.load %arg10[%c2_238, %c5_239, %c0_240] : memref<3x8x32xf32, #tpu.memory_space<vmem>>, vector<1x1x32xf32>
    %453 = vector.shape_cast %452 : vector<1x1x32xf32> to vector<1x32xf32>
    %454 = vector.broadcast %453 : vector<1x32xf32> to vector<16x32xf32>
    %455 = arith.mulf %451, %454 : vector<16x32xf32>
    %456 = arith.addf %444, %455 : vector<16x32xf32>
    %457 = vector.extract_strided_slice %377 {offsets = [96, 0], sizes = [16, 32], strides = [1, 1]} : vector<128x32xf32> to vector<16x32xf32>
    %c2_241 = arith.constant 2 : index
    %c6_242 = arith.constant 6 : index
    %c0_243 = arith.constant 0 : index
    %458 = vector.load %arg8[%c2_241, %c6_242, %c0_243] : memref<3x8x32xf32, #tpu.memory_space<vmem>>, vector<1x1x32xf32>
    %459 = vector.shape_cast %458 : vector<1x1x32xf32> to vector<1x32xf32>
    %460 = vector.broadcast %459 : vector<1x32xf32> to vector<16x32xf32>
    %461 = arith.mulf %457, %460 : vector<16x32xf32>
    %462 = arith.addf %450, %461 : vector<16x32xf32>
    %463 = vector.extract_strided_slice %378 {offsets = [96, 0], sizes = [16, 32], strides = [1, 1]} : vector<128x32xf32> to vector<16x32xf32>
    %c2_244 = arith.constant 2 : index
    %c6_245 = arith.constant 6 : index
    %c0_246 = arith.constant 0 : index
    %464 = vector.load %arg10[%c2_244, %c6_245, %c0_246] : memref<3x8x32xf32, #tpu.memory_space<vmem>>, vector<1x1x32xf32>
    %465 = vector.shape_cast %464 : vector<1x1x32xf32> to vector<1x32xf32>
    %466 = vector.broadcast %465 : vector<1x32xf32> to vector<16x32xf32>
    %467 = arith.mulf %463, %466 : vector<16x32xf32>
    %468 = arith.addf %456, %467 : vector<16x32xf32>
    %469 = vector.extract_strided_slice %377 {offsets = [112, 0], sizes = [16, 32], strides = [1, 1]} : vector<128x32xf32> to vector<16x32xf32>
    %c2_247 = arith.constant 2 : index
    %c7_248 = arith.constant 7 : index
    %c0_249 = arith.constant 0 : index
    %470 = vector.load %arg8[%c2_247, %c7_248, %c0_249] : memref<3x8x32xf32, #tpu.memory_space<vmem>>, vector<1x1x32xf32>
    %471 = vector.shape_cast %470 : vector<1x1x32xf32> to vector<1x32xf32>
    %472 = vector.broadcast %471 : vector<1x32xf32> to vector<16x32xf32>
    %473 = arith.mulf %469, %472 : vector<16x32xf32>
    %474 = arith.addf %462, %473 : vector<16x32xf32>
    %475 = vector.extract_strided_slice %378 {offsets = [112, 0], sizes = [16, 32], strides = [1, 1]} : vector<128x32xf32> to vector<16x32xf32>
    %c2_250 = arith.constant 2 : index
    %c7_251 = arith.constant 7 : index
    %c0_252 = arith.constant 0 : index
    %476 = vector.load %arg10[%c2_250, %c7_251, %c0_252] : memref<3x8x32xf32, #tpu.memory_space<vmem>>, vector<1x1x32xf32>
    %477 = vector.shape_cast %476 : vector<1x1x32xf32> to vector<1x32xf32>
    %478 = vector.broadcast %477 : vector<1x32xf32> to vector<16x32xf32>
    %479 = arith.mulf %475, %478 : vector<16x32xf32>
    %480 = arith.addf %468, %479 : vector<16x32xf32>
    %c2_253 = arith.constant 2 : index
    %c0_254 = arith.constant 0 : index
    %c0_255 = arith.constant 0 : index
    %481 = vector.load %arg12[%c2_253, %c0_254, %c0_255] : memref<3x32x32xf32, #tpu.memory_space<vmem>>, vector<1x32x32xf32>
    %482 = vector.shape_cast %481 : vector<1x32x32xf32> to vector<32x32xf32>
    %cst_256 = arith.constant dense<0.000000e+00> : vector<16x32xf32>
    %483 = tpu.matmul %474, %482, %cst_256 {dimension_numbers = #tpu.dot_dimension_numbers<[1], [0], [0], [1], [0, 0, 1, 1], [], []>} : vector<16x32xf32>, vector<32x32xf32>, vector<16x32xf32> -> vector<16x32xf32>
    %c2_257 = arith.constant 2 : index
    %c0_258 = arith.constant 0 : index
    %c0_259 = arith.constant 0 : index
    %484 = vector.load %arg13[%c2_257, %c0_258, %c0_259] : memref<3x1x32xf32, #tpu.memory_space<vmem>>, vector<1x1x32xf32>
    %485 = vector.shape_cast %484 : vector<1x1x32xf32> to vector<1x32xf32>
    %486 = vector.broadcast %485 : vector<1x32xf32> to vector<16x32xf32>
    %487 = arith.addf %483, %486 : vector<16x32xf32>
    %cst_260 = arith.constant 0.000000e+00 : f32
    %488 = vector.broadcast %cst_260 : f32 to vector<16x32xf32>
    %489 = arith.maximumf %487, %488 : vector<16x32xf32>
    %c2_261 = arith.constant 2 : index
    %c0_262 = arith.constant 0 : index
    %c0_263 = arith.constant 0 : index
    %490 = vector.load %arg14[%c2_261, %c0_262, %c0_263] : memref<3x32x32xf32, #tpu.memory_space<vmem>>, vector<1x32x32xf32>
    %491 = vector.shape_cast %490 : vector<1x32x32xf32> to vector<32x32xf32>
    %cst_264 = arith.constant dense<0.000000e+00> : vector<16x32xf32>
    %492 = tpu.matmul %480, %491, %cst_264 {dimension_numbers = #tpu.dot_dimension_numbers<[1], [0], [0], [1], [0, 0, 1, 1], [], []>} : vector<16x32xf32>, vector<32x32xf32>, vector<16x32xf32> -> vector<16x32xf32>
    %c2_265 = arith.constant 2 : index
    %c0_266 = arith.constant 0 : index
    %c0_267 = arith.constant 0 : index
    %493 = vector.load %arg15[%c2_265, %c0_266, %c0_267] : memref<3x1x32xf32, #tpu.memory_space<vmem>>, vector<1x1x32xf32>
    %494 = vector.shape_cast %493 : vector<1x1x32xf32> to vector<1x32xf32>
    %495 = vector.broadcast %494 : vector<1x32xf32> to vector<16x32xf32>
    %496 = arith.addf %492, %495 : vector<16x32xf32>
    %cst_268 = arith.constant 0.000000e+00 : f32
    %497 = vector.broadcast %cst_268 : f32 to vector<16x32xf32>
    %498 = arith.maximumf %496, %497 : vector<16x32xf32>
    %499 = arith.addf %489, %498 : vector<16x32xf32>
    %500 = arith.addf %499, %376 : vector<16x32xf32>
    %c0_269 = arith.constant 0 : index
    %c0_270 = arith.constant 0 : index
    %501 = vector.load %arg16[%c0_269, %c0_270] : memref<32x128xf32, #tpu.memory_space<vmem>>, vector<32x128xf32>
    %cst_271 = arith.constant dense<0.000000e+00> : vector<16x128xf32>
    %502 = tpu.matmul %500, %501, %cst_271 {dimension_numbers = #tpu.dot_dimension_numbers<[1], [0], [0], [1], [0, 0, 1, 1], [], []>} : vector<16x32xf32>, vector<32x128xf32>, vector<16x128xf32> -> vector<16x128xf32>
    %c0_272 = arith.constant 0 : index
    %c0_273 = arith.constant 0 : index
    %503 = vector.load %arg17[%c0_272, %c0_273] : memref<1x128xf32, #tpu.memory_space<vmem>>, vector<1x128xf32>
    %504 = vector.broadcast %503 : vector<1x128xf32> to vector<16x128xf32>
    %505 = arith.addf %502, %504 : vector<16x128xf32>
    %c0_274 = arith.constant 0 : index
    %c0_275 = arith.constant 0 : index
    %506 = vector.load %arg18[%c0_274, %c0_275] : memref<16x128xf32, #tpu.memory_space<vmem>>, vector<16x128xf32>
    tpu.vector_store %arg18[%c0_274, %c0_275], %505 {strides = array<i32>} : memref<16x128xf32, #tpu.memory_space<vmem>>, vector<16x128xf32>,
    return
  }
}

</mosaic_0001>

<bundles_post_ra>
// kernel: _model_forward_impl.1
= control target key start
LH: loop header
LB: loop body
LE: loop exit
PB: predicated region body
PF: predicated region fallthrough
CT: control target
= control target key end

     0   :  { %v8562_v0 = vmov 1   ;;  %v8564_v1 = vmov 0   ;;  %v8560_v9 = vmov 2   ;;  %v8566_v16 = vmov 3   ;;  %s8534_s1 = inlined_call_operand.vmem [shape: s32[128,8], index: 1, kind: input, shape index: {}]   ;;  %s8535_s2 = inlined_call_operand.vmem [shape: s32[128,8], index: 2, kind: input, shape index: {}]   ;;  %s8536_s5 = inlined_call_operand.vmem [shape: f32[24,32], index: 5, kind: input, shape index: {}]   ;;  %s8537_s0 = inlined_call_operand.vmem [shape: f32[16,24], index: 0, kind: input, shape index: {}]   ;;  %s8538_s6 = inlined_call_operand.vmem [shape: f32[6,32], index: 6, kind: input, shape index: {}]   ;;  %s8539_s4 = inlined_call_operand.vmem [shape: f32[128,6], index: 4, kind: input, shape index: {}]   ;;  %s8540_s3 = inlined_call_operand.vmem [shape: f32[128,6], index: 3, kind: input, shape index: {}]   ;;  %s8541_s8 = inlined_call_operand.vmem [shape: f32[3,8,32], index: 8, kind: input, shape index: {}]   ;;  %s8542_s7 = inlined_call_operand.vmem [shape: f32[8,32], index: 7, kind: input, shape index: {}]   ;;  %s8543_s10 = inlined_call_operand.vmem [shape: f32[3,8,32], index: 10, kind: input, shape index: {}]   ;;  %s8544_s9 = inlined_call_operand.vmem [shape: f32[3,1,32], index: 9, kind: input, shape index: {}]   ;;  %s8545_s11 = inlined_call_operand.vmem [shape: f32[3,1,32], index: 11, kind: input, shape index: {}]   ;;  %s8546_s12 = inlined_call_operand.vmem [shape: f32[3,32,32], index: 12, kind: input, shape index: {}]   ;;  %s8547_s14 = inlined_call_operand.vmem [shape: f32[3,32,32], index: 14, kind: input, shape index: {}]   ;;  %s8548_s15 = inlined_call_operand.vmem [shape: f32[3,1,32], index: 15, kind: input, shape index: {}]   ;;  %s8549_s13 = inlined_call_operand.vmem [shape: f32[3,1,32], index: 13, kind: input, shape index: {}]   ;;  %s8550_s16 = inlined_call_operand.vmem [shape: f32[32,128], index: 16, kind: input, shape index: {}]   ;;  %s8551_s17 = inlined_call_operand.vmem [shape: f32[1,128], index: 17, kind: input, shape index: {}]   ;;  %s8552_s18 = inlined_call_operand.vmem [shape: f32[16,128], index: 18, kind: output, shape index: {}]  }
   0x1   :  { %8617 = sst [smem:[#allocation83_spill]] %s8534_s1  ;;  %5697 = vset.pattern.permute.xlu1 %v8562_v0  ;;  %5696 = vset.pattern.permute.xlu0 %v8564_v1  ;;  %v59_v24 = vld [vmem:[%s8537_s0] sm:$0xff]  ;;  %vm64_vm0 = vcmask 195584   ;;  %v60_v25 = vld [vmem:[%s8537_s0 + $0x8] sm:$0xff]  ;;  %v8558_v29 = vmov 4   ;;  %v8568_v36 = vmov 5  }
   0x2   :  { %8618 = sst [smem:[#allocation84_spill]] %s8535_s2  ;;  %s8620_s29 = sld [smem:[#allocation83_spill]]  ;;  %5271 = vmatprep.mubr.msk.f32.mxu0 %vm64_vm0, %v59_v24  ;;  %v8556_v55 = vmov 6   ;;  %vm2040_vm1 = vcmask 1045504   ;;  %vm1991_vm2 = vcmask 48128  }
   0x3   :  { %8619 = sst [smem:[#allocation85_spill]] %s8536_s5  ;;  %s8621_s19 = sld [smem:[#allocation84_spill]] }
   0x4   :  { %s8622_s5 = sld [smem:[#allocation85_spill]] }
   0x8   :  { %v5961_v2 = vld [vmem:[%s8620_s29] sm:$0xff]  ;;  %v5975_v4 = vld [vmem:[%s8620_s29 + $0x8] sm:$0xff]  ;;  %v5988_v6 = vld [vmem:[%s8620_s29 + $0x10] sm:$0xff] }
   0x9   :  { %407 = vperm.xlu1 %5697, %v5961_v2   ;;  %167 = vperm.xlu0 %5696, %v5961_v2   ;;  %v5968_v3 = vld [vmem:[%s8621_s19] sm:$0xff]  ;;  %v5980_v5 = vld [vmem:[%s8621_s19 + $0x8] sm:$0xff]  ;;  %v5995_v7 = vld [vmem:[%s8620_s29 + $0x18] sm:$0xff] }
   0xa   :  { %v6002_v8 = vld [vmem:[%s8620_s29 + $0x20] sm:$0xff]  ;;  %v6010_v10 = vld [vmem:[%s8621_s19 + $0x28] sm:$0xff]  ;;  %v6017_v11 = vld [vmem:[%s8621_s19 + $0x38] sm:$0xff] }
   0xb   :  { %v6024_v12 = vld [vmem:[%s8621_s19 + $0x10] sm:$0xff]  ;;  %v6029_v13 = vld [vmem:[%s8620_s29 + $0x40] sm:$0xff]  ;;  %v6045_v15 = vld [vmem:[%s8620_s29 + $0x58] sm:$0xff] }
   0xc   :  { %v6037_v14 = vld [vmem:[%s8621_s19 + $0x50] sm:$0xff]  ;;  %v6052_v17 = vld [vmem:[%s8621_s19 + $0x68] sm:$0xff]  ;;  %v6066_v19 = vld [vmem:[%s8621_s19 + $0x18] sm:$0xff] }
   0xd   :  { %519 = vperm.xlu1 %5697, %v5968_v3   ;;  %295 = vperm.xlu0 %5696, %v5968_v3   ;;  %v6059_v18 = vld [vmem:[%s8620_s29 + $0x70] sm:$0xff]  ;;  %v61_v20 = vld [vmem:[%s8622_s5] sm:$0xff]  ;;  %v62_v21 = vld [vmem:[%s8622_s5 + $0x8] sm:$0xff] }
   0xe   :  { %v5571_v22 = vpack.c.bf16 %v62_v21, %v61_v20  ;;  %v63_v23 = vld [vmem:[%s8622_s5 + $0x10] sm:$0xff]  ;;  %v6096_v26 = vld [vmem:[%s8621_s19 + $0x20] sm:$0xff]  ;;  %v6118_v30 = vld [vmem:[%s8620_s29 + $0x48] sm:$0xff] }
   0xf   :  { %v6103_v27 = vld [vmem:[%s8620_s29 + $0x30] sm:$0xff]  ;;  %v6111_v28 = vld [vmem:[%s8621_s19 + $0x40] sm:$0xff]  ;;  %v6125_v31 = vld [vmem:[%s8621_s19 + $0x58] sm:$0xff] }
  0x10   :  { %5572 = vmatprep.subr.bf16.mxu0 %v5571_v22  ;;  %v162_v32 = vld [vmem:[%s8620_s29 + $0x60] sm:$0xff]  ;;  %v6137_v33 = vld [vmem:[%s8621_s19 + $0x70] sm:$0xff]  ;;  %v6145_v34 = vld [vmem:[%s8620_s29 + $0x78] sm:$0xff] }
  0x11   :  { %5698 = vset.pattern.permute.xlu1 %v8564_v1  ;;  %170 = vperm.xlu0 %5696, %v5975_v4   ;;  %v6161_v35 = vld [vmem:[%s8620_s29 + $0x38] sm:$0xff]  ;;  %v6171_v37 = vld [vmem:[%s8620_s29 + $0x28] sm:$0xff] }
  0x12   :  { %298 = vperm.xlu1 %5698, %v5980_v5   ;;  %5574 = vmatpush3.bf16.msra.mxu0 %v5571_v22  ;;  %v6176_v38 = vld [vmem:[%s8621_s19 + $0x48] sm:$0xff]  ;;  %v6203_v44 = vld [vmem:[%s8621_s19 + $0x78] sm:$0xff] }
  0x13   :  { %5269 = vmatprep.subr.mxu0 %v63_v23  ;;  %v6186_v39 = vld [vmem:[%s8620_s29 + $0x68] sm:$0xff] }
  0x15   :  { %173 = vperm.xlu0 %5696, %v5988_v6  }
  0x16   :  { %5699 = vset.pattern.permute.xlu1 %v8562_v0  ;;  %5270 = vmatpush3.msra.mxu0 %v63_v23  ;;  %v6285_v23 = vld [vmem:[%s8621_s19 + $0x30] sm:$0xff] }
  0x17   :  { %522 = vperm.xlu1 %5699, %v5980_v5   ;;  %5272 = vmatmul.mubr.msk.f32.vlgmr.msra.gmra.mrb[0].mxu0 %vm64_vm0, %v60_v25 }
  0x19   :  { %176 = vperm.xlu0 %5696, %v5995_v7  }
  0x1b   :  { %5700 = vset.pattern.permute.xlu1 %v8560_v9 }
  0x1c   :  { %631 = vperm.xlu1 %5700, %v5961_v2  }
  0x1d   :  { %179 = vperm.xlu0 %5696, %v6002_v8  }
  0x20   :  { %634 = vperm.xlu1 %5700, %v5975_v4  }
  0x21   :  { %310 = vperm.xlu0 %5696, %v6010_v10  }
  0x24   :  { %746 = vperm.xlu1 %5700, %v5980_v5  }
  0x25   :  { %316 = vperm.xlu0 %5696, %v6017_v11  }
  0x28   :  { %5701 = vset.pattern.permute.xlu1 %v8564_v1 }
  0x29   :  { %301 = vperm.xlu1 %5701, %v6024_v12   ;;  %191 = vperm.xlu0 %5696, %v6029_v13  }
  0x2d   :  { %5702 = vset.pattern.permute.xlu1 %v8562_v0  ;;  %325 = vperm.xlu0 %5696, %v6037_v14  }
  0x2e   :  { %413 = vperm.xlu1 %5702, %v5988_v6  }
  0x31   :  { %200 = vperm.xlu0 %5696, %v6045_v15  }
  0x32   :  { %5703 = vset.pattern.permute.xlu1 %v8566_v16 }
  0x33   :  { %855 = vperm.xlu1 %5703, %v5961_v2  }
  0x35   :  { %334 = vperm.xlu0 %5696, %v6052_v17  }
  0x37   :  { %967 = vperm.xlu1 %5703, %v5968_v3  }
  0x39   :  { %209 = vperm.xlu0 %5696, %v6059_v18  }
  0x3b   :  { %5704 = vset.pattern.permute.xlu1 %v8564_v1 }
  0x3c   :  { %304 = vperm.xlu1 %5704, %v6066_v19  }
  0x3d   :  { %5789 = vset.pattern.permute.xlu0 %v8562_v0 }
  0x3e   :  { %410 = vperm.xlu0 %5789, %v5975_v4  }
  0x40   :  { %5705 = vset.pattern.permute.xlu1 %v8562_v0 }
  0x41   :  { %416 = vperm.xlu1 %5705, %v5995_v7  }
  0x42   :  { %525 = vperm.xlu0 %5789, %v6024_v12  }
  0x45   :  { %5706 = vset.pattern.permute.xlu1 %v8566_v16 }
  0x46   :  { %858 = vperm.xlu1 %5706, %v5975_v4   ;;  %528 = vperm.xlu0 %5789, %v6066_v19  }
  0x4a   :  { %970 = vperm.xlu1 %5706, %v5980_v5   ;;  %531 = vperm.xlu0 %5789, %v6096_v26  }
  0x4e   :  { %5707 = vset.pattern.permute.xlu1 %v8560_v9  ;;  %425 = vperm.xlu0 %5789, %v6103_v27  }
  0x4f   :  { %749 = vperm.xlu1 %5707, %v6024_v12  }
  0x52   :  { %543 = vperm.xlu0 %5789, %v6111_v28  }
  0x53   :  { %5708 = vset.pattern.permute.xlu1 %v8558_v29 }
  0x54   :  { %1079 = vperm.xlu1 %5708, %v5961_v2  }
  0x56   :  { %434 = vperm.xlu0 %5789, %v6118_v30  }
  0x58   :  { %5709 = vset.pattern.permute.xlu1 %v8560_v9 }
  0x59   :  { %640 = vperm.xlu1 %5709, %v5995_v7  }
  0x5a   :  { %552 = vperm.xlu0 %5789, %v6125_v31  }
  0x5d   :  { %752 = vperm.xlu1 %5709, %v6066_v19  }
  0x5e   :  { %443 = vperm.xlu0 %5789, %v162_v32  }
  0x61   :  { %5710 = vset.pattern.permute.xlu1 %v8558_v29 }
  0x62   :  { %1194 = vperm.xlu1 %5710, %v5980_v5   ;;  %561 = vperm.xlu0 %5789, %v6137_v33  }
  0x66   :  { %5711 = vset.pattern.permute.xlu1 %v8564_v1  ;;  %452 = vperm.xlu0 %5789, %v6145_v34  }
  0x67   :  { %307 = vperm.xlu1 %5711, %v6096_v26  }
  0x6a   :  { %5796 = vset.pattern.permute.xlu0 %v8560_v9 }
  0x6b   :  { %5712 = vset.pattern.permute.xlu1 %v8562_v0  ;;  %743 = vperm.xlu0 %5796, %v5968_v3  }
  0x6c   :  { %419 = vperm.xlu1 %5712, %v6002_v8  }
  0x6f   :  { %637 = vperm.xlu0 %5796, %v5988_v6  }
  0x70   :  { %5713 = vset.pattern.permute.xlu1 %v8566_v16 }
  0x71   :  { %861 = vperm.xlu1 %5713, %v5988_v6  }
  0x73   :  { %649 = vperm.xlu0 %5796, %v6103_v27  }
  0x75   :  { %973 = vperm.xlu1 %5713, %v6024_v12  }
  0x77   :  { %652 = vperm.xlu0 %5796, %v6161_v35  }
  0x79   :  { %5714 = vset.pattern.permute.xlu1 %v8568_v36 }
  0x7a   :  { %1415 = vperm.xlu1 %5714, %v5968_v3  }
  0x7b   :  { %767 = vperm.xlu0 %5796, %v6111_v28  }
  0x7e   :  { %5715 = vset.pattern.permute.xlu1 %v8564_v1 }
  0x7f   :  { %182 = vperm.xlu1 %5715, %v6171_v37   ;;  %770 = vperm.xlu0 %5796, %v6176_v38  }
  0x83   :  { %5716 = vset.pattern.permute.xlu1 %v8562_v0  ;;  %667 = vperm.xlu0 %5796, %v162_v32  }
  0x84   :  { %422 = vperm.xlu1 %5716, %v6171_v37  }
  0x87   :  { %670 = vperm.xlu0 %5796, %v6186_v39  }
  0x88   :  { %534 = vperm.xlu1 %5716, %v6010_v10   ;;  %v6190_v40 = vpop.permute.xlu1 %407  ;;  %v6192_v41 = vpop.permute.xlu0 %167 }
  0x8b   :  { %785 = vperm.xlu0 %5796, %v6137_v33  }
  0x8c   :  { %5717 = vset.pattern.permute.xlu1 %v8566_v16  ;;  %v6196_v42 = vpop.permute.xlu1 %519  ;;  %v6198_v43 = vpop.permute.xlu0 %295 }
  0x8d   :  { %976 = vperm.xlu1 %5717, %v6066_v19  }
  0x8f   :  { %788 = vperm.xlu0 %5796, %v6203_v44  }
  0x90   :  { %v6207_v45 = vpop.permute.xlu0 %170 }
  0x91   :  { %5718 = vset.pattern.permute.xlu1 %v8568_v36  ;;  %v6210_v46 = vpop.permute.xlu1 %298 }
  0x92   :  { %1306 = vperm.xlu1 %5718, %v5975_v4  }
  0x93   :  { %5805 = vset.pattern.permute.xlu0 %v8566_v16 }
  0x94   :  { %864 = vperm.xlu0 %5805, %v5995_v7   ;;  %v6215_v47 = vpop.permute.xlu0 %173 }
  0x96   :  { %5719 = vset.pattern.permute.xlu1 %v8560_v9  ;;  %v6218_v48 = vpop.permute.xlu1 %522 }
  0x97   :  { %643 = vperm.xlu1 %5719, %v6002_v8  }
  0x98   :  { %979 = vperm.xlu0 %5805, %v6096_v26   ;;  %v6222_v49 = vpop.permute.xlu0 %176 }
  0x9b   :  { %755 = vperm.xlu1 %5719, %v6096_v26   ;;  %v6225_v50 = vpop.permute.xlu1 %631 }
  0x9c   :  { %870 = vperm.xlu0 %5805, %v6171_v37   ;;  %v6228_v51 = vpop.permute.xlu0 %179 }
  0x9f   :  { %5720 = vset.pattern.permute.xlu1 %v8558_v29  ;;  %v6231_v52 = vpop.permute.xlu1 %634 }
  0xa0   :  { %8623 = vst [vmem:[#allocation2_spill] sm:$0xff] %v6231_v52  ;;  %1197 = vperm.xlu1 %5720, %v6024_v12   ;;  %988 = vperm.xlu0 %5805, %v6017_v11   ;;  %v6235_v53 = vpop.permute.xlu0 %310 }
  0xa1   :  { %8624 = vst [vmem:[#allocation3_spill] sm:$0xff] %v6235_v53  ;;  %v8653_v53 = vmov 3  }
  0xa3   :  { %v6237_v54 = vpop.permute.xlu1 %746 }
  0xa4   :  { %5721 = vset.pattern.permute.xlu1 %v8556_v55  ;;  %879 = vperm.xlu0 %5805, %v6029_v13   ;;  %v6241_v56 = vpop.permute.xlu0 %316 }
  0xa5   :  { %8625 = vst [vmem:[#allocation4_spill] sm:$0xff] %v6241_v56  ;;  %1527 = vperm.xlu1 %5721, %v5961_v2   ;;  %v8647_v56 = vmov 0  }
  0xa8   :  { %v6244_v57 = vpop.permute.xlu1 %301  ;;  %997 = vperm.xlu0 %5805, %v6037_v14   ;;  %v6247_v58 = vpop.permute.xlu0 %191 }
  0xa9   :  { %8626 = vst [vmem:[#allocation5_spill] sm:$0xff] %v6244_v57  ;;  %8627 = vst [vmem:[#allocation6_spill] sm:$0xff] %v6247_v58  ;;  %5722 = vset.pattern.permute.xlu1 %v8560_v9  ;;  %v8570_v58 = vmov 7  }
  0xaa   :  { %646 = vperm.xlu1 %5722, %v6171_v37  }
  0xac   :  { %888 = vperm.xlu0 %5805, %v6045_v15   ;;  %v6252_v59 = vpop.permute.xlu0 %325 }
  0xad   :  { %8628 = vst [vmem:[#allocation7_spill] sm:$0xff] %v6252_v59  ;;  %v6254_v60 = vpop.permute.xlu1 %413 }
  0xae   :  { %758 = vperm.xlu1 %5722, %v6010_v10  }
  0xb0   :  { %1006 = vperm.xlu0 %5805, %v6052_v17   ;;  %v6258_v61 = vpop.permute.xlu0 %200 }
  0xb1   :  { %8629 = vst [vmem:[#allocation8_spill] sm:$0xff] %v6258_v61 }
  0xb2   :  { %5723 = vset.pattern.permute.xlu1 %v8558_v29  ;;  %v6261_v62 = vpop.permute.xlu1 %855 }
  0xb3   :  { %8630 = vst [vmem:[#allocation9_spill] sm:$0xff] %v6261_v62  ;;  %1200 = vperm.xlu1 %5723, %v6066_v19  }
  0xb4   :  { %1009 = vperm.xlu0 %5805, %v6137_v33   ;;  %v6265_v63 = vpop.permute.xlu0 %334 }
  0xb5   :  { %8631 = vst [vmem:[#allocation10_spill] sm:$0xff] %v6265_v63 }
  0xb6   :  { %v6267_v20 = vpop.permute.xlu1 %967 }
  0xb7   :  { %5724 = vset.pattern.permute.xlu1 %v8556_v55 }
  0xb8   :  { %1530 = vperm.xlu1 %5724, %v5975_v4   ;;  %1012 = vperm.xlu0 %5805, %v6203_v44   ;;  %v6272_v17 = vpop.permute.xlu0 %209 }
  0xb9   :  { %8632 = vst [vmem:[#allocation11_spill] sm:$0xff] %v6272_v17 }
  0xbb   :  { %v6274_v21 = vpop.permute.xlu1 %304 }
  0xbc   :  { %8633 = vst [vmem:[#allocation12_spill] sm:$0xff] %v6274_v21  ;;  %5725 = vset.pattern.permute.xlu1 %v8564_v1  ;;  %5812 = vset.pattern.permute.xlu0 %v8558_v29 }
  0xbd   :  { %185 = vperm.xlu1 %5725, %v6103_v27   ;;  %1191 = vperm.xlu0 %5812, %v5968_v3   ;;  %v6280_v22 = vpop.permute.xlu0 %410 }
  0xc0   :  { %v6287_v24 = vpop.permute.xlu1 %416 }
  0xc1   :  { %8634 = vst [vmem:[#allocation13_spill] sm:$0xff] %v6287_v24  ;;  %313 = vperm.xlu1 %5725, %v6285_v23   ;;  %1082 = vperm.xlu0 %5812, %v5975_v4   ;;  %v6291_v25 = vpop.permute.xlu0 %525 }
  0xc2   :  { %8635 = vst [vmem:[#allocation14_spill] sm:$0xff] %v6291_v25  ;;  %v2190_v25 = vld [vmem:[%s8539_s4 + $0x8] sm:$0xff] }
  0xc5   :  { %5726 = vset.pattern.permute.xlu1 %v8562_v0  ;;  %v6294_v32 = vpop.permute.xlu1 %858  ;;  %1085 = vperm.xlu0 %5812, %v5988_v6   ;;  %v6297_v55 = vpop.permute.xlu0 %528 }
  0xc6   :  { %8636 = vst [vmem:[#allocation15_spill] sm:$0xff] %v6294_v32  ;;  %8637 = vst [vmem:[#allocation16_spill] sm:$0xff] %v6297_v55  ;;  %537 = vperm.xlu1 %5726, %v6285_v23  }
  0xc9   :  { %v6300_v29 = vpop.permute.xlu1 %970  ;;  %1088 = vperm.xlu0 %5812, %v5995_v7   ;;  %v6303_v9 = vpop.permute.xlu0 %531 }
  0xca   :  { %8638 = vst [vmem:[#allocation17_spill] sm:$0xff] %v6303_v9  ;;  %5727 = vset.pattern.permute.xlu1 %v8566_v16 }
  0xcb   :  { %867 = vperm.xlu1 %5727, %v6002_v8  }
  0xcd   :  { %1203 = vperm.xlu0 %5812, %v6096_v26   ;;  %v6308_v0 = vpop.permute.xlu0 %425 }
  0xce   :  { %8639 = vst [vmem:[#allocation18_spill] sm:$0xff] %v6308_v0  ;;  %v6310_v1 = vpop.permute.xlu1 %749  ;;  %v8650_v0 = vmov 1  }
  0xcf   :  { %8640 = vst [vmem:[#allocation19_spill] sm:$0xff] %v6310_v1  ;;  %5728 = vset.pattern.permute.xlu1 %v8568_v36 }
  0xd0   :  { %1309 = vperm.xlu1 %5728, %v5988_v6  }
  0xd1   :  { %1206 = vperm.xlu0 %5812, %v6010_v10   ;;  %v6315_v17 = vpop.permute.xlu0 %543 }
  0xd2   :  { %8641 = vst [vmem:[#allocation20_spill] sm:$0xff] %v6315_v17 }
  0xd3   :  { %v6317_v61 = vpop.permute.xlu1 %1079 }
  0xd4   :  { %8642 = vst [vmem:[#allocation21_spill] sm:$0xff] %v6317_v61  ;;  %1421 = vperm.xlu1 %5728, %v6024_v12  }
  0xd5   :  { %1103 = vperm.xlu0 %5812, %v6029_v13   ;;  %v6321_v16 = vpop.permute.xlu0 %434 }
  0xd6   :  { %8643 = vst [vmem:[#allocation22_spill] sm:$0xff] %v6321_v16 }
  0xd8   :  { %5729 = vset.pattern.permute.xlu1 %v8570_v58  ;;  %v6324_v63 = vpop.permute.xlu1 %640 }
  0xd9   :  { %8644 = vst [vmem:[#allocation23_spill] sm:$0xff] %v6324_v63  ;;  %1863 = vperm.xlu1 %5729, %v5968_v3   ;;  %1106 = vperm.xlu0 %5812, %v6118_v30   ;;  %v6328_v36 = vpop.permute.xlu0 %552  ;;  %v8659_v63 = vmov 7  }
  0xda   :  { %8645 = vst [vmem:[#allocation24_spill] sm:$0xff] %v6328_v36 }
  0xdc   :  { %v6330_v17 = vpop.permute.xlu1 %752 }
  0xdd   :  { %8646 = vst [vmem:[#allocation25_spill] sm:$0xff] %v6330_v17  ;;  %5730 = vset.pattern.permute.xlu1 %v8647_v56  ;;  %1221 = vperm.xlu0 %5812, %v6037_v14   ;;  %v6334_v59 = vpop.permute.xlu0 %443 }
  0xde   :  { %8648 = vst [vmem:[#allocation26_spill] sm:$0xff] %v6334_v59  ;;  %188 = vperm.xlu1 %5730, %v6161_v35  }
  0xe1   :  { %v6337_v16 = vpop.permute.xlu1 %1194  ;;  %1224 = vperm.xlu0 %5812, %v6125_v31   ;;  %v6340_v58 = vpop.permute.xlu0 %561 }
  0xe2   :  { %8649 = vst [vmem:[#allocation27_spill] sm:$0xff] %v6340_v58  ;;  %5731 = vset.pattern.permute.xlu1 %v8650_v0  ;;  %v8654_v58 = vmov 5  }
  0xe3   :  { %428 = vperm.xlu1 %5731, %v6161_v35  }
  0xe5   :  { %1233 = vperm.xlu0 %5812, %v6137_v33   ;;  %v6345_v36 = vpop.permute.xlu0 %452 }
  0xe6   :  { %8651 = vst [vmem:[#allocation28_spill] sm:$0xff] %v6345_v36  ;;  %v6347_v9 = vpop.permute.xlu1 %307 }
  0xe7   :  { %8652 = vst [vmem:[#allocation29_spill] sm:$0xff] %v6347_v9  ;;  %540 = vperm.xlu1 %5731, %v6017_v11  }
  0xe9   :  { %1124 = vperm.xlu0 %5812, %v6145_v34  }
  0xea   :  { %v6351_v59 = vpop.permute.xlu0 %743 }
  0xeb   :  { %5732 = vset.pattern.permute.xlu1 %v8653_v53  ;;  %v6354_v17 = vpop.permute.xlu1 %419 }
  0xec   :  { %982 = vperm.xlu1 %5732, %v6010_v10  }
  0xed   :  { %5817 = vset.pattern.permute.xlu0 %v8654_v58 }
  0xee   :  { %1303 = vperm.xlu0 %5817, %v5961_v2   ;;  %v6359_v21 = vpop.permute.xlu0 %637 }
  0xef   :  { %8655 = vst [vmem:[#allocation30_spill] sm:$0xff] %v6359_v21  ;;  %v8666_v21 = vmov 4  }
  0xf0   :  { %5733 = vset.pattern.permute.xlu1 %v8654_v58  ;;  %v6362_v36 = vpop.permute.xlu1 %861 }
  0xf1   :  { %8656 = vst [vmem:[#allocation31_spill] sm:$0xff] %v6362_v36  ;;  %1312 = vperm.xlu1 %5733, %v5995_v7  }
  0xf2   :  { %1418 = vperm.xlu0 %5817, %v5980_v5   ;;  %v6366_v9 = vpop.permute.xlu0 %649 }
  0xf3   :  { %8657 = vst [vmem:[#allocation32_spill] sm:$0xff] %v6366_v9  ;;  %v1990_v9 = vld [vmem:[%s8538_s6] sm:$0x3f] }
  0xf4   :  { %v6368_v55 = vpop.permute.xlu1 %973  ;;  %5300 = vmatprep.subr.msk.mxu0 %vm2040_vm1, %v1990_v9  ;;  %5274 = vmatprep.subr.msk.mxu1 %vm2040_vm1, %v1990_v9 }
  0xf5   :  { %8658 = vst [vmem:[#allocation33_spill] sm:$0xff] %v6368_v55  ;;  %5734 = vset.pattern.permute.xlu1 %v8659_v63  ;;  %5301 = vmatpush3.msk.msra.mxu0 %vm2040_vm1, %v1990_v9 }
  0xf6   :  { %1754 = vperm.xlu1 %5734, %v5975_v4   ;;  %1424 = vperm.xlu0 %5817, %v6066_v19   ;;  %v6373_v61 = vpop.permute.xlu0 %652  ;;  %v8662_v4 = vmov 2  }
  0xf7   :  { %8660 = vst [vmem:[#allocation34_spill] sm:$0xff] %v6373_v61  ;;  %5275 = vmatpush3.msk.msra.mxu1 %vm2040_vm1, %v1990_v9  ;;  %v2192_v9 = vld [vmem:[%s8539_s4 + $0x18] sm:$0xff] }
  0xf9   :  { %v6375_v1 = vpop.permute.xlu1 %1415 }
  0xfa   :  { %1866 = vperm.xlu1 %5734, %v5980_v5   ;;  %1315 = vperm.xlu0 %5817, %v6002_v8   ;;  %v6379_v36 = vpop.permute.xlu0 %767 }
  0xfb   :  { %8661 = vst [vmem:[#allocation35_spill] sm:$0xff] %v6379_v36  ;;  %v2189_v36 = vld [vmem:[%s8539_s4] sm:$0xff] }
  0xfc   :  { %5302 = vmatprep.mubr.msk.f32.mxu0 %vm1991_vm2, %v2189_v36 }
  0xfd   :  { %5303 = vmatmul.mubr.msk.f32.vlgmr.msra.gmra.mrb[2].mxu0 %vm1991_vm2, %v2190_v25  ;;  %v2193_v25 = vld [vmem:[%s8539_s4 + $0x20] sm:$0xff] }
  0xfe   :  { %5735 = vset.pattern.permute.xlu1 %v8662_v4  ;;  %v6385_v55 = vpop.permute.xlu1 %182  ;;  %1433 = vperm.xlu0 %5817, %v6285_v23   ;;  %v6388_v61 = vpop.permute.xlu0 %770 }
  0xff   :  { %8663 = vst [vmem:[#allocation36_spill] sm:$0xff] %v6385_v55  ;;  %8664 = vst [vmem:[#allocation37_spill] sm:$0xff] %v6388_v61  ;;  %761 = vperm.xlu1 %5735, %v6285_v23   ;;  %v2191_v55 = vld [vmem:[%s8539_s4 + $0x10] sm:$0xff] }
 0x100   :  { %5305 = vmatprep.mubr.msk.f32.mxu0 %vm1991_vm2, %v2191_v55  ;;  %v6425_v55 = vld [vmem:[%s8620_s29 + $0x50] sm:$0xff] }
 0x101   :  { %5306 = vmatmul.mubr.msk.f32.gmra.mrb[4].mxu0 %vm1991_vm2, %v2192_v9  ;;  %v2194_v9 = vld [vmem:[%s8539_s4 + $0x28] sm:$0xff] }
 0x102   :  { %1324 = vperm.xlu0 %5817, %v6161_v35   ;;  %v6400_v61 = vpop.permute.xlu0 %667  ;;  %5308 = vmatprep.mubr.msk.f32.mxu0 %vm1991_vm2, %v2193_v25  ;;  %v2196_v25 = vld [vmem:[%s8539_s4 + $0x38] sm:$0xff] }
 0x103   :  { %8665 = vst [vmem:[#allocation38_spill] sm:$0xff] %v6400_v61  ;;  %5736 = vset.pattern.permute.xlu1 %v8666_v21  ;;  %v6406_v32 = vpop.permute.xlu1 %422 }
 0x104   :  { %8667 = vst [vmem:[#allocation39_spill] sm:$0xff] %v6406_v32  ;;  %1091 = vperm.xlu1 %5736, %v6002_v8   ;;  %v8670_v32 = vmov 6  }
 0x105   :  { %5309 = vmatmul.mubr.msk.f32.gmra.mrb[6].mxu0 %vm1991_vm2, %v2194_v9 }
 0x106   :  { %1442 = vperm.xlu0 %5817, %v6176_v38   ;;  %v6415_v36 = vpop.permute.xlu0 %670 }
 0x107   :  { %8668 = vst [vmem:[#allocation40_spill] sm:$0xff] %v6415_v36  ;;  %v6420_v61 = vpop.permute.xlu1 %534 }
 0x108   :  { %8669 = vst [vmem:[#allocation41_spill] sm:$0xff] %v6420_v61  ;;  %5737 = vset.pattern.permute.xlu1 %v8670_v32  ;;  %v2195_v61 = vld [vmem:[%s8539_s4 + $0x30] sm:$0xff] }
 0x109   :  { %1533 = vperm.xlu1 %5737, %v5988_v6   ;;  %5311 = vmatprep.mubr.msk.f32.mxu0 %vm1991_vm2, %v2195_v61  ;;  %v2198_v61 = vld [vmem:[%s8539_s4 + $0x48] sm:$0xff] }
 0x10a   :  { %1333 = vperm.xlu0 %5817, %v6425_v55   ;;  %v6435_v36 = vpop.permute.xlu0 %785  ;;  %5312 = vmatmul.mubr.msk.f32.gmra.mrb[8].mxu0 %vm1991_vm2, %v2196_v25  ;;  %v2199_v25 = vld [vmem:[%s8539_s4 + $0x50] sm:$0xff] }
 0x10b   :  { %8671 = vst [vmem:[#allocation42_spill] sm:$0xff] %v6435_v36  ;;  %v2197_v36 = vld [vmem:[%s8539_s4 + $0x40] sm:$0xff] }
 0x10c   :  { %v6444_v24 = vpop.permute.xlu1 %976  ;;  %5314 = vmatprep.mubr.msk.f32.mxu0 %vm1991_vm2, %v2197_v36  ;;  %v2200_v36 = vld [vmem:[%s8539_s4 + $0x58] sm:$0xff] }
 0x10d   :  { %8672 = vst [vmem:[#allocation43_spill] sm:$0xff] %v6444_v24  ;;  %1645 = vperm.xlu1 %5737, %v6024_v12  }
 0x10e   :  { %1457 = vperm.xlu0 %5817, %v6137_v33   ;;  %v6449_v9 = vpop.permute.xlu0 %788  ;;  %5315 = vmatmul.mubr.msk.f32.gmra.mrb[10].mxu0 %vm1991_vm2, %v2198_v61 }
 0x10f   :  { %8673 = vst [vmem:[#allocation44_spill] sm:$0xff] %v6449_v9  ;;  %5317 = vmatprep.mubr.msk.f32.mxu0 %vm1991_vm2, %v2199_v25 }
 0x111   :  { %5738 = vset.pattern.permute.xlu1 %v8662_v4  ;;  %v6459_v24 = vpop.permute.xlu1 %1306 }
 0x112   :  { %8674 = vst [vmem:[#allocation45_spill] sm:$0xff] %v6459_v24  ;;  %764 = vperm.xlu1 %5738, %v6017_v11   ;;  %1348 = vperm.xlu0 %5817, %v6145_v34   ;;  %v2201_v34 = vld [vmem:[%s8539_s4 + $0x60] sm:$0xff]  ;;  %v6485_v24 = vpop.f32.mrb[0].mxu0 }
 0x113   :  { %v6467_v9 = vpop.permute.xlu0 %864  ;;  %5318 = vmatmul.mubr.msk.f32.gmra.mrb[12].mxu0 %vm1991_vm2, %v2200_v36  ;;  %8677 = vst [vmem:[#allocation48_spill] sm:$0xff] %v6485_v24  ;;  %v2202_v36 = vld [vmem:[%s8539_s4 + $0x68] sm:$0xff]  ;;  %v8577_v62 = vmax.f32 %v6485_v24, 0.0  ;;  %v1976_v24 = vld [vmem:[%s8540_s3 + $0x10] sm:$0xff] }
 0x114   :  { %8675 = vst [vmem:[#allocation46_spill] sm:$0xff] %v6467_v9  ;;  %5320 = vmatprep.mubr.msk.f32.mxu0 %vm1991_vm2, %v2201_v34  ;;  %v6491_v9 = vpop.f32.mrb[1].mxu0 }
 0x115   :  { %8678 = vst [vmem:[#allocation49_spill] sm:$0xff] %v6491_v9  ;;  %v8576_v57 = vmax.f32 %v6491_v9, 0.0 }
 0x116   :  { %5739 = vset.pattern.permute.xlu1 %v8666_v21  ;;  %v6475_v61 = vpop.permute.xlu1 %643  ;;  %5822 = vset.pattern.permute.xlu0 %v8670_v32 }
 0x117   :  { %1094 = vperm.xlu1 %5739, %v6171_v37   ;;  %1639 = vperm.xlu0 %5822, %v5968_v3   ;;  %v6483_v25 = vpop.permute.xlu0 %979  ;;  %v2203_v3 = vld [vmem:[%s8539_s4 + $0x70] sm:$0xff]  ;;  %v5575_v34 = vpack.c.bf16 %v8577_v62, %v8576_v57 }
 0x118   :  { %8676 = vst [vmem:[#allocation47_spill] sm:$0xff] %v6483_v25  ;;  %5321 = vmatmul.mubr.msk.f32.gmra.mrb[14].mxu0 %vm1991_vm2, %v2202_v36  ;;  %v2204_v36 = vld [vmem:[%s8539_s4 + $0x78] sm:$0xff] }
 0x119   :  { %5323 = vmatprep.mubr.msk.f32.mxu0 %vm1991_vm2, %v2203_v3  ;;  %5580 = vmatprep.subr.bf16.mxu0 %v5575_v34  ;;  %v1974_v3 = vld [vmem:[%s8540_s3] sm:$0xff] }
 0x11a   :  { %v6496_v52 = vpop.permute.xlu1 %755  ;;  %5582 = vmatpush3.bf16.msra.mxu0 %v5575_v34  ;;  %5576 = vmatprep.subr.bf16.mxu1 %v5575_v34 }
 0x11b   :  { %8679 = vst [vmem:[#allocation50_spill] sm:$0xff] %v6496_v52  ;;  %5740 = vset.pattern.permute.xlu1 %v8670_v32  ;;  %1642 = vperm.xlu0 %5822, %v5980_v5   ;;  %v6503_v25 = vpop.permute.xlu0 %870 }
 0x11c   :  { %8680 = vst [vmem:[#allocation51_spill] sm:$0xff] %v6503_v25  ;;  %1536 = vperm.xlu1 %5740, %v5995_v7   ;;  %5324 = vmatmul.mubr.msk.f32.gmra.mrb[16].mxu0 %vm1991_vm2, %v2204_v36 }
 0x11d   :  { %5276 = vmatprep.mubr.msk.f32.mxu1 %vm1991_vm2, %v1974_v3  ;;  %v1977_v3 = vld [vmem:[%s8540_s3 + $0x18] sm:$0xff] }
 0x11f   :  { %v6515_v5 = vpop.permute.xlu1 %1197  ;;  %1539 = vperm.xlu0 %5822, %v6002_v8   ;;  %v6518_v9 = vpop.permute.xlu0 %988  ;;  %v1975_v8 = vld [vmem:[%s8540_s3 + $0x8] sm:$0xff] }
 0x120   :  { %8681 = vst [vmem:[#allocation52_spill] sm:$0xff] %v6518_v9  ;;  %1648 = vperm.xlu1 %5740, %v6066_v19   ;;  %5277 = vmatmul.mubr.msk.f32.vlgmr.msra.gmra.mrb[0].mxu1 %vm1991_vm2, %v1975_v8  ;;  %v1979_v8 = vld [vmem:[%s8540_s3 + $0x28] sm:$0xff] }
 0x121   :  { %5578 = vmatpush3.bf16.msra.mxu1 %v5575_v34  ;;  %5279 = vmatprep.mubr.msk.f32.mxu1 %vm1991_vm2, %v1976_v24  ;;  %v1978_v24 = vld [vmem:[%s8540_s3 + $0x20] sm:$0xff] }
 0x123   :  { %1542 = vperm.xlu0 %5822, %v6171_v37   ;;  %v6522_v57 = vpop.permute.xlu0 %879 }
 0x124   :  { %8682 = vst [vmem:[#allocation53_spill] sm:$0xff] %v6522_v57  ;;  %5741 = vset.pattern.permute.xlu1 %v8647_v56  ;;  %v6528_v36 = vpop.permute.xlu1 %1527  ;;  %5280 = vmatmul.mubr.msk.f32.gmra.mrb[2].mxu1 %vm1991_vm2, %v1977_v3 }
 0x125   :  { %319 = vperm.xlu1 %5741, %v6111_v28   ;;  %5282 = vmatprep.mubr.msk.f32.mxu1 %vm1991_vm2, %v1978_v24  ;;  %v1980_v24 = vld [vmem:[%s8540_s3 + $0x30] sm:$0xff] }
 0x127   :  { %1657 = vperm.xlu0 %5822, %v6285_v23   ;;  %v6537_v62 = vpop.permute.xlu0 %997 }
 0x128   :  { %8683 = vst [vmem:[#allocation54_spill] sm:$0xff] %v6537_v62  ;;  %5283 = vmatmul.mubr.msk.f32.gmra.mrb[4].mxu1 %vm1991_vm2, %v1979_v8 }
 0x129   :  { %5742 = vset.pattern.permute.xlu1 %v8650_v0  ;;  %v6547_v57 = vpop.permute.xlu1 %646  ;;  %5285 = vmatprep.mubr.msk.f32.mxu1 %vm1991_vm2, %v1980_v24  ;;  %v1983_v24 = vld [vmem:[%s8540_s3 + $0x48] sm:$0xff] }
 0x12a   :  { %8684 = vst [vmem:[#allocation55_spill] sm:$0xff] %v6547_v57  ;;  %431 = vperm.xlu1 %5742, %v6029_v13  }
 0x12b   :  { %1660 = vperm.xlu0 %5822, %v6017_v11   ;;  %v6552_v34 = vpop.permute.xlu0 %888 }
 0x12c   :  { %8685 = vst [vmem:[#allocation56_spill] sm:$0xff] %v6552_v34  ;;  %v1981_v34 = vld [vmem:[%s8540_s3 + $0x38] sm:$0xff] }
 0x12d   :  { %v6561_v9 = vpop.permute.xlu1 %758  ;;  %5286 = vmatmul.mubr.msk.f32.gmra.mrb[6].mxu1 %vm1991_vm2, %v1981_v34 }
 0x12e   :  { %8686 = vst [vmem:[#allocation57_spill] sm:$0xff] %v6561_v9  ;;  %5743 = vset.pattern.permute.xlu1 %v8653_v53 }
 0x12f   :  { %873 = vperm.xlu1 %5743, %v6103_v27   ;;  %1557 = vperm.xlu0 %5822, %v6425_v55   ;;  %v6567_v3 = vpop.permute.xlu0 %1006 }
 0x130   :  { %8687 = vst [vmem:[#allocation58_spill] sm:$0xff] %v6567_v3  ;;  %v1982_v3 = vld [vmem:[%s8540_s3 + $0x40] sm:$0xff] }
 0x131   :  { %5288 = vmatprep.mubr.msk.f32.mxu1 %vm1991_vm2, %v1982_v3  ;;  %v1985_v3 = vld [vmem:[%s8540_s3 + $0x58] sm:$0xff] }
 0x132   :  { %v6577_v8 = vpop.permute.xlu1 %1200  ;;  %5289 = vmatmul.mubr.msk.f32.gmra.mrb[8].mxu1 %vm1991_vm2, %v1983_v24  ;;  %v1986_v24 = vld [vmem:[%s8540_s3 + $0x60] sm:$0xff] }
 0x133   :  { %985 = vperm.xlu1 %5743, %v6285_v23   ;;  %1560 = vperm.xlu0 %5822, %v6045_v15   ;;  %v6581_v62 = vpop.permute.xlu0 %1009 }
 0x134   :  { %8688 = vst [vmem:[#allocation59_spill] sm:$0xff] %v6581_v62  ;;  %v1984_v62 = vld [vmem:[%s8540_s3 + $0x50] sm:$0xff] }
 0x135   :  { %5291 = vmatprep.mubr.msk.f32.mxu1 %vm1991_vm2, %v1984_v62  ;;  %v1987_v62 = vld [vmem:[%s8540_s3 + $0x68] sm:$0xff] }
 0x136   :  { %5292 = vmatmul.mubr.msk.f32.gmra.mrb[10].mxu1 %vm1991_vm2, %v1985_v3 }
 0x137   :  { %5744 = vset.pattern.permute.xlu1 %v8654_v58  ;;  %v6592_v34 = vpop.permute.xlu1 %1530  ;;  %1566 = vperm.xlu0 %5822, %v6186_v39   ;;  %v6595_v25 = vpop.permute.xlu0 %1012 }
 0x138   :  { %8689 = vst [vmem:[#allocation60_spill] sm:$0xff] %v6595_v25  ;;  %1427 = vperm.xlu1 %5744, %v6096_v26   ;;  %5294 = vmatprep.mubr.msk.f32.mxu1 %vm1991_vm2, %v1986_v24 }
 0x13a   :  { %5295 = vmatmul.mubr.msk.f32.gmra.mrb[12].mxu1 %vm1991_vm2, %v1987_v62 }
 0x13b   :  { %1681 = vperm.xlu0 %5822, %v6137_v33   ;;  %v1988_v33 = vld [vmem:[%s8540_s3 + $0x70] sm:$0xff] }
 0x13c   :  { %5745 = vset.pattern.permute.xlu1 %v8659_v63  ;;  %v6611_v25 = vpop.permute.xlu1 %185  ;;  %v6613_v57 = vpop.permute.xlu0 %1191  ;;  %5297 = vmatprep.mubr.msk.f32.mxu1 %vm1991_vm2, %v1988_v33 }
 0x13d   :  { %8690 = vst [vmem:[#allocation61_spill] sm:$0xff] %v6611_v25  ;;  %1757 = vperm.xlu1 %5745, %v5988_v6   ;;  %v1989_v6 = vld [vmem:[%s8540_s3 + $0x78] sm:$0xff] }
 0x13e   :  { %5298 = vmatmul.mubr.msk.f32.gmra.mrb[14].mxu1 %vm1991_vm2, %v1989_v6 }
 0x13f   :  { %5826 = vset.pattern.permute.xlu0 %v8659_v63 }
 0x140   :  { %v6625_v3 = vpop.permute.xlu1 %313  ;;  %1751 = vperm.xlu0 %5826, %v5961_v2   ;;  %v6628_v25 = vpop.permute.xlu0 %1082 }
 0x141   :  { %8691 = vst [vmem:[#allocation62_spill] sm:$0xff] %v6625_v3  ;;  %5746 = vset.pattern.permute.xlu1 %v8647_v56 }
 0x142   :  { %194 = vperm.xlu1 %5746, %v6118_v30  }
 0x144   :  { %1869 = vperm.xlu0 %5826, %v6024_v12   ;;  %v6638_v24 = vpop.permute.xlu0 %1085 }
 0x145   :  { %v6640_v62 = vpop.permute.xlu1 %537 }
 0x146   :  { %322 = vperm.xlu1 %5746, %v6176_v38  }
 0x148   :  { %1760 = vperm.xlu0 %5826, %v5995_v7   ;;  %v6644_v2 = vpop.permute.xlu0 %1088 }
 0x14a   :  { %5747 = vset.pattern.permute.xlu1 %v8650_v0  ;;  %v6647_v33 = vpop.permute.xlu1 %867 }
 0x14b   :  { %546 = vperm.xlu1 %5747, %v6176_v38  }
 0x14c   :  { %v6650_v52 = vpop.permute.xlu0 %1203  ;;  %1878 = vperm.xlu0 %5826, %v6010_v10  }
 0x14d   :  { %8692 = vst [vmem:[#allocation63_spill] sm:$0xff] %v6650_v52 }
 0x14f   :  { %5748 = vset.pattern.permute.xlu1 %v8653_v53  ;;  %v6654_v12 = vpop.permute.xlu1 %1309 }
 0x150   :  { %876 = vperm.xlu1 %5748, %v6161_v35   ;;  %v6657_v6 = vpop.permute.xlu0 %1206  ;;  %1769 = vperm.xlu0 %5826, %v6103_v27  }
 0x151   :  { %8693 = vst [vmem:[#allocation64_spill] sm:$0xff] %v6657_v6 }
 0x153   :  { %v6660_v7 = vpop.permute.xlu1 %1421 }
 0x154   :  { %5749 = vset.pattern.permute.xlu1 %v8654_v58  ;;  %v6663_v9 = vpop.permute.xlu0 %1103  ;;  %1887 = vperm.xlu0 %5826, %v6111_v28  }
 0x155   :  { %8694 = vst [vmem:[#allocation65_spill] sm:$0xff] %v6663_v9  ;;  %1318 = vperm.xlu1 %5749, %v6171_v37  }
 0x158   :  { %v6667_v38 = vpop.permute.xlu1 %1863  ;;  %v6669_v52 = vpop.permute.xlu0 %1106  ;;  %1778 = vperm.xlu0 %5826, %v6118_v30  }
 0x159   :  { %8695 = vst [vmem:[#allocation66_spill] sm:$0xff] %v6669_v52  ;;  %1430 = vperm.xlu1 %5749, %v6010_v10  }
 0x15c   :  { %v6673_v6 = vpop.permute.xlu0 %1221  ;;  %1781 = vperm.xlu0 %5826, %v6425_v55  }
 0x15d   :  { %8696 = vst [vmem:[#allocation67_spill] sm:$0xff] %v6673_v6  ;;  %5750 = vset.pattern.permute.xlu1 %v8659_v63  ;;  %v6677_v3 = vpop.permute.xlu1 %188 }
 0x15e   :  { %8697 = vst [vmem:[#allocation68_spill] sm:$0xff] %v6677_v3  ;;  %1872 = vperm.xlu1 %5750, %v6066_v19   ;;  %v8581_v3 = vlaneseq }
 0x160   :  { %v6680_v9 = vpop.permute.xlu0 %1224  ;;  %1784 = vperm.xlu0 %5826, %v6045_v15  }
 0x161   :  { %8698 = vst [vmem:[#allocation69_spill] sm:$0xff] %v6680_v9 }
 0x162   :  { %5751 = vset.pattern.permute.xlu1 %v8662_v4  ;;  %v6684_v37 = vpop.permute.xlu1 %428 }
 0x163   :  { %8699 = vst [vmem:[#allocation70_spill] sm:$0xff] %v6684_v37  ;;  %655 = vperm.xlu1 %5751, %v6029_v13  }
 0x164   :  { %v6687_v52 = vpop.permute.xlu0 %1233  ;;  %1790 = vperm.xlu0 %5826, %v6186_v39  }
 0x165   :  { %8700 = vst [vmem:[#allocation71_spill] sm:$0xff] %v6687_v52 }
 0x166   :  { %v6690_v6 = vpop.permute.xlu1 %540 }
 0x167   :  { %8701 = vst [vmem:[#allocation72_spill] sm:$0xff] %v6690_v6  ;;  %5752 = vset.pattern.permute.xlu1 %v8666_v21 }
 0x168   :  { %1097 = vperm.xlu1 %5752, %v6103_v27   ;;  %v6694_v19 = vpop.permute.xlu0 %1124  ;;  %1793 = vperm.xlu0 %5826, %v6059_v18  }
 0x169   :  { %8702 = vst [vmem:[#allocation73_spill] sm:$0xff] %v6694_v19 }
 0x16b   :  { %v6697_v15 = vpop.permute.xlu1 %982 }
 0x16c   :  { %8703 = vst [vmem:[#allocation74_spill] sm:$0xff] %v6697_v15  ;;  %1209 = vperm.xlu1 %5752, %v6285_v23   ;;  %1908 = vperm.xlu0 %5826, %v6203_v44   ;;  %v6729_v15 = vand.u32 127, %v8581_v3 }
 0x16d   :  { %v6701_v13 = vpop.permute.xlu0 %1303 }
 0x16e   :  { %vm566_vm3 = vcmp.eq.s32.totalorder %v6196_v42, %v6729_v15  ;;  %vm342_vm4 = vcmp.eq.s32.totalorder %v6198_v43, %v6729_v15  ;;  %vm790_vm5 = vcmp.eq.s32.totalorder %v6351_v59, %v6729_v15  ;;  %vm567_vm6 = vcmp.eq.s32.totalorder %v6218_v48, %v6729_v15 }
 0x16f   :  { %vm343_vm7 = vcmp.eq.s32.totalorder %v6210_v46, %v6729_v15  ;;  %vm1014_vm8 = vcmp.eq.s32.totalorder %v6267_v20, %v6729_v15  ;;  %vm1238_vm9 = vcmp.eq.s32.totalorder %v6613_v57, %v6729_v15  ;;  %vm218_vm10 = vcmp.eq.s32.totalorder %v6228_v51, %v6729_v15 }
 0x170   :  { %5753 = vset.pattern.permute.xlu1 %v8670_v32  ;;  %v6704_v39 = vpop.permute.xlu1 %1312  ;;  %vm791_vm11 = vcmp.eq.s32.totalorder %v6237_v54, %v6729_v15  ;;  %vm458_vm12 = vcmp.eq.s32.totalorder %v6354_v17, %v6729_v15  ;;  %vm1015_vm13 = vcmp.eq.s32.totalorder %v6300_v29, %v6729_v15  ;;  %vm682_vm14 = vcmp.eq.s32.totalorder %v6475_v61, %v6729_v15 }
 0x171   :  { %1651 = vperm.xlu1 %5753, %v6096_v26   ;;  %v6707_v9 = vpop.permute.xlu0 %1418  ;;  %vm1239_vm15 = vcmp.eq.s32.totalorder %v6337_v16, %v6729_v15  ;;  %vm1462_vm0 = vcmp.eq.s32.totalorder %v6375_v1, %v6729_v15  ;;  %vm906_vm1 = vcmp.eq.s32.totalorder %v6647_v33, %v6729_v15 }
 0x172   :  { %vm1463_vm2 = vcmp.eq.s32.totalorder %v6707_v9, %v6729_v15 }
 0x175   :  { %5754 = vset.pattern.permute.xlu1 %v8662_v4  ;;  %v6710_v19 = vpop.permute.xlu1 %1754  ;;  %v6712_v18 = vpop.permute.xlu0 %1424 }
 0x176   :  { %658 = vperm.xlu1 %5754, %v6118_v30  }
 0x179   :  { %v6715_v23 = vpop.permute.xlu1 %1866  ;;  %v6717_v44 = vpop.permute.xlu0 %1315 }
 0x17a   :  { %5755 = vset.pattern.permute.xlu1 %v8666_v21 }
 0x17b   :  { %1100 = vperm.xlu1 %5755, %v6161_v35  }
 0x17d   :  { %v6721_v52 = vpop.permute.xlu0 %1433 }
 0x17e   :  { %8704 = vst [vmem:[#allocation75_spill] sm:$0xff] %v6721_v52  ;;  %v6723_v6 = vpop.permute.xlu1 %761 }
 0x17f   :  { %1212 = vperm.xlu1 %5755, %v6017_v11   ;;  %v8584_v11 = vmov 0.0  }
 0x180   :  { %v4609_v3 = vsel %vm566_vm3, 1.0, %v8584_v11  ;;  %v4641_v42 = vsel %vm790_vm5, 1.0, %v8584_v11  ;;  %v4610_v46 = vsel %vm567_vm6, 1.0, %v8584_v11  ;;  %v4578_v48 = vsel %vm343_vm7, 1.0, %v8584_v11 }
 0x181   :  { %v6726_v37 = vpop.permute.xlu0 %1324  ;;  %v4673_v57 = vsel %vm1014_vm8, 1.0, %v8584_v11  ;;  %v4705_v51 = vsel %vm1238_vm9, 1.0, %v8584_v11  ;;  %v4565_v54 = vsel %vm218_vm10, 1.0, %v8584_v11  ;;  %v4642_v20 = vsel %vm791_vm11, 1.0, %v8584_v11 }
 0x182   :  { %8705 = vst [vmem:[#allocation76_spill] sm:$0xff] %v6726_v37  ;;  %v4577_v37 = vsel %vm342_vm4, 1.0, %v8584_v11  ;;  %v4597_v17 = vsel %vm458_vm12, 1.0, %v8584_v11  ;;  %v615_v29 = vadd.f32 %v4610_v46, %v4578_v48  ;;  %v4629_v61 = vsel %vm682_vm14, 1.0, %v8584_v11 }
 0x183   :  { %5756 = vset.pattern.permute.xlu1 %v8670_v32  ;;  %v6732_v30 = vpop.permute.xlu1 %1091  ;;  %v614_v43 = vadd.f32 %v4609_v3, %v4577_v37  ;;  %v4706_v46 = vsel %vm1239_vm15, 1.0, %v8584_v11  ;;  %v4737_v16 = vsel %vm1462_vm0, 1.0, %v8584_v11  ;;  %v4661_v48 = vsel %vm906_vm1, 1.0, %v8584_v11 }
 0x184   :  { %1654 = vperm.xlu1 %5756, %v6010_v10   ;;  %vm1130_vm3 = vcmp.eq.s32.totalorder %v6732_v30, %v6729_v15  ;;  %vm1910_vm4 = vcmp.eq.s32.totalorder %v6667_v38, %v6729_v15  ;;  %v4738_v9 = vsel %vm1463_vm2, 1.0, %v8584_v11  ;;  %vm1354_vm6 = vcmp.eq.s32.totalorder %v6717_v44, %v6729_v15 }
 0x185   :  { %v6739_v35 = vpop.permute.xlu0 %1442  ;;  %vm2428_vm7 = vcmask 130048   ;;  %vm1911_vm8 = vcmp.eq.s32.totalorder %v6715_v23, %v6729_v15  ;;  %v4725_v44 = vsel %vm1354_vm6, 1.0, %v8584_v11  ;;  %vm454_vm11 = vcmp.eq.s32.totalorder %v6190_v40, %v6729_v15 }
 0x186   :  { %8706 = vst [vmem:[#allocation77_spill] sm:$0xff] %v6739_v35  ;;  %v838_v35 = vadd.f32 %v4641_v42, %v614_v43  ;;  %v4674_v43 = vsel %vm1015_vm13, 1.0, %v8584_v11  ;;  %v4802_v23 = vsel %vm1911_vm8, 1.0, %v8584_v11  ;;  %vm214_vm12 = vcmp.eq.s32.totalorder %v6192_v41, %v6729_v15 }
 0x187   :  { %vm215_vm13 = vcmp.eq.s32.totalorder %v6207_v45, %v6729_v15  ;;  %vm455_vm14 = vcmp.eq.s32.totalorder %v6280_v22, %v6729_v15  ;;  %vm678_vm15 = vcmp.eq.s32.totalorder %v6225_v50, %v6729_v15  ;;  %v4561_v40 = vsel %vm214_vm12, 1.0, %v8584_v11 }
 0x188   :  { %5757 = vset.pattern.permute.xlu1 %v8647_v56  ;;  %v6746_v52 = vpop.permute.xlu1 %1533  ;;  %v1062_v3 = vadd.f32 %v4673_v57, %v838_v35  ;;  %v839_v35 = vadd.f32 %v4642_v20, %v615_v29  ;;  %v506_v57 = vadd.f32 %v4597_v17, %v4565_v54  ;;  %v4693_v20 = vsel %vm1130_vm3, 1.0, %v8584_v11 }
 0x189   :  { %197 = vperm.xlu1 %5757, %v6425_v55   ;;  %v6749_v10 = vpop.permute.xlu0 %1333  ;;  %v4562_v45 = vsel %vm215_vm13, 1.0, %v8584_v11  ;;  %vm216_vm0 = vcmp.eq.s32.totalorder %v6215_v47, %v6729_v15  ;;  %v4594_v22 = vsel %vm455_vm14, 1.0, %v8584_v11  ;;  %vm217_vm1 = vcmp.eq.s32.totalorder %v6222_v49, %v6729_v15  ;;  %v8715_v49 = vld [vmem:[#allocation13_spill] sm:$0xff] }
 0x18a   :  { %8707 = vst [vmem:[#allocation78_spill] sm:$0xff] %v6749_v10  ;;  %v730_v1 = vadd.f32 %v4629_v61, %v506_v57  ;;  %v4625_v50 = vsel %vm678_vm15, 1.0, %v8584_v11  ;;  %vm456_vm2 = vcmp.eq.s32.totalorder %v6254_v60, %v6729_v15  ;;  %v4563_v47 = vsel %vm216_vm0, 1.0, %v8584_v11 }
 0x18b   :  { %vm457_vm6 = vcmp.eq.s32.totalorder %v8715_v49, %v6729_v15  ;;  %vm1127_vm12 = vcmp.eq.s32.totalorder %v6628_v25, %v6729_v15 }
 0x18c   :  { %v6754_v59 = vpop.permute.xlu1 %1645 }
 0x18d   :  { %5758 = vset.pattern.permute.xlu1 %v8650_v0  ;;  %v6763_v10 = vpop.permute.xlu0 %1457 }
 0x18e   :  { %8708 = vst [vmem:[#allocation79_spill] sm:$0xff] %v6763_v10  ;;  %437 = vperm.xlu1 %5758, %v6425_v55   ;;  %v1286_v10 = vadd.f32 %v4705_v51, %v1062_v3  ;;  %v954_v3 = vadd.f32 %v4661_v48, %v730_v1 }
 0x190   :  { %v1510_v54 = vadd.f32 %v4737_v16, %v1286_v10  ;;  %v1178_v10 = vadd.f32 %v4693_v20, %v954_v3 }
 0x191   :  { %v6783_v37 = vpop.permute.xlu1 %764  ;;  %v6785_v42 = vpop.permute.xlu0 %1348 }
 0x192   :  { %8709 = vst [vmem:[#allocation80_spill] sm:$0xff] %v6785_v42  ;;  %549 = vperm.xlu1 %5758, %v6037_v14   ;;  %v1063_v14 = vadd.f32 %v4674_v43, %v839_v35  ;;  %v4801_v43 = vsel %vm1910_vm4, 1.0, %v8584_v11  ;;  %v1402_v1 = vadd.f32 %v4725_v44, %v1178_v10  ;;  %v4564_v44 = vsel %vm217_vm1, 1.0, %v8584_v11  ;;  %v8752_v42 = vld [vmem:[#allocation47_spill] sm:$0xff] }
 0x194   :  { %v1287_v30 = vadd.f32 %v4706_v46, %v1063_v14 }
 0x196   :  { %5759 = vset.pattern.permute.xlu1 %v8653_v53  ;;  %v6804_v51 = vpop.permute.xlu1 %1094  ;;  %v1640_v33 = vpop.permute.xlu0 %1639  ;;  %v1511_v38 = vadd.f32 %v4738_v9, %v1287_v30 }
 0x197   :  { %vm1686_vm5 = vcmp.eq.s32.totalorder %v1640_v33, %v6729_v15  ;;  %991 = vperm.xlu1 %5759, %v6111_v28  }
 0x198   :  { %v4769_v17 = vsel %vm1686_vm5, 1.0, %v8584_v11 }
 0x199   :  { %v1734_v29 = vadd.f32 %v4769_v17, %v1510_v54  ;;  %v4593_v17 = vsel %vm454_vm11, 1.0, %v8584_v11 }
 0x19a   :  { %v1643_v61 = vpop.permute.xlu0 %1642  ;;  %v502_v3 = vadd.f32 %v4593_v17, %v4561_v40  ;;  %v8718_v17 = vld [vmem:[#allocation14_spill] sm:$0xff]  ;;  %v4596_v40 = vsel %vm457_vm6, 1.0, %v8584_v11  ;;  %vm1352_vm6 = vcmp.eq.s32.totalorder %v6654_v12, %v6729_v15 }
 0x19b   :  { %v6818_v28 = vadd.f32 %v4801_v43, %v1734_v29  ;;  %vm1687_vm9 = vcmp.eq.s32.totalorder %v1643_v61, %v6729_v15  ;;  %5760 = vset.pattern.permute.xlu1 %v8654_v58  ;;  %v6822_v35 = vpop.permute.xlu1 %1536  ;;  %v8713_v29 = vld [vmem:[#allocation5_spill] sm:$0xff]  ;;  %v8716_v61 = vld [vmem:[#allocation15_spill] sm:$0xff]  ;;  %v505_v25 = vadd.f32 %v4596_v40, %v4564_v44  ;;  %v8725_v44 = vld [vmem:[#allocation46_spill] sm:$0xff] }
 0x19c   :  { %v4770_v57 = vsel %vm1687_vm9, 1.0, %v8584_v11  ;;  %1321 = vperm.xlu1 %5760, %v6103_v27   ;;  %v5828_v27 = vld [vmem:[%s8620_s29 + $0x20] sm:$0xff]  ;;  %vm344_vm4 = vcmp.eq.s32.totalorder %v8713_v29, %v6729_v15  ;;  %v8714_v43 = vld [vmem:[#allocation9_spill] sm:$0xff]  ;;  %vm903_vm8 = vcmp.eq.s32.totalorder %v8716_v61, %v6729_v15  ;;  %vm905_vm1 = vcmp.eq.s32.totalorder %v8725_v44, %v6729_v15 }
 0x19d   :  { %8710 = vst [vmem:[#allocation81_spill] sm:$0xff] %v6818_v28  ;;  %v1735_v46 = vadd.f32 %v4770_v57, %v1511_v38  ;;  %5358 = vmatprep.mubr.msk.f32.mxu0 %vm2428_vm7, %v6818_v28  ;;  %vm902_vm5 = vcmp.eq.s32.totalorder %v8714_v43, %v6729_v15  ;;  %v503_v38 = vadd.f32 %v4594_v22, %v4562_v45  ;;  %v4658_v45 = vsel %vm903_vm8, 1.0, %v8584_v11  ;;  %v8719_v22 = vld [vmem:[#allocation19_spill] sm:$0xff] }
 0x19e   :  { %v1540_v14 = vpop.permute.xlu0 %1539  ;;  %v726_v57 = vadd.f32 %v4625_v50, %v502_v3  ;;  %vm792_vm11 = vcmp.eq.s32.totalorder %v8719_v22, %v6729_v15  ;;  %v8723_v22 = vld [vmem:[#allocation31_spill] sm:$0xff]  ;;  %v4660_v44 = vsel %vm905_vm1, 1.0, %v8584_v11  ;;  %vm1574_vm8 = vcmp.eq.s32.totalorder %v6528_v36, %v6729_v15 }
 0x19f   :  { %v6830_v16 = vadd.f32 %v4802_v23, %v1735_v46  ;;  %vm1578_vm10 = vcmp.eq.s32.totalorder %v1540_v14, %v6729_v15  ;;  %v6833_v48 = vpop.permute.xlu1 %1648  ;;  %v4595_v46 = vsel %vm456_vm2, 1.0, %v8584_v11  ;;  %v8717_v23 = vld [vmem:[#allocation30_spill] sm:$0xff]  ;;  %v6901_v14 = vld [vmem:[%s8620_s29 + $0x58] sm:$0xff]  ;;  %vm904_vm15 = vcmp.eq.s32.totalorder %v8723_v22, %v6729_v15 }
 0x1a0   :  { %v4757_v33 = vsel %vm1578_vm10, 1.0, %v8584_v11  ;;  %5761 = vset.pattern.permute.xlu1 %v8659_v63  ;;  %vm680_vm9 = vcmp.eq.s32.totalorder %v8717_v23, %v6729_v15  ;;  %vm568_vm10 = vcmp.eq.s32.totalorder %v8718_v17, %v6729_v15  ;;  %v504_v50 = vadd.f32 %v4595_v46, %v4563_v47  ;;  %v8722_v17 = vld [vmem:[#allocation23_spill] sm:$0xff]  ;;  %v8727_v22 = vld [vmem:[#allocation45_spill] sm:$0xff] }
 0x1a1   :  { %8711 = vst [vmem:[#allocation82_spill] sm:$0xff] %v6830_v16  ;;  %v6837_v9 = vadd.f32 %v4757_v33, %v1402_v1  ;;  %1763 = vperm.xlu1 %5761, %v5828_v27   ;;  %5359 = vmatmul.mubr.msk.f32.vlgmr.msra.gmra.mrb[2].mxu0 %vm2428_vm7, %v6830_v16  ;;  %v4579_v33 = vsel %vm344_vm4, 1.0, %v8584_v11  ;;  %v4657_v27 = vsel %vm902_vm5, 1.0, %v8584_v11  ;;  %v4627_v29 = vsel %vm680_vm9, 1.0, %v8584_v11  ;;  %v6969_v16 = vld [vmem:[%s8621_s19 + $0x48] sm:$0xff] }
 0x1a2   :  { %v6844_v54 = vpop.permute.xlu0 %1542  ;;  %v950_v61 = vadd.f32 %v4657_v27, %v726_v57  ;;  %v4611_v23 = vsel %vm568_vm10, 1.0, %v8584_v11  ;;  %vm681_vm14 = vcmp.eq.s32.totalorder %v8722_v17, %v6729_v15  ;;  %v4690_v46 = vsel %vm1127_vm12, 1.0, %v8584_v11  ;;  %v6942_v57 = vld [vmem:[%s8620_s29 + $0x48] sm:$0xff] }
 0x1a3   :  { %v728_v27 = vadd.f32 %v4627_v29, %v504_v50  ;;  %v616_v40 = vadd.f32 %v4611_v23, %v4579_v33  ;;  %vm1350_vm2 = vcmp.eq.s32.totalorder %v6701_v13, %v6729_v15  ;;  %vm1240_vm4 = vcmp.eq.s32.totalorder %v6515_v5, %v6729_v15 }
 0x1a4   :  { %v6846_v30 = vpop.permute.xlu1 %319  ;;  %vm1128_vm5 = vcmp.eq.s32.totalorder %v6638_v24, %v6729_v15  ;;  %v4721_v24 = vsel %vm1350_vm2, 1.0, %v8584_v11  ;;  %vm1575_vm9 = vcmp.eq.s32.totalorder %v6592_v34, %v6729_v15  ;;  %v4723_v13 = vsel %vm1352_vm6, 1.0, %v8584_v11  ;;  %v6999_v34 = vld [vmem:[%s8621_s19 + $0x38] sm:$0xff] }
 0x1a5   :  { %1875 = vperm.xlu1 %5761, %v6096_v26   ;;  %vm1464_vm10 = vcmp.eq.s32.totalorder %v6660_v7, %v6729_v15  ;;  %vm1799_vm12 = vcmp.eq.s32.totalorder %v6710_v19, %v6729_v15  ;;  %vm1577_vm2 = vcmp.eq.s32.totalorder %v6822_v35, %v6729_v15 }
 0x1a6   :  { %v6849_v20 = vpop.permute.xlu0 %1657  ;;  %v4739_v19 = vsel %vm1464_vm10, 1.0, %v8584_v11  ;;  %v4756_v35 = vsel %vm1577_vm2, 1.0, %v8584_v11  ;;  %vm1241_vm10 = vcmp.eq.s32.totalorder %v6577_v8, %v6729_v15 }
 0x1a9   :  { %5762 = vset.pattern.permute.xlu1 %v8647_v56  ;;  %v6862_v26 = vpop.permute.xlu1 %431 }
 0x1aa   :  { %328 = vperm.xlu1 %5762, %v6125_v31   ;;  %v6867_v41 = vpop.permute.xlu0 %1660  ;;  %v8712_v31 = vld [vmem:[#allocation2_spill] sm:$0xff] }
 0x1ab   :  { %vm679_vm3 = vcmp.eq.s32.totalorder %v8712_v31, %v6729_v15  ;;  %v8720_v31 = vld [vmem:[#allocation21_spill] sm:$0xff] }
 0x1ac   :  { %v4626_v1 = vsel %vm679_vm3, 1.0, %v8584_v11  ;;  %vm1126_vm13 = vcmp.eq.s32.totalorder %v8720_v31, %v6729_v15  ;;  %v8724_v31 = vld [vmem:[#allocation33_spill] sm:$0xff]  ;;  %vm1351_vm3 = vcmp.eq.s32.totalorder %v8727_v22, %v6729_v15 }
 0x1ad   :  { %v727_v3 = vadd.f32 %v4626_v1, %v503_v38  ;;  %v4643_v38 = vsel %vm792_vm11, 1.0, %v8584_v11  ;;  %v4689_v1 = vsel %vm1126_vm13, 1.0, %v8584_v11  ;;  %vm1016_vm0 = vcmp.eq.s32.totalorder %v8724_v31, %v6729_v15 }
 0x1ae   :  { %5763 = vset.pattern.permute.xlu1 %v8650_v0  ;;  %v6890_v60 = vpop.permute.xlu1 %873  ;;  %v6892_v10 = vpop.permute.xlu0 %1557  ;;  %v840_v29 = vadd.f32 %v4643_v38, %v616_v40  ;;  %v1174_v23 = vadd.f32 %v4689_v1, %v950_v61  ;;  %v4675_v31 = vsel %vm1016_vm0, 1.0, %v8584_v11  ;;  %v4722_v61 = vsel %vm1351_vm3, 1.0, %v8584_v11 }
 0x1af   :  { %440 = vperm.xlu1 %5763, %v6901_v14   ;;  %v951_v47 = vadd.f32 %v4658_v45, %v727_v3  ;;  %v4628_v45 = vsel %vm681_vm14, 1.0, %v8584_v11  ;;  %v4659_v3 = vsel %vm904_vm15, 1.0, %v8584_v11  ;;  %v4707_v38 = vsel %vm1240_vm4, 1.0, %v8584_v11 }
 0x1b0   :  { %v729_v5 = vadd.f32 %v4628_v45, %v505_v25  ;;  %v1064_v25 = vadd.f32 %v4675_v31, %v840_v29  ;;  %v1398_v40 = vadd.f32 %v4721_v24, %v1174_v23  ;;  %vm1576_vm11 = vcmp.eq.s32.totalorder %v6746_v52, %v6729_v15 }
 0x1b1   :  { %v1175_v50 = vadd.f32 %v4690_v46, %v951_v47  ;;  %v952_v47 = vadd.f32 %v4659_v3, %v728_v27  ;;  %v4691_v46 = vsel %vm1128_vm5, 1.0, %v8584_v11  ;;  %v4753_v3 = vsel %vm1574_vm8, 1.0, %v8584_v11 }
 0x1b2   :  { %v6927_v43 = vpop.permute.xlu1 %985  ;;  %v6929_v49 = vpop.permute.xlu0 %1560  ;;  %v953_v27 = vadd.f32 %v4660_v44, %v729_v5  ;;  %v1288_v45 = vadd.f32 %v4707_v38, %v1064_v25  ;;  %vm1129_vm13 = vcmp.eq.s32.totalorder %v6644_v2, %v6729_v15  ;;  %vm1688_vm14 = vcmp.eq.s32.totalorder %v6754_v59, %v6729_v15  ;;  %v5833_v25 = vld [vmem:[%s8620_s29 + $0x28] sm:$0xff] }
 0x1b3   :  { %8721 = vst [vmem:[#allocation2_spill] sm:$0xff] %v6929_v49  ;;  %5764 = vset.pattern.permute.xlu1 %v8653_v53  ;;  %v1399_v12 = vadd.f32 %v4722_v61, %v1175_v50  ;;  %v1176_v22 = vadd.f32 %v4691_v46, %v952_v47  ;;  %v4754_v50 = vsel %vm1575_vm9, 1.0, %v8584_v11  ;;  %v4755_v31 = vsel %vm1576_vm11, 1.0, %v8584_v11 }
 0x1b4   :  { %882 = vperm.xlu1 %5764, %v6942_v57   ;;  %vm1353_vm0 = vcmp.eq.s32.totalorder %v6704_v39, %v6729_v15  ;;  %v4786_v2 = vsel %vm1799_vm12, 1.0, %v8584_v11  ;;  %v1622_v59 = vadd.f32 %v4753_v3, %v1398_v40  ;;  %v4692_v5 = vsel %vm1129_vm13, 1.0, %v8584_v11 }
 0x1b5   :  { %v1400_v29 = vadd.f32 %v4723_v13, %v1176_v22  ;;  %v1623_v23 = vadd.f32 %v4754_v50, %v1399_v12  ;;  %v4771_v7 = vsel %vm1688_vm14, 1.0, %v8584_v11  ;;  %v1512_v61 = vadd.f32 %v4739_v19, %v1288_v45 }
 0x1b6   :  { %v6954_v17 = vpop.permute.xlu0 %1566  ;;  %v4724_v12 = vsel %vm1353_vm0, 1.0, %v8584_v11  ;;  %vm1465_vm11 = vcmp.eq.s32.totalorder %v6712_v18, %v6729_v15  ;;  %vm1689_vm12 = vcmp.eq.s32.totalorder %v6833_v48, %v6729_v15  ;;  %v7117_v48 = vld [vmem:[%s8621_s19 + $0x58] sm:$0xff]  ;;  %vm572_vm14 = vcmp.eq.s32.totalorder %v6640_v62, %v6729_v15 }
 0x1b7   :  { %8726 = vst [vmem:[#allocation5_spill] sm:$0xff] %v6954_v17  ;;  %v6962_v33 = vpop.permute.xlu1 %1427  ;;  %v1624_v38 = vadd.f32 %v4755_v31, %v1400_v29  ;;  %v7038_v13 = vadd.f32 %v4786_v2, %v1623_v23  ;;  %v1736_v45 = vadd.f32 %v4771_v7, %v1512_v61  ;;  %v7068_v2 = vld [vmem:[%s8621_s19 + $0x50] sm:$0xff]  ;;  %v8737_v7 = vld [vmem:[#allocation25_spill] sm:$0xff]  ;;  %v8738_v61 = vld [vmem:[#allocation43_spill] sm:$0xff]  ;;  %vm796_vm0 = vcmp.eq.s32.totalorder %v6723_v6, %v6729_v15 }
 0x1b8   :  { %994 = vperm.xlu1 %5764, %v6969_v16   ;;  %vm793_vm8 = vcmp.eq.s32.totalorder %v8737_v7, %v6729_v15  ;;  %vm1017_vm9 = vcmp.eq.s32.totalorder %v8738_v61, %v6729_v15 }
 0x1b9   :  { %8729 = vst [vmem:[#allocation13_spill] sm:$0xff] %v7038_v13 }
 0x1ba   :  { %v6983_v1 = vpop.permute.xlu0 %1681 }
 0x1bc   :  { %5765 = vset.pattern.permute.xlu1 %v8654_v58  ;;  %v1758_v36 = vpop.permute.xlu1 %1757 }
 0x1bd   :  { %1436 = vperm.xlu1 %5765, %v6999_v34   ;;  %vm1800_vm15 = vcmp.eq.s32.totalorder %v1758_v36, %v6729_v15  ;;  %v1177_v36 = vadd.f32 %v4692_v5, %v953_v27  ;;  %v8736_v5 = vld [vmem:[#allocation12_spill] sm:$0xff] }
 0x1be   :  { %v4787_v47 = vsel %vm1800_vm15, 1.0, %v8584_v11  ;;  %vm345_vm6 = vcmp.eq.s32.totalorder %v8736_v5, %v6729_v15 }
 0x1bf   :  { %v1752_v44 = vpop.permute.xlu0 %1751  ;;  %v7040_v3 = vadd.f32 %v4787_v47, %v1624_v38  ;;  %v1401_v39 = vadd.f32 %v4724_v12, %v1177_v36  ;;  %v7085_v47 = vld [vmem:[%s8621_s19 + $0x40] sm:$0xff]  ;;  %v4580_v38 = vsel %vm345_vm6, 1.0, %v8584_v11  ;;  %v4676_v36 = vsel %vm1017_vm9, 1.0, %v8584_v11 }
 0x1c0   :  { %vm1798_vm1 = vcmp.eq.s32.totalorder %v1752_v44, %v6729_v15 }
 0x1c1   :  { %v4785_v24 = vsel %vm1798_vm1, 1.0, %v8584_v11  ;;  %5766 = vset.pattern.permute.xlu1 %v8659_v63  ;;  %v7025_v52 = vpop.permute.xlu1 %194  ;;  %8730 = vst [vmem:[#allocation15_spill] sm:$0xff] %v7040_v3  ;;  %v1625_v19 = vadd.f32 %v4756_v35, %v1401_v39  ;;  %vm1020_vm1 = vcmp.eq.s32.totalorder %v6927_v43, %v6729_v15  ;;  %v8742_v43 = vld [vmem:[#allocation75_spill] sm:$0xff] }
 0x1c2   :  { %v7029_v46 = vadd.f32 %v4785_v24, %v1622_v59  ;;  %1766 = vperm.xlu1 %5766, %v5833_v25   ;;  %v4644_v25 = vsel %vm793_vm8, 1.0, %v8584_v11  ;;  %v4679_v6 = vsel %vm1020_vm1, 1.0, %v8584_v11  ;;  %vm1468_vm2 = vcmp.eq.s32.totalorder %v8742_v43, %v6729_v15 }
 0x1c3   :  { %v1870_v40 = vpop.permute.xlu0 %1869  ;;  %vm1466_vm1 = vcmp.eq.s32.totalorder %v6962_v33, %v6729_v15 }
 0x1c4   :  { %8728 = vst [vmem:[#allocation9_spill] sm:$0xff] %v7029_v46  ;;  %vm1912_vm3 = vcmp.eq.s32.totalorder %v1870_v40, %v6729_v15  ;;  %5330 = vmatprep.mubr.msk.f32.mxu1 %vm2428_vm7, %v7029_v46 }
 0x1c5   :  { %v4803_v22 = vsel %vm1912_vm3, 1.0, %v8584_v11  ;;  %v7047_v50 = vpop.permute.xlu1 %322  ;;  %5331 = vmatmul.mubr.msk.f32.vlgmr.msra.gmra.mrb[0].mxu1 %vm2428_vm7, %v7038_v13  ;;  %vm1692_vm3 = vcmp.eq.s32.totalorder %v6849_v20, %v6729_v15  ;;  %v7167_v20 = vld [vmem:[%s8621_s19 + $0x60] sm:$0xff] }
 0x1c6   :  { %8731 = vst [vmem:[#allocation30_spill] sm:$0xff] %v7047_v50  ;;  %v7051_v29 = vadd.f32 %v4803_v22, %v1736_v45  ;;  %5767 = vset.pattern.permute.xlu1 %v8662_v4  ;;  %5333 = vmatprep.mubr.msk.f32.mxu1 %vm2428_vm7, %v7040_v3  ;;  %v5836_v45 = vld [vmem:[%s8620_s29 + $0x30] sm:$0xff]  ;;  %v4708_v22 = vsel %vm1241_vm10, 1.0, %v8584_v11  ;;  %v8750_v3 = vld [vmem:[#allocation50_spill] sm:$0xff] }
 0x1c7   :  { %661 = vperm.xlu1 %5767, %v6425_v55   ;;  %v1761_v27 = vpop.permute.xlu0 %1760  ;;  %v8735_v55 = vld [vmem:[#allocation16_spill] sm:$0xff] }
 0x1c8   :  { %8732 = vst [vmem:[#allocation14_spill] sm:$0xff] %v7051_v29  ;;  %vm1801_vm4 = vcmp.eq.s32.totalorder %v1761_v27, %v6729_v15  ;;  %5361 = vmatprep.mubr.msk.f32.mxu0 %vm2428_vm7, %v7051_v29  ;;  %vm569_vm5 = vcmp.eq.s32.totalorder %v8735_v55, %v6729_v15  ;;  %v4740_v27 = vsel %vm1465_vm11, 1.0, %v8584_v11  ;;  %vm794_vm11 = vcmp.eq.s32.totalorder %v8750_v3, %v6729_v15  ;;  %v8753_v50 = vld [vmem:[#allocation64_spill] sm:$0xff] }
 0x1c9   :  { %v4788_v23 = vsel %vm1801_vm4, 1.0, %v8584_v11  ;;  %v4612_v24 = vsel %vm569_vm5, 1.0, %v8584_v11 }
 0x1ca   :  { %v7061_v31 = vadd.f32 %v4788_v23, %v1625_v19  ;;  %v7063_v44 = vpop.permute.xlu1 %546  ;;  %v617_v12 = vadd.f32 %v4612_v24, %v4580_v38  ;;  %v4772_v23 = vsel %vm1689_vm12, 1.0, %v8584_v11  ;;  %v8741_v38 = vld [vmem:[#allocation62_spill] sm:$0xff] }
 0x1cb   :  { %8734 = vst [vmem:[#allocation21_spill] sm:$0xff] %v7063_v44  ;;  %773 = vperm.xlu1 %5767, %v7068_v2   ;;  %vm348_vm15 = vcmp.eq.s32.totalorder %v8741_v38, %v6729_v15 }
 0x1cc   :  { %8733 = vst [vmem:[#allocation19_spill] sm:$0xff] %v7061_v31  ;;  %5334 = vmatmul.mubr.msk.f32.gmra.mrb[2].mxu1 %vm2428_vm7, %v7061_v31  ;;  %v841_v35 = vadd.f32 %v4644_v25, %v617_v12  ;;  %v4615_v25 = vsel %vm572_vm14, 1.0, %v8584_v11  ;;  %v4583_v62 = vsel %vm348_vm15, 1.0, %v8584_v11  ;;  %v4647_v12 = vsel %vm796_vm0, 1.0, %v8584_v11 }
 0x1cd   :  { %v8749_v31 = vmov 0.0   ;;  %vm1243_vm14 = vcmp.eq.s32.totalorder %v8753_v50, %v6729_v15 }
 0x1ce   :  { %v1065_v39 = vadd.f32 %v4676_v36, %v841_v35  ;;  %v7146_v35 = vld [vmem:[%s8620_s29 + $0x38] sm:$0xff]  ;;  %v4645_v3 = vsel %vm794_vm11, 1.0, %v8749_v31  ;;  %v4741_v50 = vsel %vm1466_vm1, 1.0, %v8749_v31 }
 0x1cf   :  { %5768 = vset.pattern.permute.xlu1 %v8666_v21  ;;  %v7076_v59 = vpop.permute.xlu1 %876 }
 0x1d0   :  { %1215 = vperm.xlu1 %5768, %v7085_v47   ;;  %v1289_v19 = vadd.f32 %v4708_v22, %v1065_v39 }
 0x1d2   :  { %v1513_v55 = vadd.f32 %v4740_v27, %v1289_v19  ;;  %v4743_v19 = vsel %vm1468_vm2, 1.0, %v8584_v11 }
 0x1d4   :  { %5769 = vset.pattern.permute.xlu1 %v8670_v32  ;;  %v7096_v40 = vpop.permute.xlu1 %1318  ;;  %v1737_v18 = vadd.f32 %v4772_v23, %v1513_v55  ;;  %v7161_v55 = vld [vmem:[%s8620_s29 + $0x60] sm:$0xff] }
 0x1d5   :  { %1545 = vperm.xlu1 %5769, %v5836_v45   ;;  %v620_v45 = vadd.f32 %v4615_v25, %v4583_v62 }
 0x1d7   :  { %v844_v22 = vadd.f32 %v4647_v12, %v620_v45  ;;  %v7185_v45 = vld [vmem:[%s8620_s29 + $0x50] sm:$0xff] }
 0x1d8   :  { %v7107_v8 = vpop.permute.xlu1 %1430 }
 0x1d9   :  { %5770 = vset.pattern.permute.xlu1 %v8662_v4  ;;  %v1068_v27 = vadd.f32 %v4679_v6, %v844_v22  ;;  %v7194_v22 = vld [vmem:[%s8620_s29 + $0x40] sm:$0xff]  ;;  %vm1467_vm0 = vcmp.eq.s32.totalorder %v7107_v8, %v6729_v15 }
 0x1da   :  { %664 = vperm.xlu1 %5770, %v6901_v14  }
 0x1dd   :  { %v1873_v5 = vpop.permute.xlu1 %1872 }
 0x1de   :  { %vm1913_vm13 = vcmp.eq.s32.totalorder %v1873_v5, %v6729_v15  ;;  %776 = vperm.xlu1 %5770, %v7117_v48  }
 0x1df   :  { %v4804_v7 = vsel %vm1913_vm13, 1.0, %v8584_v11  ;;  %vm1018_vm13 = vcmp.eq.s32.totalorder %v8752_v42, %v6729_v15  ;;  %v4710_v42 = vsel %vm1243_vm14, 1.0, %v8749_v31  ;;  %vm1579_vm14 = vcmp.eq.s32.totalorder %v6844_v54, %v6729_v15  ;;  %v8766_v54 = vld [vmem:[#allocation61_spill] sm:$0xff] }
 0x1e0   :  { %v7121_v24 = vadd.f32 %v4804_v7, %v1737_v18  ;;  %v4775_v18 = vsel %vm1692_vm3, 1.0, %v8584_v11  ;;  %vm220_vm1 = vcmp.eq.s32.totalorder %v8766_v54, %v6729_v15 }
 0x1e2   :  { %8739 = vst [vmem:[#allocation23_spill] sm:$0xff] %v7121_v24  ;;  %5771 = vset.pattern.permute.xlu1 %v8666_v21  ;;  %v7126_v61 = vpop.permute.xlu1 %655  ;;  %5362 = vmatmul.mubr.msk.f32.gmra.mrb[4].mxu0 %vm2428_vm7, %v7121_v24  ;;  %v8748_v24 = vld [vmem:[#allocation57_spill] sm:$0xff] }
 0x1e3   :  { %8740 = vst [vmem:[#allocation31_spill] sm:$0xff] %v7126_v61  ;;  %1218 = vperm.xlu1 %5771, %v6969_v16   ;;  %vm795_vm10 = vcmp.eq.s32.totalorder %v8748_v24, %v6729_v15  ;;  %v7241_v24 = vld [vmem:[%s8621_s19 + $0x68] sm:$0xff] }
 0x1e4   :  { %v4646_v46 = vsel %vm795_vm10, 1.0, %v8749_v31 }
 0x1e7   :  { %5772 = vset.pattern.permute.xlu1 %v8670_v32  ;;  %v7141_v36 = vpop.permute.xlu1 %1097 }
 0x1e8   :  { %1548 = vperm.xlu1 %5772, %v7146_v35  }
 0x1eb   :  { %v1210_v39 = vpop.permute.xlu1 %1209 }
 0x1ec   :  { %vm1244_vm4 = vcmp.eq.s32.totalorder %v1210_v39, %v6729_v15  ;;  %5773 = vset.pattern.permute.xlu1 %v8647_v56 }
 0x1ed   :  { %v4711_v23 = vsel %vm1244_vm4, 1.0, %v8584_v11  ;;  %203 = vperm.xlu1 %5773, %v7161_v55   ;;  %v8747_v11 = vld [vmem:[#allocation29_spill] sm:$0xff] }
 0x1ee   :  { %v1292_v5 = vadd.f32 %v4711_v23, %v1068_v27  ;;  %v5842_v27 = vld [vmem:[%s8621_s19 + $0x30] sm:$0xff]  ;;  %v7210_v23 = vld [vmem:[%s8620_s29 + $0x68] sm:$0xff]  ;;  %vm346_vm9 = vcmp.eq.s32.totalorder %v8747_v11, %v6729_v15 }
 0x1ef   :  { %v4581_v13 = vsel %vm346_vm9, 1.0, %v8749_v31 }
 0x1f0   :  { %v1516_v7 = vadd.f32 %v4743_v19, %v1292_v5  ;;  %v7170_v38 = vpop.permute.xlu1 %1651 }
 0x1f1   :  { %331 = vperm.xlu1 %5773, %v7167_v20   ;;  %vm1690_vm3 = vcmp.eq.s32.totalorder %v7170_v38, %v6729_v15 }
 0x1f2   :  { %v7173_v25 = vadd.f32 %v4775_v18, %v1516_v7  ;;  %v8744_v18 = vld [vmem:[#allocation3_spill] sm:$0xff]  ;;  %v8745_v7 = vld [vmem:[#allocation41_spill] sm:$0xff] }
 0x1f3   :  { %vm347_vm5 = vcmp.eq.s32.totalorder %v8744_v18, %v6729_v15  ;;  %vm571_vm6 = vcmp.eq.s32.totalorder %v8745_v7, %v6729_v15 }
 0x1f4   :  { %v4582_v29 = vsel %vm347_vm5, 1.0, %v8749_v31  ;;  %v4614_v18 = vsel %vm571_vm6, 1.0, %v8749_v31 }
 0x1f5   :  { %5774 = vset.pattern.permute.xlu1 %v8650_v0  ;;  %v7176_v62 = vpop.permute.xlu1 %658  ;;  %v619_v28 = vadd.f32 %v4614_v18, %v4582_v29  ;;  %v4677_v29 = vsel %vm1018_vm13, 1.0, %v8749_v31  ;;  %vm1355_vm13 = vcmp.eq.s32.totalorder %v7096_v40, %v6729_v15  ;;  %v4758_v40 = vsel %vm1579_vm14, 1.0, %v8749_v31 }
 0x1f6   :  { %8743 = vst [vmem:[#allocation33_spill] sm:$0xff] %v7176_v62  ;;  %555 = vperm.xlu1 %5774, %v7167_v20   ;;  %v8754_v62 = vld [vmem:[#allocation63_spill] sm:$0xff]  ;;  %vm2401_vm14 = vcmask 261120  }
 0x1f7   :  { %v843_v49 = vadd.f32 %v4646_v46, %v619_v28  ;;  %vm1242_vm15 = vcmp.eq.s32.totalorder %v8754_v62, %v6729_v15  ;;  %v4742_v46 = vsel %vm1467_vm0, 1.0, %v8749_v31 }
 0x1f8   :  { %v4709_v28 = vsel %vm1242_vm15, 1.0, %v8749_v31 }
 0x1fa   :  { %5775 = vset.pattern.permute.xlu1 %v8653_v53  ;;  %v7180_v12 = vpop.permute.xlu1 %1100 }
 0x1fb   :  { %885 = vperm.xlu1 %5775, %v7185_v45  }
 0x1fe   :  { %v7188_v6 = vpop.permute.xlu1 %1212 }
 0x1ff   :  { %5776 = vset.pattern.permute.xlu1 %v8654_v58 }
 0x200   :  { %1327 = vperm.xlu1 %5776, %v7194_v22  }
 0x203   :  { %v1655_v43 = vpop.permute.xlu1 %1654 }
 0x204   :  { %1439 = vperm.xlu1 %5776, %v7085_v47   ;;  %vm1691_vm2 = vcmp.eq.s32.totalorder %v1655_v43, %v6729_v15  ;;  %v4773_v43 = vsel %vm1690_vm3, 1.0, %v8749_v31 }
 0x205   :  { %v4774_v33 = vsel %vm1691_vm2, 1.0, %v8749_v31 }
 0x208   :  { %5777 = vset.pattern.permute.xlu1 %v8659_v63  ;;  %v7199_v39 = vpop.permute.xlu1 %197 }
 0x209   :  { %1881 = vperm.xlu1 %5777, %v5842_v27   ;;  %v8746_v27 = vld [vmem:[#allocation17_spill] sm:$0xff] }
 0x20a   :  { %vm570_vm8 = vcmp.eq.s32.totalorder %v8746_v27, %v6729_v15  ;;  %v8751_v27 = vld [vmem:[#allocation74_spill] sm:$0xff] }
 0x20b   :  { %v4613_v7 = vsel %vm570_vm8, 1.0, %v8749_v31  ;;  %vm1019_vm12 = vcmp.eq.s32.totalorder %v8751_v27, %v6729_v15 }
 0x20c   :  { %v618_v17 = vadd.f32 %v4613_v7, %v4581_v13  ;;  %v4678_v27 = vsel %vm1019_vm12, 1.0, %v8749_v31  ;;  %vm1131_vm12 = vcmp.eq.s32.totalorder %v6804_v51, %v6729_v15 }
 0x20d   :  { %5778 = vset.pattern.permute.xlu1 %v8647_v56  ;;  %v7205_v19 = vpop.permute.xlu1 %437  ;;  %v1067_v13 = vadd.f32 %v4678_v27, %v843_v49  ;;  %v1879_v49 = vpop.permute.xlu0 %1878 }
 0x20e   :  { %206 = vperm.xlu1 %5778, %v7210_v23   ;;  %v842_v44 = vadd.f32 %v4645_v3, %v618_v17  ;;  %vm1915_vm5 = vcmp.eq.s32.totalorder %v1879_v49, %v6729_v15  ;;  %v8759_v49 = vld [vmem:[#allocation39_spill] sm:$0xff] }
 0x20f   :  { %v1291_v8 = vadd.f32 %v4710_v42, %v1067_v13  ;;  %v4806_v42 = vsel %vm1915_vm5, 1.0, %v8749_v31  ;;  %vm459_vm8 = vcmp.eq.s32.totalorder %v8759_v49, %v6729_v15 }
 0x210   :  { %v1066_v17 = vadd.f32 %v4677_v29, %v842_v44 }
 0x211   :  { %v7213_v5 = vpop.permute.xlu1 %549  ;;  %v1515_v44 = vadd.f32 %v4742_v46, %v1291_v8  ;;  %v8762_v8 = vld [vmem:[#allocation55_spill] sm:$0xff] }
 0x212   :  { %5779 = vset.pattern.permute.xlu1 %v8650_v0  ;;  %v1290_v18 = vadd.f32 %v4709_v28, %v1066_v17  ;;  %vm683_vm10 = vcmp.eq.s32.totalorder %v8762_v8, %v6729_v15  ;;  %vm576_vm3 = vcmp.eq.s32.totalorder %v7213_v5, %v6729_v15  ;;  %v8770_v5 = vld [vmem:[#allocation54_spill] sm:$0xff] }
 0x213   :  { %446 = vperm.xlu1 %5779, %v7210_v23   ;;  %v1739_v27 = vadd.f32 %v4774_v33, %v1515_v44  ;;  %vm1024_vm5 = vcmp.eq.s32.totalorder %v8770_v5, %v6729_v15 }
 0x214   :  { %v1514_v7 = vadd.f32 %v4741_v50, %v1290_v18  ;;  %v8761_v50 = vld [vmem:[#allocation36_spill] sm:$0xff]  ;;  %v4630_v18 = vsel %vm683_vm10, 1.0, %v8749_v31  ;;  %vm1132_vm10 = vcmp.eq.s32.totalorder %v7141_v36, %v6729_v15 }
 0x215   :  { %vm219_vm9 = vcmp.eq.s32.totalorder %v8761_v50, %v6729_v15 }
 0x216   :  { %v7235_v11 = vpop.permute.xlu1 %991  ;;  %v1738_v13 = vadd.f32 %v4773_v43, %v1514_v7  ;;  %v8763_v43 = vld [vmem:[#allocation51_spill] sm:$0xff] }
 0x217   :  { %558 = vperm.xlu1 %5779, %v7241_v24   ;;  %vm907_vm11 = vcmp.eq.s32.totalorder %v8763_v43, %v6729_v15  ;;  %v4567_v43 = vsel %vm220_vm1, 1.0, %v8749_v31 }
 0x218   :  { %v4662_v7 = vsel %vm907_vm11, 1.0, %v8749_v31 }
 0x21b   :  { %5780 = vset.pattern.permute.xlu1 %v8653_v53  ;;  %v7253_v61 = vpop.permute.xlu1 %1321 }
 0x21c   :  { %1000 = vperm.xlu1 %5780, %v7117_v48   ;;  %vm1356_vm11 = vcmp.eq.s32.totalorder %v7253_v61, %v6729_v15 }
 0x21d   :  { %v4727_v36 = vsel %vm1356_vm11, 1.0, %v8749_v31  ;;  %vm1245_vm11 = vcmp.eq.s32.totalorder %v7188_v6, %v6729_v15 }
 0x220   :  { %5781 = vset.pattern.permute.xlu1 %v8654_v58  ;;  %v1764_v62 = vpop.permute.xlu1 %1763 }
 0x221   :  { %vm1802_vm4 = vcmp.eq.s32.totalorder %v1764_v62, %v6729_v15  ;;  %1330 = vperm.xlu1 %5781, %v6942_v57   ;;  %v4566_v62 = vsel %vm219_vm9, 1.0, %v8749_v31 }
 0x222   :  { %v4789_v38 = vsel %vm1802_vm4, 1.0, %v8749_v31 }
 0x223   :  { %v7276_v3 = vadd.f32 %v4789_v38, %v6837_v9  ;;  %v7287_v9 = vadd.f32 %v4806_v42, %v1739_v27 }
 0x224   :  { %v1876_v29 = vpop.permute.xlu1 %1875 }
 0x225   :  { %8755 = vst [vmem:[#allocation46_spill] sm:$0xff] %v7276_v3  ;;  %vm1914_vm6 = vcmp.eq.s32.totalorder %v1876_v29, %v6729_v15  ;;  %5782 = vset.pattern.permute.xlu1 %v8659_v63  ;;  %5336 = vmatprep.mubr.msk.f32.mxu1 %vm2428_vm7, %v7276_v3  ;;  %8757 = vst [vmem:[#allocation16_spill] sm:$0xff] %v7287_v9  ;;  %v4694_v29 = vsel %vm1131_vm12, 1.0, %v8749_v31 }
 0x226   :  { %v4805_v28 = vsel %vm1914_vm6, 1.0, %v8749_v31  ;;  %1772 = vperm.xlu1 %5782, %v7146_v35  }
 0x227   :  { %v7285_v17 = vadd.f32 %v4805_v28, %v1738_v13 }
 0x229   :  { %8756 = vst [vmem:[#allocation45_spill] sm:$0xff] %v7285_v17  ;;  %v7289_v46 = vpop.permute.xlu1 %328  ;;  %5364 = vmatprep.mubr.msk.f32.mxu0 %vm2428_vm7, %v7285_v17  ;;  %v2417_v17 = vld [vmem:[%s8543_s10] sm:$0xff] }
 0x22a   :  { %8758 = vst [vmem:[#allocation12_spill] sm:$0xff] %v7289_v46  ;;  %1884 = vperm.xlu1 %5782, %v6999_v34   ;;  %5365 = vmatmul.mubr.msk.f32.gmra.mrb[6].mxu0 %vm2428_vm7, %v7287_v9  ;;  %v4598_v34 = vsel %vm459_vm8, 1.0, %v8749_v31  ;;  %vm908_vm8 = vcmp.eq.s32.totalorder %v6890_v60, %v6729_v15 }
 0x22b   :  { %v507_v44 = vadd.f32 %v4598_v34, %v4566_v62  ;;  %v8765_v34 = vld [vmem:[#allocation18_spill] sm:$0xff]  ;;  %v8768_v62 = vld [vmem:[#allocation7_spill] sm:$0xff]  ;;  %v4663_v60 = vsel %vm908_vm8, 1.0, %v8749_v31  ;;  %vm1133_vm8 = vcmp.eq.s32.totalorder %v7180_v12, %v6729_v15  ;;  %v8792_v12 = vld [vmem:[#allocation76_spill] sm:$0xff] }
 0x22c   :  { %vm460_vm0 = vcmp.eq.s32.totalorder %v8765_v34, %v6729_v15  ;;  %vm352_vm2 = vcmp.eq.s32.totalorder %v8768_v62, %v6729_v15  ;;  %v4696_v46 = vsel %vm1133_vm8, 1.0, %v8749_v31 }
 0x22d   :  { %v731_v38 = vadd.f32 %v4630_v18, %v507_v44  ;;  %v4599_v44 = vsel %vm460_vm0, 1.0, %v8749_v31 }
 0x22e   :  { %5783 = vset.pattern.permute.xlu1 %v8662_v4  ;;  %v7299_v35 = vpop.permute.xlu1 %440 }
 0x22f   :  { %8760 = vst [vmem:[#allocation25_spill] sm:$0xff] %v7299_v35  ;;  %779 = vperm.xlu1 %5783, %v7167_v20   ;;  %v955_v13 = vadd.f32 %v4662_v7, %v731_v38  ;;  %v4587_v38 = vsel %vm352_vm2, 1.0, %v8749_v31  ;;  %v4619_v7 = vsel %vm576_vm3, 1.0, %v8749_v31 }
 0x231   :  { %v1179_v42 = vadd.f32 %v4694_v29, %v955_v13  ;;  %v8769_v29 = vld [vmem:[#allocation32_spill] sm:$0xff]  ;;  %v508_v13 = vadd.f32 %v4599_v44, %v4567_v43  ;;  %v4695_v43 = vsel %vm1132_vm10, 1.0, %v8749_v31  ;;  %vm1357_vm10 = vcmp.eq.s32.totalorder %v8792_v12, %v6729_v15 }
 0x232   :  { %vm684_vm4 = vcmp.eq.s32.totalorder %v8769_v29, %v6729_v15 }
 0x233   :  { %5784 = vset.pattern.permute.xlu1 %v8666_v21  ;;  %v7310_v33 = vpop.permute.xlu1 %882 }
 0x234   :  { %1109 = vperm.xlu1 %5784, %v7185_v45   ;;  %v4726_v45 = vsel %vm1355_vm13, 1.0, %v8749_v31 }
 0x235   :  { %v1403_v28 = vadd.f32 %v4726_v45, %v1179_v42  ;;  %v8771_v42 = vld [vmem:[#allocation67_spill] sm:$0xff] }
 0x236   :  { %vm1248_vm6 = vcmp.eq.s32.totalorder %v8771_v42, %v6729_v15 }
 0x237   :  { %v7318_v27 = vpop.permute.xlu1 %994  ;;  %v1627_v50 = vadd.f32 %v4758_v40, %v1403_v28  ;;  %v624_v28 = vadd.f32 %v4619_v7, %v4587_v38  ;;  %v4631_v40 = vsel %vm684_vm4, 1.0, %v8749_v31  ;;  %v4715_v34 = vsel %vm1248_vm6, 1.0, %v8749_v31 }
 0x238   :  { %8764 = vst [vmem:[#allocation43_spill] sm:$0xff] %v7318_v27  ;;  %5785 = vset.pattern.permute.xlu1 %v8670_v32  ;;  %v732_v54 = vadd.f32 %v4631_v40, %v508_v13  ;;  %v7389_v13 = vld [vmem:[%s8621_s19 + $0x70] sm:$0xff]  ;;  %vm797_vm6 = vcmp.eq.s32.totalorder %v6783_v37, %v6729_v15 }
 0x239   :  { %1551 = vperm.xlu1 %5785, %v7194_v22   ;;  %8773 = vst [vmem:[#allocation3_spill] sm:$0xff] %v7389_v13  ;;  %v4648_v27 = vsel %vm797_vm6, 1.0, %v8749_v31 }
 0x23a   :  { %v956_v38 = vadd.f32 %v4663_v60, %v732_v54 }
 0x23c   :  { %v7328_v51 = vpop.permute.xlu1 %1436  ;;  %v1180_v29 = vadd.f32 %v4695_v43, %v956_v38  ;;  %v7428_v43 = vld [vmem:[%s8620_s29 + $0x78] sm:$0xff]  ;;  %v2398_v38 = vld [vmem:[%s8542_s7] sm:$0xff] }
 0x23d   :  { %1663 = vperm.xlu1 %5785, %v7085_v47  }
 0x23e   :  { %v1404_v61 = vadd.f32 %v4727_v36, %v1180_v29 }
 0x241   :  { %5786 = vset.pattern.permute.xlu1 %v8662_v4  ;;  %v1767_v49 = vpop.permute.xlu1 %1766 }
 0x242   :  { %vm1803_vm15 = vcmp.eq.s32.totalorder %v1767_v49, %v6729_v15  ;;  %782 = vperm.xlu1 %5786, %v7241_v24   ;;  %v4683_v49 = vsel %vm1024_vm5, 1.0, %v8749_v31  ;;  %vm909_vm5 = vcmp.eq.s32.totalorder %v7076_v59, %v6729_v15  ;;  %v4883_v59 = vld [vmem:[%s8541_s8] ss:$0 sm:$0xff] }
 0x243   :  { %v4790_v8 = vsel %vm1803_vm15, 1.0, %v8749_v31 }
 0x244   :  { %v7340_v47 = vadd.f32 %v4790_v8, %v1627_v50 }
 0x246   :  { %8767 = vst [vmem:[#allocation62_spill] sm:$0xff] %v7340_v47  ;;  %5787 = vset.pattern.permute.xlu1 %v8666_v21  ;;  %v7347_v18 = vpop.permute.xlu1 %661  ;;  %5337 = vmatmul.mubr.msk.f32.gmra.mrb[4].mxu1 %vm2428_vm7, %v7340_v47 }
 0x247   :  { %1112 = vperm.xlu1 %5787, %v6901_v14   ;;  %vm688_vm6 = vcmp.eq.s32.totalorder %v7347_v18, %v6729_v15 }
 0x248   :  { %v4635_v18 = vsel %vm688_vm6, 1.0, %v8749_v31 }
 0x24a   :  { %v774_v45 = vpop.permute.xlu1 %773 }
 0x24b   :  { %vm800_vm9 = vcmp.eq.s32.totalorder %v774_v45, %v6729_v15  ;;  %5788 = vset.pattern.permute.xlu1 %v8670_v32 }
 0x24c   :  { %v4651_v50 = vsel %vm800_vm9, 1.0, %v8749_v31  ;;  %1554 = vperm.xlu1 %5788, %v6942_v57   ;;  %v1770_v57 = vpop.permute.xlu0 %1769 }
 0x24d   :  { %v848_v8 = vadd.f32 %v4651_v50, %v624_v28  ;;  %vm1804_vm12 = vcmp.eq.s32.totalorder %v1770_v57, %v6729_v15  ;;  %v7402_v50 = vld [vmem:[%s8620_s29 + $0x70] sm:$0xff]  ;;  %v2399_v57 = vld [vmem:[%s8541_s8] sm:$0xff] }
 0x24e   :  { %v4791_v42 = vsel %vm1804_vm12, 1.0, %v8749_v31  ;;  %v2400_v29 = vmul.f32 %v2399_v57, %v2398_v38  ;;  %vm1469_vm12 = vcmp.eq.s32.totalorder %v7328_v51, %v6729_v15 }
 0x24f   :  { %v1072_v62 = vadd.f32 %v4683_v49, %v848_v8  ;;  %v7376_v44 = vpop.permute.xlu1 %1215  ;;  %v4744_v51 = vsel %vm1469_vm12, 1.0, %v8749_v31  ;;  %vm1584_vm12 = vcmp.eq.s32.totalorder %v6892_v10, %v6729_v15 }
 0x250   :  { %1666 = vperm.xlu1 %5788, %v6969_v16  }
 0x251   :  { %v7380_v7 = vadd.f32 %v4715_v34, %v1072_v62 }
 0x253   :  { %8772 = vst [vmem:[#allocation75_spill] sm:$0xff] %v7380_v7 }
 0x254   :  { %5790 = vset.pattern.permute.xlu1 %v8647_v56  ;;  %v1546_v5 = vpop.permute.xlu1 %1545 }
 0x255   :  { %vm1580_vm13 = vcmp.eq.s32.totalorder %v1546_v5, %v6729_v15  ;;  %337 = vperm.xlu1 %5790, %v7389_v13   ;;  %v7446_v5 = vld [vmem:[%s8621_s19 + $0x78] sm:$0xff]  ;;  %v8784_v13 = vld [vmem:[#allocation70_spill] sm:$0xff] }
 0x256   :  { %v4759_v45 = vsel %vm1580_vm13, 1.0, %v8749_v31  ;;  %8781 = vst [vmem:[#allocation64_spill] sm:$0xff] %v7446_v5  ;;  %vm461_vm0 = vcmp.eq.s32.totalorder %v8784_v13, %v6729_v15  ;;  %v8789_v13 = vld [vmem:[#allocation72_spill] sm:$0xff] }
 0x257   :  { %v1628_v28 = vadd.f32 %v4759_v45, %v1404_v61  ;;  %v2402_v61 = vsel %vm2401_vm14, %v2400_v29, 0.0  ;;  %vm573_vm4 = vcmp.eq.s32.totalorder %v8789_v13, %v6729_v15 }
 0x259   :  { %v7394_v40 = vadd.f32 %v4791_v42, %v1628_v28  ;;  %5791 = vset.pattern.permute.xlu1 %v8650_v0  ;;  %v7397_v49 = vpop.permute.xlu1 %664  ;;  %v2403_v42 = vrot.slane %v2402_v61, 4 }
 0x25a   :  { %8775 = vst [vmem:[#allocation17_spill] sm:$0xff] %v7397_v49  ;;  %449 = vperm.xlu1 %5791, %v7402_v50  }
 0x25b   :  { %8774 = vst [vmem:[#allocation41_spill] sm:$0xff] %v7394_v40  ;;  %5339 = vmatprep.mubr.msk.f32.mxu1 %vm2428_vm7, %v7394_v40  ;;  %v2404_v57 = vadd.f32 %v2403_v42, %v2402_v61  ;;  %v2410_v42 = vsel %vm2401_vm14, %v2398_v38, 0.0  ;;  %v8786_v38 = vld [vmem:[#allocation68_spill] sm:$0xff] }
 0x25c   :  { %vm221_vm1 = vcmp.eq.s32.totalorder %v8786_v38, %v6729_v15  ;;  %v2426_v38 = vld [vmem:[%s8544_s9] sm:$0x1] }
 0x25d   :  { %v7407_v8 = vpop.permute.xlu1 %776  ;;  %v2405_v9 = vrot.slane %v2404_v57, 2 }
 0x25e   :  { %8776 = vst [vmem:[#allocation29_spill] sm:$0xff] %v7407_v8  ;;  %5792 = vset.pattern.permute.xlu1 %v8653_v53 }
 0x25f   :  { %891 = vperm.xlu1 %5792, %v7161_v55   ;;  %v2406_v29 = vadd.f32 %v2405_v9, %v2404_v57  ;;  %v2418_v9 = vsel %vm2401_vm14, %v2417_v17, 0.0  ;;  %v2411_v57 = vrot.slane %v2410_v42, 4  ;;  %v8787_v17 = vld [vmem:[#allocation4_spill] sm:$0xff] }
 0x260   :  { %vm349_vm2 = vcmp.eq.s32.totalorder %v8787_v17, %v6729_v15 }
 0x261   :  { %v2407_v3 = vrot.slane %v2406_v29, 1 }
 0x262   :  { %v7411_v34 = vpop.permute.xlu1 %1218 }
 0x263   :  { %8777 = vst [vmem:[#allocation57_spill] sm:$0xff] %v7411_v34  ;;  %1003 = vperm.xlu1 %5792, %v7167_v20  }
 0x267   :  { %5793 = vset.pattern.permute.xlu1 %v8654_v58  ;;  %v7415_v60 = vpop.permute.xlu1 %1548 }
 0x268   :  { %1445 = vperm.xlu1 %5793, %v7068_v2   ;;  %vm1581_vm13 = vcmp.eq.s32.totalorder %v7415_v60, %v6729_v15 }
 0x26c   :  { %5794 = vset.pattern.permute.xlu1 %v8659_v63  ;;  %v7419_v54 = vpop.permute.xlu1 %203 }
 0x26d   :  { %8778 = vst [vmem:[#allocation50_spill] sm:$0xff] %v7419_v54  ;;  %1775 = vperm.xlu1 %5794, %v7194_v22   ;;  %v4664_v54 = vsel %vm909_vm5, 1.0, %v8749_v31  ;;  %vm224_vm5 = vcmp.eq.s32.totalorder %v7199_v39, %v6729_v15 }
 0x26e   :  { %v4571_v39 = vsel %vm224_vm5, 1.0, %v8749_v31 }
 0x270   :  { %v7422_v62 = vpop.permute.xlu1 %331 }
 0x271   :  { %8779 = vst [vmem:[#allocation74_spill] sm:$0xff] %v7422_v62  ;;  %5795 = vset.pattern.permute.xlu1 %v8647_v56 }
 0x272   :  { %212 = vperm.xlu1 %5795, %v7428_v43  }
 0x274   :  { %v7437_v22 = vpop.f32.mrb[2].mxu0 }
 0x275   :  { %v7439_v36 = vpop.permute.xlu1 %555  ;;  %v7441_v56 = vpop.f32.mrb[3].mxu0 }
 0x276   :  { %8780 = vst [vmem:[#allocation47_spill] sm:$0xff] %v7439_v36  ;;  %340 = vperm.xlu1 %5795, %v7446_v5   ;;  %v8791_v36 = vld [vmem:[#allocation52_spill] sm:$0xff] }
 0x277   :  { %vm1021_vm9 = vcmp.eq.s32.totalorder %v8791_v36, %v6729_v15  ;;  %v4712_v36 = vsel %vm1245_vm11, 1.0, %v8749_v31  ;;  %vm1022_vm11 = vcmp.eq.s32.totalorder %v7235_v11, %v6729_v15 }
 0x27a   :  { %5797 = vset.pattern.permute.xlu1 %v8650_v0  ;;  %v7451_v45 = vpop.permute.xlu1 %885 }
 0x27b   :  { %564 = vperm.xlu1 %5797, %v7446_v5  }
 0x27f   :  { %5798 = vset.pattern.permute.xlu1 %v8653_v53  ;;  %v7455_v28 = vpop.permute.xlu1 %1327 }
 0x280   :  { %894 = vperm.xlu1 %5798, %v7210_v23  }
 0x283   :  { %v7458_v40 = vpop.permute.xlu1 %1439 }
 0x284   :  { %5799 = vset.pattern.permute.xlu1 %v8654_v58 }
 0x285   :  { %1336 = vperm.xlu1 %5799, %v6901_v14  }
 0x288   :  { %v1882_v0 = vpop.permute.xlu1 %1881 }
 0x289   :  { %vm1916_vm15 = vcmp.eq.s32.totalorder %v1882_v0, %v6729_v15  ;;  %1448 = vperm.xlu1 %5799, %v7117_v48   ;;  %v2408_v0 = vadd.f32 %v2407_v3, %v2406_v29  ;;  %v8788_v29 = vld [vmem:[#allocation34_spill] sm:$0xff] }
 0x28a   :  { %v4807_v47 = vsel %vm1916_vm15, 1.0, %v8749_v31  ;;  %vm685_vm3 = vcmp.eq.s32.totalorder %v8788_v29, %v6729_v15  ;;  %vm1693_vm15 = vcmp.eq.s32.totalorder %v6867_v41, %v6729_v15  ;;  %v8793_v41 = vld [vmem:[#allocation20_spill] sm:$0xff] }
 0x28b   :  { %v7469_v61 = vadd.f32 %v4807_v47, %v7173_v25  ;;  %v2419_v25 = vrot.slane %v2418_v9, 4  ;;  %v2409_v3 = vmul.f32 8.0, %v2408_v0  ;;  %v4584_v0 = vsel %vm349_vm2, 1.0, %v8749_v31 }
 0x28c   :  { %vm464_vm2 = vcmp.eq.s32.totalorder %v7205_v19, %v6729_v15 }
 0x28d   :  { %8782 = vst [vmem:[#allocation63_spill] sm:$0xff] %v7469_v61  ;;  %5800 = vset.pattern.permute.xlu1 %v8659_v63  ;;  %v7473_v14 = vpop.permute.xlu1 %206  ;;  %5367 = vmatprep.mubr.msk.f32.mxu0 %vm2428_vm7, %v7469_v61  ;;  %v2420_v61 = vadd.f32 %v2419_v25, %v2418_v9  ;;  %v4632_v9 = vsel %vm685_vm3, 1.0, %v8749_v31  ;;  %v4616_v25 = vsel %vm573_vm4, 1.0, %v8749_v31  ;;  %vm350_vm4 = vcmp.eq.s32.totalorder %v6846_v30, %v6729_v15 }
 0x28e   :  { %8783 = vst [vmem:[#allocation39_spill] sm:$0xff] %v7473_v14  ;;  %1890 = vperm.xlu1 %5800, %v6969_v16   ;;  %v2412_v14 = vadd.f32 %v2411_v57, %v2410_v42  ;;  %v4600_v16 = vsel %vm461_vm0, 1.0, %v8749_v31  ;;  %v4568_v42 = vsel %vm221_vm1, 1.0, %v8749_v31  ;;  %v8790_v57 = vlaneseq }
 0x28f   :  { %v509_v62 = vadd.f32 %v4600_v16, %v4568_v42  ;;  %v2421_v16 = vrot.slane %v2420_v61, 2  ;;  %v621_v34 = vadd.f32 %v4616_v25, %v4584_v0  ;;  %vm574_vm1 = vcmp.eq.s32.totalorder %v8793_v41, %v6729_v15 }
 0x290   :  { %v2413_v29 = vrot.slane %v2412_v14, 2  ;;  %v4603_v30 = vsel %vm464_vm2, 1.0, %v8749_v31 }
 0x291   :  { %v2422_v7 = vadd.f32 %v2421_v16, %v2420_v61 }
 0x292   :  { %5801 = vset.pattern.permute.xlu1 %v8662_v4  ;;  %v7482_v47 = vpop.permute.xlu1 %446 }
 0x293   :  { %8785 = vst [vmem:[#allocation36_spill] sm:$0xff] %v7482_v47  ;;  %673 = vperm.xlu1 %5801, %v7402_v50   ;;  %v7499_v47 = vshrl.u32 %v8790_v57, 7  ;;  %v2815_v57 = vadd.f32 %v2426_v38, %v2409_v3  ;;  %v733_v3 = vadd.f32 %v4632_v9, %v509_v62  ;;  %v2414_v38 = vadd.f32 %v2413_v29, %v2412_v14  ;;  %v4885_v62 = vld [vmem:[%s8541_s8 + $0x1] ss:$0 sm:$0xff] }
 0x294   :  { %v845_v14 = vadd.f32 %v4648_v27, %v621_v34  ;;  %v4680_v29 = vsel %vm1021_vm9, 1.0, %v8749_v31  ;;  %v4728_v9 = vsel %vm1357_vm10, 1.0, %v8749_v31  ;;  %vm912_vm9 = vcmp.eq.s32.totalorder %v7451_v45, %v6729_v15 }
 0x295   :  { %v2827_v37 = vsub.s32 0, %v7499_v47  ;;  %v957_v5 = vadd.f32 %v4664_v54, %v733_v3  ;;  %v4667_v45 = vsel %vm912_vm9, 1.0, %v8749_v31 }
 0x296   :  { %v7501_v17 = vpop.permute.xlu1 %558 }
 0x297   :  { %5802 = vset.pattern.permute.xlu1 %v8666_v21  ;;  %v2828_v35 = vrot.slane %v2815_v57, %v2827_v37  ;;  %v1181_v25 = vadd.f32 %v4696_v46, %v957_v5  ;;  %v2423_v57 = vrot.slane %v2422_v7, 1  ;;  %v1069_v5 = vadd.f32 %v4680_v29, %v845_v14 }
 0x298   :  { %1115 = vperm.xlu1 %5802, %v7161_v55   ;;  %v5332_v13 = vpop.f32.mrb[0].mxu1  ;;  %v4776_v14 = vsel %vm1693_vm15, 1.0, %v8749_v31  ;;  %vm1246_vm15 = vcmp.eq.s32.totalorder %v7376_v44, %v6729_v15  ;;  %vm579_vm2 = vcmp.eq.s32.totalorder %v7501_v17, %v6729_v15  ;;  %v8797_v17 = vld [vmem:[#allocation58_spill] sm:$0xff] }
 0x299   :  { %v2543_v42 = vpop.f32.mrb[1].mxu1  ;;  %v2823_v49 = vmul.f32 %v5332_v13, %v4883_v59  ;;  %v2415_v13 = vrot.slane %v2414_v38, 1  ;;  %v1405_v3 = vadd.f32 %v4728_v9, %v1181_v25  ;;  %v2427_v9 = vld [vmem:[%s8545_s11] sm:$0x1]  ;;  %vm1027_vm5 = vcmp.eq.s32.totalorder %v8797_v17, %v6729_v15  ;;  %v8807_v17 = vld [vmem:[#allocation53_spill] sm:$0xff] }
 0x29a   :  { %v2822_v0 = vmul.f32 %v4883_v59, %v2543_v42  ;;  %v1293_v42 = vadd.f32 %v4712_v36, %v1069_v5 }
 0x29b   :  { %v7522_v8 = vpop.permute.xlu1 %1000  ;;  %v2831_v27 = vadd.f32 %v2828_v35, %v2823_v49  ;;  %v4760_v49 = vsel %vm1581_vm13, 1.0, %v8749_v31  ;;  %v2416_v12 = vadd.f32 %v2415_v13, %v2414_v38  ;;  %v4617_v13 = vsel %vm574_vm1, 1.0, %v8749_v31 }
 0x29c   :  { %1227 = vperm.xlu1 %5802, %v7167_v20   ;;  %v2830_v16 = vadd.f32 %v2828_v35, %v2822_v0  ;;  %v1517_v0 = vadd.f32 %v4744_v51, %v1293_v42 }
 0x29f   :  { %v5335_v54 = vpop.f32.mrb[2].mxu1 }
 0x2a0   :  { %v2853_v34 = vmul.f32 %v5335_v54, %v4885_v62  ;;  %5803 = vset.pattern.permute.xlu1 %v8670_v32  ;;  %v7545_v6 = vpop.permute.xlu1 %1330  ;;  %v2553_v61 = vpop.f32.mrb[3].mxu1  ;;  %v2424_v54 = vadd.f32 %v2423_v57, %v2422_v7 }
 0x2a1   :  { %v2852_v46 = vmul.f32 %v4885_v62, %v2553_v61  ;;  %1669 = vperm.xlu1 %5803, %v7068_v2   ;;  %v1629_v62 = vadd.f32 %v4760_v49, %v1405_v3  ;;  %v4585_v61 = vsel %vm350_vm4, 1.0, %v8749_v31  ;;  %v8795_v49 = vld [vmem:[#allocation78_spill] sm:$0xff] }
 0x2a2   :  { %v7549_v59 = vadd.f32 %v2853_v34, %v2831_v27  ;;  %v2425_v38 = vmul.f32 %v2424_v54, %v2416_v12  ;;  %v8794_v34 = vld [vmem:[#allocation35_spill] sm:$0xff]  ;;  %v622_v51 = vadd.f32 %v4617_v13, %v4585_v61  ;;  %vm1360_vm10 = vcmp.eq.s32.totalorder %v8795_v49, %v6729_v15 }
 0x2a3   :  { %v7553_v60 = vadd.f32 %v2852_v46, %v2830_v16  ;;  %vm798_vm8 = vcmp.eq.s32.totalorder %v8794_v34, %v6729_v15  ;;  %v4884_v16 = vld [vmem:[%s8543_s10] ss:$0 sm:$0xff]  ;;  %v512_v46 = vadd.f32 %v4603_v30, %v4571_v39 }
 0x2a4   :  { %v2816_v36 = vadd.f32 %v2427_v9, %v2425_v38  ;;  %v4649_v5 = vsel %vm798_vm8, 1.0, %v8749_v31  ;;  %v2838_v3 = vmul.f32 %v7437_v22, %v4884_v16  ;;  %v2837_v54 = vmul.f32 %v4884_v16, %v7441_v56 }
 0x2a5   :  { %5804 = vset.pattern.permute.xlu1 %v8662_v4  ;;  %v1773_v35 = vpop.permute.xlu1 %1772  ;;  %v1741_v4 = vadd.f32 %v4776_v14, %v1517_v0  ;;  %v736_v42 = vadd.f32 %v4635_v18, %v512_v46  ;;  %v4886_v0 = vld [vmem:[%s8543_s10 + $0x1] ss:$0 sm:$0xff]  ;;  %v4731_v22 = vsel %vm1360_vm10, 1.0, %v8749_v31  ;;  %v846_v11 = vadd.f32 %v4649_v5, %v622_v51 }
 0x2a6   :  { %vm1805_vm0 = vcmp.eq.s32.totalorder %v1773_v35, %v6729_v15  ;;  %676 = vperm.xlu1 %5804, %v7428_v43   ;;  %v2843_v12 = vrot.slane %v2816_v36, %v2827_v37  ;;  %v4681_v37 = vsel %vm1022_vm11, 1.0, %v8749_v31  ;;  %v4763_v38 = vsel %vm1584_vm12, 1.0, %v8749_v31  ;;  %v1888_v36 = vpop.permute.xlu0 %1887  ;;  %v8796_v46 = vld [vmem:[#allocation10_spill] sm:$0xff] }
 0x2a7   :  { %v4792_v29 = vsel %vm1805_vm0, 1.0, %v8749_v31  ;;  %vm1470_vm0 = vcmp.eq.s32.totalorder %v7458_v40, %v6729_v15  ;;  %v4713_v9 = vsel %vm1246_vm15, 1.0, %v8749_v31  ;;  %v1070_v30 = vadd.f32 %v4681_v37, %v846_v11  ;;  %v8798_v37 = vld [vmem:[#allocation27_spill] sm:$0xff] }
 0x2a8   :  { %v7562_v27 = vadd.f32 %v4792_v29, %v1629_v62  ;;  %v960_v62 = vadd.f32 %v4667_v45, %v736_v42  ;;  %v2846_v14 = vadd.f32 %v2843_v12, %v2838_v3  ;;  %v4745_v61 = vsel %vm1470_vm0, 1.0, %v8749_v31 }
 0x2a9   :  { %v1885_v7 = vpop.permute.xlu1 %1884  ;;  %v1294_v40 = vadd.f32 %v4713_v9, %v1070_v30  ;;  %vm1918_vm1 = vcmp.eq.s32.totalorder %v1888_v36, %v6729_v15  ;;  %vm355_vm4 = vcmp.eq.s32.totalorder %v8796_v46, %v6729_v15  ;;  %v4622_v45 = vsel %vm579_vm2, 1.0, %v8749_v31  ;;  %v8804_v30 = vld [vmem:[#allocation22_spill] sm:$0xff] }
 0x2aa   :  { %vm1917_vm3 = vcmp.eq.s32.totalorder %v1885_v7, %v6729_v15  ;;  %5806 = vset.pattern.permute.xlu1 %v8666_v21  ;;  %5340 = vmatmul.mubr.msk.f32.gmra.mrb[6].mxu1 %vm2428_vm7, %v7562_v27  ;;  %v2845_v7 = vadd.f32 %v2843_v12, %v2837_v54  ;;  %v4809_v5 = vsel %vm1918_vm1, 1.0, %v8749_v31  ;;  %v4590_v42 = vsel %vm355_vm4, 1.0, %v8749_v31 }
 0x2ab   :  { %v4808_v25 = vsel %vm1917_vm3, 1.0, %v8749_v31  ;;  %1118 = vperm.xlu1 %5806, %v7210_v23   ;;  %v1518_v16 = vadd.f32 %v4745_v61, %v1294_v40  ;;  %v627_v54 = vadd.f32 %v4622_v45, %v4590_v42  ;;  %vm580_vm8 = vcmp.eq.s32.totalorder %v8798_v37, %v6729_v15 }
 0x2ac   :  { %v7583_v19 = vadd.f32 %v4808_v25, %v1741_v4  ;;  %vm462_vm0 = vcmp.eq.s32.totalorder %v6862_v26, %v6729_v15  ;;  %vm463_vm1 = vcmp.eq.s32.totalorder %v8804_v30, %v6729_v15  ;;  %vm223_vm2 = vcmp.eq.s32.totalorder %v7025_v52, %v6729_v15  ;;  %v8805_v26 = vld [vmem:[#allocation31_spill] sm:$0xff] }
 0x2ad   :  { %vm686_vm4 = vcmp.eq.s32.totalorder %v8805_v26, %v6729_v15  ;;  %v4601_v46 = vsel %vm462_vm0, 1.0, %v8749_v31  ;;  %v4602_v52 = vsel %vm463_vm1, 1.0, %v8749_v31 }
 0x2ae   :  { %v7592_v57 = vpop.permute.xlu1 %779  ;;  %5368 = vmatmul.mubr.msk.f32.gmra.mrb[8].mxu0 %vm2428_vm7, %v7583_v19  ;;  %v4633_v45 = vsel %vm686_vm4, 1.0, %v8749_v31 }
 0x2af   :  { %1230 = vperm.xlu1 %5806, %v7241_v24  }
 0x2b3   :  { %5807 = vset.pattern.permute.xlu1 %v8670_v32  ;;  %v1110_v35 = vpop.permute.xlu1 %1109 }
 0x2b4   :  { %vm1136_vm13 = vcmp.eq.s32.totalorder %v1110_v35, %v6729_v15  ;;  %1672 = vperm.xlu1 %5807, %v7117_v48   ;;  %v4686_v35 = vsel %vm1027_vm5, 1.0, %v8749_v31 }
 0x2b5   :  { %v4699_v56 = vsel %vm1136_vm13, 1.0, %v8749_v31  ;;  %v5363_v47 = vpop.f32.mrb[4].mxu0 }
 0x2b6   :  { %v1184_v29 = vadd.f32 %v4699_v56, %v960_v62  ;;  %v2862_v41 = vmul.f32 %v5363_v47, %v4886_v0  ;;  %v2746_v10 = vpop.f32.mrb[5].mxu0 }
 0x2b7   :  { %v2861_v4 = vmul.f32 %v4886_v0, %v2746_v10 }
 0x2b8   :  { %v1408_v25 = vadd.f32 %v4731_v22, %v1184_v29  ;;  %v7629_v44 = vadd.f32 %v2862_v41, %v2846_v14  ;;  %5808 = vset.pattern.permute.xlu1 %v8653_v53  ;;  %v7632_v13 = vpop.permute.xlu1 %1551  ;;  %v8799_v29 = vld [vmem:[#allocation42_spill] sm:$0xff]  ;;  %v8800_v41 = vld [vmem:[#allocation59_spill] sm:$0xff] }
 0x2b9   :  { %v7634_v34 = vadd.f32 %v2861_v4, %v2845_v7  ;;  %897 = vperm.xlu1 %5808, %v7402_v50   ;;  %vm804_vm9 = vcmp.eq.s32.totalorder %v8799_v29, %v6729_v15  ;;  %vm1028_vm11 = vcmp.eq.s32.totalorder %v8800_v41, %v6729_v15  ;;  %v8802_v7 = vld [vmem:[#allocation6_spill] sm:$0xff]  ;;  %v8803_v4 = vld [vmem:[#allocation79_spill] sm:$0xff]  ;;  %v8809_v41 = vld [vmem:[#allocation65_spill] sm:$0xff] }
 0x2ba   :  { %v7638_v39 = vadd.f32 %v4763_v38, %v1408_v25  ;;  %v4655_v38 = vsel %vm804_vm9, 1.0, %v8749_v31  ;;  %vm222_vm13 = vcmp.eq.s32.totalorder %v8802_v7, %v6729_v15  ;;  %vm1476_vm15 = vcmp.eq.s32.totalorder %v8803_v4, %v6729_v15 }
 0x2bb   :  { %v4687_v61 = vsel %vm1028_vm11, 1.0, %v8749_v31  ;;  %vm1359_vm11 = vcmp.eq.s32.totalorder %v7545_v6, %v6729_v15 }
 0x2bc   :  { %v1664_v18 = vpop.permute.xlu1 %1663  ;;  %v4730_v4 = vsel %vm1359_vm11, 1.0, %v8749_v31 }
 0x2bd   :  { %vm1694_vm3 = vcmp.eq.s32.totalorder %v1664_v18, %v6729_v15  ;;  %5809 = vset.pattern.permute.xlu1 %v8654_v58  ;;  %v4569_v18 = vsel %vm222_vm13, 1.0, %v8749_v31 }
 0x2be   :  { %v4777_v51 = vsel %vm1694_vm3, 1.0, %v8749_v31  ;;  %1339 = vperm.xlu1 %5809, %v7161_v55   ;;  %vm1700_vm3 = vcmp.eq.s32.totalorder %v6983_v1, %v6729_v15  ;;  %v510_v42 = vadd.f32 %v4601_v46, %v4569_v18 }
 0x2bf   :  { %v1742_v49 = vadd.f32 %v4777_v51, %v1518_v16  ;;  %v4751_v16 = vsel %vm1476_vm15, 1.0, %v8749_v31  ;;  %v4783_v1 = vsel %vm1700_vm3, 1.0, %v8749_v31  ;;  %vm1582_vm15 = vcmp.eq.s32.totalorder %v7632_v13, %v6729_v15  ;;  %v8810_v13 = vld [vmem:[#allocation75_spill] sm:$0xff] }
 0x2c0   :  { %v4761_v26 = vsel %vm1582_vm15, 1.0, %v8749_v31 }
 0x2c1   :  { %v7654_v3 = vadd.f32 %v4809_v5, %v1742_v49  ;;  %v783_v12 = vpop.permute.xlu1 %782  ;;  %v8806_v5 = vld [vmem:[#allocation33_spill] sm:$0xff] }
 0x2c2   :  { %vm803_vm6 = vcmp.eq.s32.totalorder %v783_v12, %v6729_v15  ;;  %1451 = vperm.xlu1 %5809, %v7167_v20   ;;  %vm687_vm5 = vcmp.eq.s32.totalorder %v8806_v5, %v6729_v15 }
 0x2c3   :  { %v4654_v0 = vsel %vm803_vm6, 1.0, %v8749_v31  ;;  %5370 = vmatprep.mubr.msk.f32.mxu0 %vm2428_vm7, %v7654_v3  ;;  %vm911_vm6 = vcmp.eq.s32.totalorder %v7310_v33, %v6729_v15  ;;  %v4634_v12 = vsel %vm687_vm5, 1.0, %v8749_v31 }
 0x2c4   :  { %v851_v62 = vadd.f32 %v4654_v0, %v627_v54  ;;  %v734_v0 = vadd.f32 %v4633_v45, %v510_v42  ;;  %v8812_v42 = vld [vmem:[#allocation8_spill] sm:$0xff] }
 0x2c5   :  { %vm225_vm4 = vcmp.eq.s32.totalorder %v8812_v42, %v6729_v15 }
 0x2c6   :  { %5810 = vset.pattern.permute.xlu1 %v8659_v63  ;;  %v7663_v22 = vpop.permute.xlu1 %1112  ;;  %v7665_v11 = vadd.f32 %v4686_v35, %v851_v62  ;;  %v4666_v62 = vsel %vm911_vm6, 1.0, %v8749_v31 }
 0x2c7   :  { %1893 = vperm.xlu1 %5810, %v7068_v2  }
 0x2cb   :  { %5811 = vset.pattern.permute.xlu1 %v8653_v53  ;;  %v7669_v56 = vpop.permute.xlu1 %1554  ;;  %v4623_v53 = vsel %vm580_vm8, 1.0, %v8749_v31  ;;  %vm910_vm8 = vcmp.eq.s32.totalorder %v8807_v17, %v6729_v15 }
 0x2cc   :  { %900 = vperm.xlu1 %5811, %v7428_v43   ;;  %v4665_v33 = vsel %vm910_vm8, 1.0, %v8749_v31  ;;  %vm1583_vm13 = vcmp.eq.s32.totalorder %v7669_v56, %v6729_v15 }
 0x2cf   :  { %v7672_v47 = vpop.permute.xlu1 %1666 }
 0x2d0   :  { %5813 = vset.pattern.permute.xlu1 %v8654_v58 }
 0x2d1   :  { %1342 = vperm.xlu1 %5813, %v7210_v23   ;;  %v8801_v23 = vld [vmem:[#allocation71_spill] sm:$0xff] }
 0x2d2   :  { %vm1252_vm12 = vcmp.eq.s32.totalorder %v8801_v23, %v6729_v15 }
 0x2d3   :  { %v4719_v36 = vsel %vm1252_vm12, 1.0, %v8749_v31  ;;  %vm1358_vm12 = vcmp.eq.s32.totalorder %v7455_v28, %v6729_v15 }
 0x2d4   :  { %v338_v14 = vpop.permute.xlu1 %337  ;;  %v4729_v6 = vsel %vm1358_vm12, 1.0, %v8749_v31 }
 0x2d5   :  { %vm356_vm10 = vcmp.eq.s32.totalorder %v338_v14, %v6729_v15  ;;  %1454 = vperm.xlu1 %5813, %v7241_v24   ;;  %v8808_v14 = vld [vmem:[#allocation66_spill] sm:$0xff] }
 0x2d6   :  { %v4591_v2 = vsel %vm356_vm10, 1.0, %v8749_v31  ;;  %vm1135_vm9 = vcmp.eq.s32.totalorder %v8808_v14, %v6729_v15  ;;  %vm1134_vm10 = vcmp.eq.s32.totalorder %v8809_v41, %v6729_v15 }
 0x2d7   :  { %v628_v10 = vadd.f32 %v4623_v53, %v4591_v2  ;;  %v1779_v53 = vpop.permute.xlu0 %1778  ;;  %v4697_v7 = vsel %vm1134_vm10, 1.0, %v8749_v31 }
 0x2d8   :  { %vm1807_vm1 = vcmp.eq.s32.totalorder %v1779_v53, %v6729_v15 }
 0x2d9   :  { %v852_v9 = vadd.f32 %v4655_v38, %v628_v10  ;;  %5814 = vset.pattern.permute.xlu1 %v8659_v63  ;;  %v7696_v25 = vpop.permute.xlu1 %449  ;;  %v4698_v10 = vsel %vm1135_vm9, 1.0, %v8749_v31  ;;  %v958_v38 = vadd.f32 %v4665_v33, %v734_v0  ;;  %v4794_v46 = vsel %vm1807_vm1, 1.0, %v8749_v31  ;;  %v8817_v0 = vld [vmem:[#allocation56_spill] sm:$0xff]  ;;  %v8818_v33 = vld [vmem:[#allocation17_spill] sm:$0xff] }
 0x2da   :  { %1896 = vperm.xlu1 %5814, %v7117_v48   ;;  %v4570_v48 = vsel %vm223_vm2, 1.0, %v8749_v31  ;;  %vm913_vm10 = vcmp.eq.s32.totalorder %v8817_v0, %v6729_v15  ;;  %vm689_vm11 = vcmp.eq.s32.totalorder %v8818_v33, %v6729_v15 }
 0x2db   :  { %v1076_v40 = vadd.f32 %v4687_v61, %v852_v9  ;;  %v511_v35 = vadd.f32 %v4602_v52, %v4570_v48  ;;  %v1782_v30 = vpop.permute.xlu0 %1781  ;;  %v1182_v28 = vadd.f32 %v4697_v7, %v958_v38  ;;  %v4762_v61 = vsel %vm1583_vm13, 1.0, %v8749_v31  ;;  %v8811_v52 = vld [vmem:[#allocation64_spill] sm:$0xff]  ;;  %v8820_v38 = vld [vmem:[#allocation21_spill] sm:$0xff] }
 0x2dc   :  { %vm1808_vm2 = vcmp.eq.s32.totalorder %v1782_v30, %v6729_v15  ;;  %vm575_vm15 = vcmp.eq.s32.totalorder %v8820_v38, %v6729_v15 }
 0x2dd   :  { %v1300_v51 = vadd.f32 %v4719_v36, %v1076_v40  ;;  %v735_v29 = vadd.f32 %v4634_v12, %v511_v35  ;;  %v1406_v18 = vadd.f32 %v4729_v6, %v1182_v28  ;;  %v4795_v48 = vsel %vm1808_vm2, 1.0, %v8749_v31  ;;  %v8813_v12 = vld [vmem:[#allocation24_spill] sm:$0xff] }
 0x2de   :  { %5815 = vset.pattern.permute.xlu1 %v8666_v21  ;;  %v7721_v49 = vpop.permute.xlu1 %891  ;;  %v7772_v17 = vadd.f32 %v4795_v48, %v7638_v39  ;;  %vm577_vm5 = vcmp.eq.s32.totalorder %v8813_v12, %v6729_v15  ;;  %v8816_v35 = vld [vmem:[#allocation44_spill] sm:$0xff]  ;;  %v4636_v6 = vsel %vm689_vm11, 1.0, %v8749_v31 }
 0x2df   :  { %1121 = vperm.xlu1 %5815, %v7402_v50   ;;  %v1524_v54 = vadd.f32 %v4751_v16, %v1300_v51  ;;  %v959_v23 = vadd.f32 %v4666_v62, %v735_v29  ;;  %v1630_v5 = vadd.f32 %v4761_v26, %v1406_v18  ;;  %vm805_vm9 = vcmp.eq.s32.totalorder %v8816_v35, %v6729_v15  ;;  %v8819_v29 = vld [vmem:[#allocation60_spill] sm:$0xff]  ;;  %v8823_v26 = vld [vmem:[#allocation69_spill] sm:$0xff]  ;;  %v8825_v35 = vld [vmem:[#allocation43_spill] sm:$0xff] }
 0x2e0   :  { %v4572_v62 = vsel %vm225_vm4, 1.0, %v8749_v31  ;;  %v4620_v14 = vsel %vm577_vm5, 1.0, %v8749_v31  ;;  %vm1029_vm12 = vcmp.eq.s32.totalorder %v8819_v29, %v6729_v15  ;;  %v8824_v18 = vld [vmem:[#allocation29_spill] sm:$0xff]  ;;  %vm1025_vm5 = vcmp.eq.s32.totalorder %v7522_v8, %v6729_v15  ;;  %v5850_v8 = vld [vmem:[%s8621_s19 + $0x60] sm:$0xff] }
 0x2e1   :  { %v7728_v37 = vadd.f32 %v4783_v1, %v1524_v54  ;;  %v8814_v54 = vld [vmem:[#allocation25_spill] sm:$0xff]  ;;  %v4688_v30 = vsel %vm1029_vm12, 1.0, %v8749_v31  ;;  %vm801_vm4 = vcmp.eq.s32.totalorder %v8824_v18, %v6729_v15 }
 0x2e2   :  { %v7733_v2 = vpop.permute.xlu1 %1003  ;;  %vm465_vm6 = vcmp.eq.s32.totalorder %v8814_v54, %v6729_v15  ;;  %v4652_v0 = vsel %vm801_vm4, 1.0, %v8749_v31 }
 0x2e3   :  { %5816 = vset.pattern.permute.xlu1 %v8670_v32  ;;  %v4604_v53 = vsel %vm465_vm6, 1.0, %v8749_v31  ;;  %vm1137_vm6 = vcmp.eq.s32.totalorder %v7663_v22, %v6729_v15  ;;  %v8826_v22 = vld [vmem:[#allocation57_spill] sm:$0xff] }
 0x2e4   :  { %1563 = vperm.xlu1 %5816, %v7161_v55   ;;  %v1183_v55 = vadd.f32 %v4698_v10, %v959_v23  ;;  %v4656_v23 = vsel %vm805_vm9, 1.0, %v8749_v31  ;;  %v4668_v10 = vsel %vm913_vm10, 1.0, %v8749_v31  ;;  %v513_v28 = vadd.f32 %v4604_v53, %v4572_v62 }
 0x2e5   :  { %vm1247_vm9 = vcmp.eq.s32.totalorder %v8826_v22, %v6729_v15  ;;  %v4700_v38 = vsel %vm1137_vm6, 1.0, %v8749_v31 }
 0x2e6   :  { %v1407_v56 = vadd.f32 %v4730_v4, %v1183_v55  ;;  %v8821_v4 = vld [vmem:[#allocation30_spill] sm:$0xff]  ;;  %v737_v48 = vadd.f32 %v4636_v6, %v513_v28 }
 0x2e7   :  { %v1446_v9 = vpop.permute.xlu1 %1445  ;;  %v4888_v55 = vld [vmem:[%s8543_s10 + $0x2] ss:$0 sm:$0xff] }
 0x2e8   :  { %vm1472_vm0 = vcmp.eq.s32.totalorder %v1446_v9, %v6729_v15  ;;  %1675 = vperm.xlu1 %5816, %v7167_v20   ;;  %v1631_v16 = vadd.f32 %v4762_v61, %v1407_v56  ;;  %v8822_v9 = vld [vmem:[#allocation12_spill] sm:$0xff]  ;;  %v5849_v56 = vld [vmem:[%s8620_s29 + $0x60] sm:$0xff] }
 0x2e9   :  { %v4747_v36 = vsel %vm1472_vm0, 1.0, %v8749_v31  ;;  %vm351_vm0 = vcmp.eq.s32.totalorder %v8821_v4, %v6729_v15  ;;  %vm353_vm1 = vcmp.eq.s32.totalorder %v8822_v9, %v6729_v15 }
 0x2ea   :  { %v7758_v40 = vadd.f32 %v4747_v36, %v8810_v13  ;;  %v7769_v45 = vadd.f32 %v4794_v46, %v1631_v16  ;;  %v4618_v13 = vsel %vm575_vm15, 1.0, %v8749_v31  ;;  %v4586_v46 = vsel %vm351_vm0, 1.0, %v8749_v31 }
 0x2eb   :  { %vm1695_vm15 = vcmp.eq.s32.totalorder %v7672_v47, %v6729_v15 }
 0x2ec   :  { %5818 = vset.pattern.permute.xlu1 %v8666_v21  ;;  %v1776_v20 = vpop.permute.xlu1 %1775  ;;  %v4778_v47 = vsel %vm1695_vm15, 1.0, %v8749_v31 }
 0x2ed   :  { %vm1806_vm3 = vcmp.eq.s32.totalorder %v1776_v20, %v6729_v15  ;;  %1236 = vperm.xlu1 %5818, %v8811_v52  }
 0x2ee   :  { %v4793_v51 = vsel %vm1806_vm3, 1.0, %v8749_v31  ;;  %vm1249_vm3 = vcmp.eq.s32.totalorder %v8823_v26, %v6729_v15 }
 0x2ef   :  { %v7767_v1 = vadd.f32 %v4793_v51, %v1630_v5  ;;  %v4588_v5 = vsel %vm353_vm1, 1.0, %v8749_v31 }
 0x2f0   :  { %v625_v33 = vadd.f32 %v4620_v14, %v4588_v5  ;;  %v961_v14 = vadd.f32 %v4668_v10, %v737_v48  ;;  %v8828_v10 = vld [vmem:[#allocation77_spill] sm:$0xff]  ;;  %v5851_v48 = vld [vmem:[%s8621_s19 + $0x68] sm:$0xff] }
 0x2f1   :  { %5819 = vset.pattern.permute.xlu1 %v8670_v32  ;;  %v7775_v21 = vpop.permute.xlu1 %212  ;;  %5342 = vmatprep.mubr.msk.f32.mxu1 %vm2428_vm7, %v7767_v1 }
 0x2f2   :  { %1678 = vperm.xlu1 %5819, %v7241_v24   ;;  %5343 = vmatmul.mubr.msk.f32.gmra.mrb[8].mxu1 %vm2428_vm7, %v7769_v45  ;;  %v8815_v24 = vld [vmem:[#allocation37_spill] sm:$0xff]  ;;  %v849_v9 = vadd.f32 %v4652_v0, %v625_v33 }
 0x2f3   :  { %5345 = vmatprep.mubr.msk.f32.mxu1 %vm2428_vm7, %v7772_v17  ;;  %vm799_vm8 = vcmp.eq.s32.totalorder %v8815_v24, %v6729_v15  ;;  %v623_v24 = vadd.f32 %v4618_v13, %v4586_v46 }
 0x2f4   :  { %v4650_v41 = vsel %vm799_vm8, 1.0, %v8749_v31  ;;  %vm1023_vm8 = vcmp.eq.s32.totalorder %v8825_v35, %v6729_v15 }
 0x2f5   :  { %v341_v39 = vpop.permute.xlu1 %340  ;;  %v4682_v4 = vsel %vm1023_vm8, 1.0, %v8749_v31  ;;  %v847_v6 = vadd.f32 %v4650_v41, %v623_v24 }
 0x2f6   :  { %5820 = vset.pattern.permute.xlu1 %v8654_v58  ;;  %vm357_vm13 = vcmp.eq.s32.totalorder %v341_v39, %v6729_v15 }
 0x2f7   :  { %1345 = vperm.xlu1 %5820, %v7402_v50   ;;  %v4592_v61 = vsel %vm357_vm13, 1.0, %v8749_v31  ;;  %vm1471_vm13 = vcmp.eq.s32.totalorder %v8828_v10, %v6729_v15 }
 0x2fa   :  { %v565_v7 = vpop.permute.xlu1 %564 }
 0x2fb   :  { %vm581_vm2 = vcmp.eq.s32.totalorder %v565_v7, %v6729_v15  ;;  %5821 = vset.pattern.permute.xlu1 %v8659_v63  ;;  %v8827_v7 = vld [vmem:[#allocation2_spill] sm:$0xff] }
 0x2fc   :  { %v4624_v36 = vsel %vm581_vm2, 1.0, %v8749_v31  ;;  %1787 = vperm.xlu1 %5821, %v5849_v56   ;;  %vm1585_vm10 = vcmp.eq.s32.totalorder %v8827_v7, %v6729_v15  ;;  %v1071_v56 = vadd.f32 %v4682_v4, %v847_v6  ;;  %v8833_v4 = vld [vmem:[#allocation47_spill] sm:$0xff] }
 0x2fd   :  { %v629_v16 = vadd.f32 %v4624_v36, %v4592_v61  ;;  %v5366_v20 = vpop.f32.mrb[6].mxu0  ;;  %v1185_v61 = vadd.f32 %v4700_v38, %v961_v14  ;;  %v4764_v36 = vsel %vm1585_vm10, 1.0, %v8749_v31  ;;  %vm578_vm8 = vcmp.eq.s32.totalorder %v8833_v4, %v6729_v15 }
 0x2fe   :  { %v2880_v51 = vmul.f32 %v5366_v20, %v4888_v55  ;;  %v2756_v42 = vpop.f32.mrb[7].mxu0 }
 0x2ff   :  { %v853_v39 = vadd.f32 %v4656_v23, %v629_v16  ;;  %v2879_v12 = vmul.f32 %v4888_v55, %v2756_v42  ;;  %v7844_v54 = vpop.permute.xlu1 %894  ;;  %v4684_v23 = vsel %vm1025_vm5, 1.0, %v8749_v31  ;;  %v4714_v55 = vsel %vm1247_vm9, 1.0, %v8749_v31 }
 0x300   :  { %v7850_v62 = vadd.f32 %v2880_v51, %v7629_v44  ;;  %1899 = vperm.xlu1 %5821, %v5850_v8   ;;  %v1785_v44 = vpop.permute.xlu0 %1784  ;;  %v1073_v28 = vadd.f32 %v4684_v23, %v849_v9  ;;  %v1295_v13 = vadd.f32 %v4714_v55, %v1071_v56  ;;  %v4746_v16 = vsel %vm1471_vm13, 1.0, %v8749_v31  ;;  %v8831_v8 = vld [vmem:[#allocation11_spill] sm:$0xff] }
 0x301   :  { %v7858_v29 = vadd.f32 %v2879_v12, %v7634_v34  ;;  %v7860_v53 = vadd.f32 %v4688_v30, %v853_v39  ;;  %v4716_v34 = vsel %vm1249_vm3, 1.0, %v8749_v31  ;;  %vm1809_vm12 = vcmp.eq.s32.totalorder %v1785_v44, %v6729_v15  ;;  %v8829_v39 = vld [vmem:[#allocation26_spill] sm:$0xff] }
 0x302   :  { %v4796_v18 = vsel %vm1809_vm12, 1.0, %v8749_v31  ;;  %v1297_v20 = vadd.f32 %v4716_v34, %v1073_v28  ;;  %vm466_vm1 = vcmp.eq.s32.totalorder %v8829_v39, %v6729_v15  ;;  %v8830_v12 = vld [vmem:[#allocation50_spill] sm:$0xff]  ;;  %v1519_v24 = vadd.f32 %v4746_v16, %v1295_v13 }
 0x303   :  { %vm226_vm2 = vcmp.eq.s32.totalorder %v8830_v12, %v6729_v15  ;;  %vm468_vm3 = vcmp.eq.s32.totalorder %v7696_v25, %v6729_v15  ;;  %vm228_vm5 = vcmp.eq.s32.totalorder %v8831_v8, %v6729_v15  ;;  %v4605_v33 = vsel %vm466_vm1, 1.0, %v8749_v31  ;;  %v8832_v25 = vld [vmem:[#allocation38_spill] sm:$0xff]  ;;  %v8839_v8 = vld [vmem:[#allocation40_spill] sm:$0xff] }
 0x304   :  { %5823 = vset.pattern.permute.xlu1 %v8654_v58  ;;  %v1337_v30 = vpop.permute.xlu1 %1336  ;;  %v1743_v0 = vadd.f32 %v4778_v47, %v1519_v24  ;;  %v4573_v22 = vsel %vm226_vm2, 1.0, %v8749_v31  ;;  %vm690_vm6 = vcmp.eq.s32.totalorder %v8832_v25, %v6729_v15  ;;  %v4607_v38 = vsel %vm468_vm3, 1.0, %v8749_v31  ;;  %v8834_v34 = vld [vmem:[#allocation74_spill] sm:$0xff]  ;;  %v8835_v47 = vld [vmem:[#allocation3_spill] sm:$0xff] }
 0x305   :  { %vm1361_vm11 = vcmp.eq.s32.totalorder %v1337_v30, %v6729_v15  ;;  %1460 = vperm.xlu1 %5823, %v8811_v52   ;;  %v514_v7 = vadd.f32 %v4605_v33, %v4573_v22  ;;  %vm914_vm9 = vcmp.eq.s32.totalorder %v7721_v49, %v6729_v15  ;;  %vm802_vm12 = vcmp.eq.s32.totalorder %v7592_v57, %v6729_v15  ;;  %v4887_v57 = vld [vmem:[%s8541_s8 + $0x2] ss:$0 sm:$0xff] }
 0x306   :  { %v4732_v41 = vsel %vm1361_vm11, 1.0, %v8749_v31  ;;  %vm354_vm11 = vcmp.eq.s32.totalorder %v8834_v34, %v6729_v15  ;;  %v4621_v49 = vsel %vm578_vm8, 1.0, %v8749_v31  ;;  %v4669_v55 = vsel %vm914_vm9, 1.0, %v8749_v31 }
 0x307   :  { %v1409_v26 = vadd.f32 %v4732_v41, %v1185_v61  ;;  %vm1026_vm13 = vcmp.eq.s32.totalorder %v7733_v2, %v6729_v15  ;;  %v4589_v61 = vsel %vm354_vm11, 1.0, %v8749_v31  ;;  %v4653_v10 = vsel %vm802_vm12, 1.0, %v8749_v31 }
 0x308   :  { %v1449_v58 = vpop.permute.xlu1 %1448  ;;  %v626_v56 = vadd.f32 %v4621_v49, %v4589_v61  ;;  %vm229_vm2 = vcmp.eq.s32.totalorder %v7775_v21, %v6729_v15 }
 0x309   :  { %vm1473_vm0 = vcmp.eq.s32.totalorder %v1449_v58, %v6729_v15  ;;  %v1633_v46 = vadd.f32 %v4764_v36, %v1409_v26  ;;  %5824 = vset.pattern.permute.xlu1 %v8659_v63  ;;  %v4685_v26 = vsel %vm1026_vm13, 1.0, %v8749_v31  ;;  %v4576_v33 = vsel %vm229_vm2, 1.0, %v8749_v31 }
 0x30a   :  { %v4748_v5 = vsel %vm1473_vm0, 1.0, %v8749_v31  ;;  %1902 = vperm.xlu1 %5824, %v5851_v48   ;;  %v850_v58 = vadd.f32 %v4653_v10, %v626_v56 }
 0x30b   :  { %v7891_v51 = vadd.f32 %v4748_v5, %v1297_v20  ;;  %v7893_v42 = vadd.f32 %v4796_v18, %v1633_v46 }
 0x30c   :  { %v1074_v5 = vadd.f32 %v4685_v26, %v850_v58 }
 0x30d   :  { %v1891_v35 = vpop.permute.xlu1 %1890  ;;  %5346 = vmatmul.mubr.msk.f32.gmra.mrb[10].mxu1 %vm2428_vm7, %v7893_v42 }
 0x30e   :  { %vm1919_vm4 = vcmp.eq.s32.totalorder %v1891_v35, %v6729_v15  ;;  %5825 = vset.pattern.permute.xlu1 %v8670_v32  ;;  %v4575_v32 = vsel %vm228_vm5, 1.0, %v8749_v31  ;;  %v8836_v35 = vld [vmem:[#allocation36_spill] sm:$0xff]  ;;  %vm691_vm5 = vcmp.eq.s32.totalorder %v8839_v8, %v6729_v15 }
 0x30f   :  { %v4810_v23 = vsel %vm1919_vm4, 1.0, %v8749_v31  ;;  %1569 = vperm.xlu1 %5825, %v7402_v50   ;;  %v4637_v50 = vsel %vm690_vm6, 1.0, %v8749_v31  ;;  %v516_v14 = vadd.f32 %v4607_v38, %v4575_v32  ;;  %vm467_vm1 = vcmp.eq.s32.totalorder %v8836_v35, %v6729_v15 }
 0x310   :  { %v7914_v44 = vadd.f32 %v4810_v23, %v1743_v0  ;;  %v738_v28 = vadd.f32 %v4637_v50, %v514_v7  ;;  %v8838_v0 = vld [vmem:[#allocation28_spill] sm:$0xff]  ;;  %vm915_vm6 = vcmp.eq.s32.totalorder %v7844_v54, %v6729_v15  ;;  %v4638_v25 = vsel %vm691_vm5, 1.0, %v8749_v31 }
 0x311   :  { %vm469_vm4 = vcmp.eq.s32.totalorder %v8838_v0, %v6729_v15  ;;  %v4670_v7 = vsel %vm915_vm6, 1.0, %v8749_v31 }
 0x312   :  { %v674_v9 = vpop.permute.xlu1 %673  ;;  %5371 = vmatmul.mubr.msk.f32.gmra.mrb[10].mxu0 %vm2428_vm7, %v7914_v44  ;;  %v962_v41 = vadd.f32 %v4669_v55, %v738_v28  ;;  %v4608_v21 = vsel %vm469_vm4, 1.0, %v8749_v31 }
 0x313   :  { %vm692_vm10 = vcmp.eq.s32.totalorder %v674_v9, %v6729_v15  ;;  %1572 = vperm.xlu1 %5825, %v7428_v43   ;;  %v517_v38 = vadd.f32 %v4608_v21, %v4576_v33 }
 0x314   :  { %v4639_v6 = vsel %vm692_vm10, 1.0, %v8749_v31 }
 0x315   :  { %v740_v30 = vadd.f32 %v4639_v6, %v516_v14 }
 0x317   :  { %1684 = vperm.xlu1 %5825, %v8811_v52   ;;  %v1116_v36 = vpop.permute.xlu1 %1115 }
 0x318   :  { %vm1138_vm15 = vcmp.eq.s32.totalorder %v1116_v36, %v6729_v15 }
 0x319   :  { %v4701_v13 = vsel %vm1138_vm15, 1.0, %v8749_v31  ;;  %v5338_v2 = vpop.f32.mrb[4].mxu1 }
 0x31a   :  { %v7944_v18 = vadd.f32 %v4701_v13, %v962_v41  ;;  %v2871_v16 = vmul.f32 %v5338_v2, %v4887_v57  ;;  %v2563_v20 = vpop.f32.mrb[5].mxu1 }
 0x31b   :  { %v2870_v52 = vmul.f32 %v4887_v57, %v2563_v20  ;;  %5827 = vset.pattern.permute.xlu1 %v8659_v63  ;;  %v1228_v46 = vpop.permute.xlu1 %1227  ;;  %v8841_v20 = vld [vmem:[#allocation80_spill] sm:$0xff] }
 0x31c   :  { %v7948_v48 = vadd.f32 %v2871_v16, %v7549_v59  ;;  %vm1250_vm0 = vcmp.eq.s32.totalorder %v1228_v46, %v6729_v15  ;;  %1905 = vperm.xlu1 %5827, %v8835_v47   ;;  %v8837_v59 = vld [vmem:[#allocation39_spill] sm:$0xff] }
 0x31d   :  { %v7953_v39 = vadd.f32 %v2870_v52, %v7553_v60  ;;  %v4717_v12 = vsel %vm1250_vm0, 1.0, %v8749_v31  ;;  %vm227_vm3 = vcmp.eq.s32.totalorder %v8837_v59, %v6729_v15  ;;  %v4606_v60 = vsel %vm467_vm1, 1.0, %v8749_v31 }
 0x31e   :  { %v7956_v24 = vadd.f32 %v4717_v12, %v1074_v5  ;;  %v4574_v22 = vsel %vm227_vm3, 1.0, %v8749_v31  ;;  %vm1365_vm1 = vcmp.eq.s32.totalorder %v8841_v20, %v6729_v15  ;;  %v8842_v12 = vld [vmem:[#allocation5_spill] sm:$0xff] }
 0x31f   :  { %v515_v23 = vadd.f32 %v4606_v60, %v4574_v22  ;;  %v4736_v47 = vsel %vm1365_vm1, 1.0, %v8749_v31  ;;  %vm1587_vm2 = vcmp.eq.s32.totalorder %v8842_v12, %v6729_v15 }
 0x320   :  { %1796 = vperm.xlu1 %5827, %v7428_v43   ;;  %v1670_v63 = vpop.permute.xlu1 %1669  ;;  %v4766_v0 = vsel %vm1587_vm2, 1.0, %v8749_v31 }
 0x321   :  { %v739_v9 = vadd.f32 %v4638_v25, %v515_v23  ;;  %vm1696_vm12 = vcmp.eq.s32.totalorder %v1670_v63, %v6729_v15 }
 0x322   :  { %v4779_v41 = vsel %vm1696_vm12, 1.0, %v8749_v31 }
 0x323   :  { %v963_v14 = vadd.f32 %v4670_v7, %v739_v9  ;;  %v1744_v13 = vadd.f32 %v4779_v41, %v7758_v40  ;;  %v1791_v9 = vpop.permute.xlu0 %1790 }
 0x325   :  { %v677_v43 = vpop.permute.xlu1 %676 }
 0x326   :  { %vm693_vm8 = vcmp.eq.s32.totalorder %v677_v43, %v6729_v15 }
 0x327   :  { %v4640_v32 = vsel %vm693_vm8, 1.0, %v8749_v31 }
 0x328   :  { %v741_v4 = vadd.f32 %v4640_v32, %v517_v38 }
 0x32a   :  { %v1119_v50 = vpop.permute.xlu1 %1118 }
 0x32b   :  { %vm1139_vm9 = vcmp.eq.s32.totalorder %v1119_v50, %v6729_v15 }
 0x32c   :  { %v4702_v34 = vsel %vm1139_vm9, 1.0, %v8749_v31 }
 0x32d   :  { %v1187_v6 = vadd.f32 %v4702_v34, %v963_v14 }
 0x32e   :  { %v1231_v54 = vpop.permute.xlu1 %1230 }
 0x32f   :  { %vm1251_vm10 = vcmp.eq.s32.totalorder %v1231_v54, %v6729_v15 }
 0x330   :  { %v4718_v49 = vsel %vm1251_vm10, 1.0, %v8749_v31  ;;  %vm1811_vm10 = vcmp.eq.s32.totalorder %v1791_v9, %v6729_v15 }
 0x331   :  { %v7984_v55 = vadd.f32 %v4718_v49, %v7665_v11  ;;  %v4889_v49 = vld [vmem:[%s8541_s8 + $0x3] ss:$0 sm:$0xff] }
 0x333   :  { %v1673_v28 = vpop.permute.xlu1 %1672 }
 0x334   :  { %vm1697_vm4 = vcmp.eq.s32.totalorder %v1673_v28, %v6729_v15  ;;  %v4798_v28 = vsel %vm1811_vm10, 1.0, %v8749_v31 }
 0x335   :  { %v4780_v33 = vsel %vm1697_vm4, 1.0, %v8749_v31 }
 0x336   :  { %v1745_v21 = vadd.f32 %v4780_v33, %v7891_v51 }
 0x338   :  { %v898_v61 = vpop.permute.xlu1 %897 }
 0x339   :  { %vm916_vm11 = vcmp.eq.s32.totalorder %v898_v61, %v6729_v15 }
 0x33a   :  { %v4671_v10 = vsel %vm916_vm11, 1.0, %v8749_v31 }
 0x33b   :  { %v7988_v36 = vadd.f32 %v4671_v10, %v740_v30  ;;  %v8840_v30 = vld [vmem:[#allocation73_spill] sm:$0xff] }
 0x33c   :  { %vm1141_vm15 = vcmp.eq.s32.totalorder %v8840_v30, %v6729_v15 }
 0x33d   :  { %v1340_v57 = vpop.permute.xlu1 %1339  ;;  %v4704_v52 = vsel %vm1141_vm15, 1.0, %v8749_v31 }
 0x33e   :  { %vm1362_vm6 = vcmp.eq.s32.totalorder %v1340_v57, %v6729_v15 }
 0x33f   :  { %v4733_v50 = vsel %vm1362_vm6, 1.0, %v8749_v31 }
 0x340   :  { %v1410_v34 = vadd.f32 %v4733_v50, %v7944_v18 }
 0x341   :  { %v1452_v56 = vpop.permute.xlu1 %1451 }
 0x342   :  { %vm1474_vm9 = vcmp.eq.s32.totalorder %v1452_v56, %v6729_v15 }
 0x346   :  { %v1894_v26 = vpop.permute.xlu1 %1893 }
 0x347   :  { %vm1920_vm13 = vcmp.eq.s32.totalorder %v1894_v26, %v6729_v15 }
 0x348   :  { %v4811_v11 = vsel %vm1920_vm13, 1.0, %v8749_v31 }
 0x349   :  { %v7995_v2 = vadd.f32 %v4811_v11, %v1744_v13 }
 0x34b   :  { %v901_v58 = vpop.permute.xlu1 %900  ;;  %5373 = vmatprep.mubr.msk.f32.mxu0 %vm2428_vm7, %v7995_v2 }
 0x34c   :  { %vm917_vm0 = vcmp.eq.s32.totalorder %v901_v58, %v6729_v15 }
 0x34d   :  { %v4672_v16 = vsel %vm917_vm0, 1.0, %v8749_v31 }
 0x34e   :  { %v965_v40 = vadd.f32 %v4672_v16, %v741_v4  ;;  %v4890_v16 = vld [vmem:[%s8543_s10 + $0x3] ss:$0 sm:$0xff] }
 0x350   :  { %v1189_v46 = vadd.f32 %v4704_v52, %v965_v40  ;;  %v1343_v5 = vpop.permute.xlu1 %1342 }
 0x351   :  { %vm1363_vm3 = vcmp.eq.s32.totalorder %v1343_v5, %v6729_v15 }
 0x352   :  { %v4734_v35 = vsel %vm1363_vm3, 1.0, %v8749_v31  ;;  %v8011_v63 = vadd.f32 %v4736_v47, %v1189_v46 }
 0x353   :  { %v1411_v59 = vadd.f32 %v4734_v35, %v1187_v6  ;;  %v4749_v6 = vsel %vm1474_vm9, 1.0, %v8749_v31 }
 0x354   :  { %v1455_v60 = vpop.permute.xlu1 %1454  ;;  %v1522_v18 = vadd.f32 %v4749_v6, %v7956_v24 }
 0x355   :  { %v1635_v8 = vadd.f32 %v4766_v0, %v1411_v59  ;;  %vm1475_vm15 = vcmp.eq.s32.totalorder %v1455_v60, %v6729_v15 }
 0x356   :  { %v4750_v59 = vsel %vm1475_vm15, 1.0, %v8749_v31 }
 0x357   :  { %v8044_v11 = vadd.f32 %v4798_v28, %v1635_v8  ;;  %v1523_v8 = vadd.f32 %v4750_v59, %v7984_v55  ;;  %v3068_v59 = vld [vmem:[%s8547_s14 + $0x8] sm:$0xff] }
 0x359   :  { %v1897_v22 = vpop.permute.xlu1 %1896 }
 0x35a   :  { %vm1921_vm5 = vcmp.eq.s32.totalorder %v1897_v22, %v6729_v15 }
 0x35b   :  { %v4812_v23 = vsel %vm1921_vm5, 1.0, %v8749_v31 }
 0x35c   :  { %v8019_v43 = vadd.f32 %v4812_v23, %v1745_v21 }
 0x35e   :  { %v1122_v25 = vpop.permute.xlu1 %1121  ;;  %5374 = vmatmul.mubr.msk.f32.gmra.mrb[12].mxu0 %vm2428_vm7, %v8019_v43 }
 0x35f   :  { %vm1140_vm1 = vcmp.eq.s32.totalorder %v1122_v25, %v6729_v15 }
 0x363   :  { %v1564_v38 = vpop.permute.xlu1 %1563 }
 0x364   :  { %vm1586_vm8 = vcmp.eq.s32.totalorder %v1564_v38, %v6729_v15  ;;  %v1794_v38 = vpop.permute.xlu0 %1793 }
 0x365   :  { %v4765_v14 = vsel %vm1586_vm8, 1.0, %v8749_v31  ;;  %vm1812_vm4 = vcmp.eq.s32.totalorder %v1794_v38, %v6729_v15  ;;  %v2975_v38 = vld [vmem:[%s8546_s12 + $0x10] sm:$0xff] }
 0x366   :  { %v1634_v61 = vadd.f32 %v4765_v14, %v1410_v34 }
 0x367   :  { %v1676_v32 = vpop.permute.xlu1 %1675 }
 0x368   :  { %vm1698_vm11 = vcmp.eq.s32.totalorder %v1676_v32, %v6729_v15 }
 0x369   :  { %v4781_v10 = vsel %vm1698_vm11, 1.0, %v8749_v31 }
 0x36a   :  { %v1746_v20 = vadd.f32 %v4781_v10, %v1522_v18 }
 0x36c   :  { %v8023_v7 = vpop.permute.xlu1 %1236 }
 0x36d   :  { %vm1253_vm6 = vcmp.eq.s32.totalorder %v8023_v7, %v6729_v15  ;;  %v1909_v7 = vpop.permute.xlu0 %1908 }
 0x36e   :  { %v4720_v14 = vsel %vm1253_vm6, 1.0, %v8749_v31  ;;  %vm1925_vm11 = vcmp.eq.s32.totalorder %v1909_v7, %v6729_v15  ;;  %v4894_v7 = vld [vmem:[%s8543_s10 + $0x5] ss:$0 sm:$0xff] }
 0x371   :  { %v1679_v4 = vpop.permute.xlu1 %1678 }
 0x372   :  { %vm1699_vm0 = vcmp.eq.s32.totalorder %v1679_v4, %v6729_v15 }
 0x373   :  { %v4782_v60 = vsel %vm1699_vm0, 1.0, %v8749_v31 }
 0x374   :  { %v1747_v22 = vadd.f32 %v4782_v60, %v1523_v8 }
 0x376   :  { %v1346_v51 = vpop.permute.xlu1 %1345 }
 0x377   :  { %vm1364_vm2 = vcmp.eq.s32.totalorder %v1346_v51, %v6729_v15  ;;  %v4799_v51 = vsel %vm1812_vm4, 1.0, %v8749_v31 }
 0x378   :  { %v4735_v23 = vsel %vm1364_vm2, 1.0, %v8749_v31 }
 0x37b   :  { %v1788_v54 = vpop.permute.xlu1 %1787 }
 0x37c   :  { %vm1810_vm12 = vcmp.eq.s32.totalorder %v1788_v54, %v6729_v15  ;;  %v1301_v54 = vadd.f32 %v4720_v14, %v7860_v53  ;;  %v4816_v53 = vsel %vm1925_vm11, 1.0, %v8749_v31 }
 0x37d   :  { %v4797_v57 = vsel %vm1810_vm12, 1.0, %v8749_v31  ;;  %v5341_v56 = vpop.f32.mrb[6].mxu1 }
 0x37e   :  { %v8042_v41 = vadd.f32 %v4797_v57, %v1634_v61  ;;  %v2889_v26 = vmul.f32 %v5341_v56, %v4889_v49  ;;  %v2573_v13 = vpop.f32.mrb[7].mxu1 }
 0x37f   :  { %v2888_v58 = vmul.f32 %v4889_v49, %v2573_v13  ;;  %v1900_v30 = vpop.permute.xlu1 %1899 }
 0x380   :  { %v8050_v40 = vadd.f32 %v2889_v26, %v7948_v48  ;;  %vm1922_vm13 = vcmp.eq.s32.totalorder %v1900_v30, %v6729_v15  ;;  %5348 = vmatprep.mubr.msk.f32.mxu1 %vm2428_vm7, %v8042_v41 }
 0x381   :  { %v8056_v24 = vadd.f32 %v2888_v58, %v7953_v39  ;;  %v4813_v52 = vsel %vm1922_vm13, 1.0, %v8749_v31  ;;  %5349 = vmatmul.mubr.msk.f32.gmra.mrb[12].mxu1 %vm2428_vm7, %v8044_v11  ;;  %v5369_v46 = vpop.f32.mrb[8].mxu0 }
 0x382   :  { %v8062_v5 = vadd.f32 %v4813_v52, %v1746_v20  ;;  %v2898_v48 = vmul.f32 %v5369_v46, %v4890_v16  ;;  %v2766_v47 = vpop.f32.mrb[9].mxu0 }
 0x383   :  { %v2897_v12 = vmul.f32 %v4890_v16, %v2766_v47  ;;  %v2974_v47 = vld [vmem:[%s8546_s12 + $0x8] sm:$0xff] }
 0x384   :  { %v8066_v35 = vadd.f32 %v2898_v48, %v7850_v62  ;;  %v1461_v39 = vpop.permute.xlu1 %1460  ;;  %5376 = vmatprep.mubr.msk.f32.mxu0 %vm2428_vm7, %v8062_v5  ;;  %v4703_v62 = vsel %vm1140_vm1, 1.0, %v8749_v31  ;;  %v2973_v48 = vld [vmem:[%s8546_s12] sm:$0xff] }
 0x385   :  { %v8072_v0 = vadd.f32 %v2897_v12, %v7858_v29  ;;  %v1188_v25 = vadd.f32 %v4703_v62, %v7988_v36  ;;  %vm1477_vm8 = vcmp.eq.s32.totalorder %v1461_v39, %v6729_v15  ;;  %v3067_v12 = vld [vmem:[%s8547_s14] sm:$0xff]  ;;  %v5583_v39 = vpack.c.bf16 %v2974_v47, %v2973_v48 }
 0x386   :  { %v4752_v34 = vsel %vm1477_vm8, 1.0, %v8749_v31  ;;  %v4898_v47 = vld [vmem:[%s8543_s10 + $0x7] ss:$0 sm:$0xff] }
 0x387   :  { %v1412_v55 = vadd.f32 %v4735_v23, %v1188_v25  ;;  %v1525_v28 = vadd.f32 %v4752_v34, %v1301_v54  ;;  %5584 = vmatprep.subr.bf16.mxu1 %v5583_v39 }
 0x388   :  { %5586 = vmatpush3.bf16.msra.mxu1 %v5583_v39 }
 0x389   :  { %v1903_v33 = vpop.permute.xlu1 %1902 }
 0x38a   :  { %vm1923_vm3 = vcmp.eq.s32.totalorder %v1903_v33, %v6729_v15 }
 0x38b   :  { %v4814_v21 = vsel %vm1923_vm3, 1.0, %v8749_v31 }
 0x38c   :  { %v8082_v29 = vadd.f32 %v4814_v21, %v1747_v22  ;;  %v4892_v21 = vld [vmem:[%s8543_s10 + $0x4] ss:$0 sm:$0xff] }
 0x38e   :  { %v1570_v32 = vpop.permute.xlu1 %1569  ;;  %5377 = vmatmul.mubr.msk.f32.gmra.mrb[14].mxu0 %vm2428_vm7, %v8082_v29 }
 0x38f   :  { %vm1588_vm5 = vcmp.eq.s32.totalorder %v1570_v32, %v6729_v15  ;;  %v2976_v32 = vld [vmem:[%s8546_s12 + $0x18] sm:$0xff] }
 0x390   :  { %v4767_v4 = vsel %vm1588_vm5, 1.0, %v8749_v31 }
 0x391   :  { %v1636_v9 = vadd.f32 %v4767_v4, %v1412_v55  ;;  %v3069_v55 = vld [vmem:[%s8547_s14 + $0x10] sm:$0xff] }
 0x392   :  { %v1573_v50 = vpop.permute.xlu1 %1572 }
 0x393   :  { %v8094_v36 = vadd.f32 %v4799_v51, %v1636_v9  ;;  %vm1589_vm10 = vcmp.eq.s32.totalorder %v1573_v50, %v6729_v15  ;;  %v5587_v51 = vpack.c.bf16 %v2976_v32, %v2975_v38  ;;  %v3070_v50 = vld [vmem:[%s8547_s14 + $0x18] sm:$0xff] }
 0x394   :  { %v4768_v57 = vsel %vm1589_vm10, 1.0, %v8749_v31  ;;  %v5595_v34 = vpack.c.bf16 %v3070_v50, %v3069_v55  ;;  %v8843_v38 = vld [vmem:[#allocation81_spill] sm:$0xff]  ;;  %v4902_v55 = vld [vmem:[%s8548_s15] ss:$0 sm:$0xff] }
 0x395   :  { %5351 = vmatprep.mubr.msk.f32.mxu1 %vm2428_vm7, %v8094_v36  ;;  %v1637_v58 = vadd.f32 %v4768_v57, %v8011_v63  ;;  %5588 = vmatprep.subr.bf16.mxu1 %v5587_v51  ;;  %v8844_v32 = vld [vmem:[#allocation9_spill] sm:$0xff] }
 0x396   :  { %v1685_v6 = vpop.permute.xlu1 %1684  ;;  %5590 = vmatpush3.bf16.msra.mxu1 %v5587_v51  ;;  %v4899_v51 = vld [vmem:[%s8549_s13] ss:$0 sm:$0xff] }
 0x397   :  { %vm1701_vm9 = vcmp.eq.s32.totalorder %v1685_v6, %v6729_v15 }
 0x398   :  { %v4784_v49 = vsel %vm1701_vm9, 1.0, %v8749_v31 }
 0x399   :  { %v1749_v61 = vadd.f32 %v4784_v49, %v1525_v28 }
 0x39b   :  { %v1906_v10 = vpop.permute.xlu1 %1905  ;;  %v8112_v26 = vadd.f32 %v4816_v53, %v1749_v61 }
 0x39c   :  { %vm1924_vm12 = vcmp.eq.s32.totalorder %v1906_v10, %v6729_v15 }
 0x39d   :  { %v4815_v56 = vsel %vm1924_vm12, 1.0, %v8749_v31 }
 0x39e   :  { %v8110_v18 = vadd.f32 %v4815_v56, %v7728_v37  ;;  %v4891_v37 = vld [vmem:[%s8541_s8 + $0x4] ss:$0 sm:$0xff] }
 0x39f   :  { %v1797_v13 = vpop.permute.xlu1 %1796 }
 0x3a0   :  { %vm1813_vm13 = vcmp.eq.s32.totalorder %v1797_v13, %v6729_v15  ;;  %5379 = vmatprep.mubr.msk.f32.mxu0 %vm2428_vm7, %v8110_v18 }
 0x3a1   :  { %v4800_v30 = vsel %vm1813_vm13, 1.0, %v8749_v31  ;;  %5380 = vmatmul.mubr.msk.f32.gmra.mrb[16].mxu0 %vm2428_vm7, %v8112_v26 }
 0x3a2   :  { %v8121_v16 = vadd.f32 %v4800_v30, %v1637_v58 }
 0x3a4   :  { %5352 = vmatmul.mubr.msk.f32.gmra.mrb[14].mxu1 %vm2428_vm7, %v8121_v16 }
 0x3c5   :  { %v5344_v63 = vpop.f32.mrb[8].mxu1 }
 0x3c6   :  { %v2907_v20 = vmul.f32 %v5344_v63, %v4891_v37  ;;  %v2583_v15 = vpop.f32.mrb[9].mxu1  ;;  %v4896_v63 = vld [vmem:[%s8543_s10 + $0x6] ss:$0 sm:$0xff] }
 0x3c7   :  { %v2906_v52 = vmul.f32 %v4891_v37, %v2583_v15 }
 0x3c8   :  { %v2909_v46 = vadd.f32 %v2907_v20, %v8050_v40  ;;  %v5591_v40 = vpack.c.bf16 %v3068_v59, %v3067_v12 }
 0x3c9   :  { %v2908_v31 = vadd.f32 %v2906_v52, %v8056_v24  ;;  %v4893_v24 = vld [vmem:[%s8541_s8 + $0x5] ss:$0 sm:$0xff] }
 0x3ca   :  { %5592 = vmatprep.subr.bf16.mxu0 %v5591_v40 }
 0x3cb   :  { %5594 = vmatpush3.bf16.msra.mxu0 %v5591_v40  ;;  %v4897_v40 = vld [vmem:[%s8541_s8 + $0x7] ss:$0 sm:$0xff] }
 0x3cc   :  { %5596 = vmatprep.subr.bf16.mxu0 %v5595_v34 }
 0x3cf   :  { %5598 = vmatpush3.bf16.msra.mxu0 %v5595_v34 }
 0x3e0   :  { %v5347_v60 = vpop.f32.mrb[10].mxu1 }
 0x3e1   :  { %v2925_v8 = vmul.f32 %v5347_v60, %v4893_v24  ;;  %v2593_v33 = vpop.f32.mrb[11].mxu1 }
 0x3e2   :  { %v2924_v62 = vmul.f32 %v4893_v24, %v2593_v33 }
 0x3e3   :  { %v2927_v22 = vadd.f32 %v2925_v8, %v2909_v46 }
 0x3e4   :  { %v2926_v23 = vadd.f32 %v2924_v62, %v2908_v31 }
 0x3e5   :  { %v5372_v25 = vpop.f32.mrb[10].mxu0 }
 0x3e6   :  { %v2916_v4 = vmul.f32 %v5372_v25, %v4892_v21  ;;  %v2776_v9 = vpop.f32.mrb[11].mxu0 }
 0x3e7   :  { %v2915_v14 = vmul.f32 %v4892_v21, %v2776_v9 }
 0x3e8   :  { %v2918_v6 = vadd.f32 %v2916_v4, %v8066_v35  ;;  %v4895_v35 = vld [vmem:[%s8541_s8 + $0x6] ss:$0 sm:$0xff] }
 0x3e9   :  { %v2917_v54 = vadd.f32 %v2915_v14, %v8072_v0 }
 0x431   :  { %v5375_v49 = vpop.f32.mrb[12].mxu0 }
 0x432   :  { %v2934_v28 = vmul.f32 %v5375_v49, %v4894_v7  ;;  %v2786_v61 = vpop.f32.mrb[13].mxu0 }
 0x433   :  { %v2933_v10 = vmul.f32 %v4894_v7, %v2786_v61 }
 0x434   :  { %v2936_v57 = vadd.f32 %v2934_v28, %v2918_v6 }
 0x435   :  { %v2935_v56 = vadd.f32 %v2933_v10, %v2917_v54 }
 0x454   :  { %v5350_v53 = vpop.f32.mrb[12].mxu1 }
 0x455   :  { %v2943_v13 = vmul.f32 %v5350_v53, %v4895_v35  ;;  %v2603_v0 = vpop.f32.mrb[13].mxu1 }
 0x456   :  { %v2942_v58 = vmul.f32 %v4895_v35, %v2603_v0  ;;  %v8845_v35 = vld [vmem:[#allocation48_spill] sm:$0xff]  ;;  %v8847_v0 = vld [vmem:[#allocation49_spill] sm:$0xff] }
 0x457   :  { %v2945_v30 = vadd.f32 %v2943_v13, %v2927_v22  ;;  %v8846_v53 = vmax.f32 %v8845_v35, 0.0  ;;  %v4948_v35 = vld [vmem:[%s8543_s10 + $0x9] ss:$0 sm:$0xff] }
 0x458   :  { %v2944_v37 = vadd.f32 %v2942_v58, %v2926_v23  ;;  %v8848_v58 = vmax.f32 %v8847_v0, 0.0 }
 0x461   :  { %v5378_v20 = vpop.f32.mrb[14].mxu0 }
 0x462   :  { %v2952_v15 = vmul.f32 %v5378_v20, %v4896_v63  ;;  %v2796_v52 = vpop.f32.mrb[15].mxu0  ;;  %v8850_v20 = vld [vmem:[#allocation82_spill] sm:$0xff] }
 0x463   :  { %v2951_v46 = vmul.f32 %v4896_v63, %v2796_v52  ;;  %v8849_v63 = vld [vmem:[#allocation13_spill] sm:$0xff]  ;;  %v8852_v52 = vld [vmem:[#allocation14_spill] sm:$0xff] }
 0x464   :  { %v2954_v31 = vadd.f32 %v2952_v15, %v2936_v57  ;;  %v8851_v15 = vld [vmem:[#allocation15_spill] sm:$0xff] }
 0x465   :  { %v2953_v48 = vadd.f32 %v2951_v46, %v2935_v56  ;;  %v8853_v46 = vld [vmem:[#allocation19_spill] sm:$0xff] }
 0x474   :  { %v5381_v12 = vpop.f32.mrb[16].mxu0 }
 0x475   :  { %v2970_v39 = vmul.f32 %v5381_v12, %v4898_v47  ;;  %v2806_v59 = vpop.f32.mrb[17].mxu0  ;;  %v8857_v12 = vld [vmem:[#allocation62_spill] sm:$0xff] }
 0x476   :  { %v2969_v24 = vmul.f32 %v4898_v47, %v2806_v59  ;;  %v8856_v47 = vld [vmem:[#allocation45_spill] sm:$0xff] }
 0x477   :  { %v2972_v60 = vadd.f32 %v2970_v39, %v2954_v31  ;;  %v5353_v8 = vpop.f32.mrb[14].mxu1  ;;  %v8854_v31 = vld [vmem:[#allocation23_spill] sm:$0xff]  ;;  %v8858_v39 = vld [vmem:[#allocation16_spill] sm:$0xff]  ;;  %v8859_v59 = vld [vmem:[#allocation41_spill] sm:$0xff] }
 0x478   :  { %v2971_v33 = vadd.f32 %v2969_v24, %v2953_v48  ;;  %v2961_v62 = vmul.f32 %v5353_v8, %v4897_v40  ;;  %v2613_v22 = vpop.f32.mrb[15].mxu1  ;;  %v8855_v48 = vld [vmem:[#allocation46_spill] sm:$0xff] }
 0x479   :  { %v2960_v21 = vmul.f32 %v4897_v40, %v2613_v22  ;;  %v8860_v40 = vld [vmem:[#allocation63_spill] sm:$0xff]  ;;  %v4973_v24 = vld [vmem:[%s8546_s12 + $0x20] sm:$0xff] }
 0x47a   :  { %v2963_v23 = vadd.f32 %v2961_v62, %v2945_v30  ;;  %5401 = vmatprep.mubr.msk.f32.mxu0 %vm2401_vm14, %v2971_v33  ;;  %v4981_v8 = vld [vmem:[%s8547_s14 + $0x20] sm:$0xff]  ;;  %v4982_v62 = vld [vmem:[%s8547_s14 + $0x28] sm:$0xff] }
 0x47b   :  { %v2962_v25 = vadd.f32 %v2960_v21, %v2944_v37  ;;  %5402 = vmatmul.mubr.msk.f32.vlgmr.msra.gmra.mrb[18].mxu0 %vm2401_vm14, %v2972_v60  ;;  %v4974_v60 = vld [vmem:[%s8546_s12 + $0x28] sm:$0xff]  ;;  %v5615_v22 = vpack.c.bf16 %v4982_v62, %v4981_v8  ;;  %v4975_v21 = vld [vmem:[%s8546_s12 + $0x30] sm:$0xff] }
 0x47c   :  { %5436 = vmatprep.mubr.msk.f32.mxu0 %vm2428_vm7, %v8843_v38  ;;  %v5607_v33 = vpack.c.bf16 %v4974_v60, %v4973_v24 }
 0x47d   :  { %5390 = vmatprep.mubr.msk.f32.mxu1 %vm2401_vm14, %v2962_v25  ;;  %v4983_v25 = vld [vmem:[%s8547_s14 + $0x30] sm:$0xff] }
 0x47e   :  { %5391 = vmatmul.mubr.msk.f32.vlgmr.msra.gmra.mrb[16].mxu1 %vm2401_vm14, %v2963_v23  ;;  %v4976_v23 = vld [vmem:[%s8546_s12 + $0x38] sm:$0xff] }
 0x47f   :  { %5408 = vmatprep.mubr.msk.f32.mxu1 %vm2428_vm7, %v8844_v32 }
 0x54e   :  { %v5403_v4 = vpop.f32.mrb[18].mxu0 }
 0x54f   :  { %v3150_v9 = vpop.f32.mrb[19].mxu0  ;;  %v3156_v50 = vadd.f32 %v5403_v4, %v4902_v55  ;;  %v4984_v4 = vld [vmem:[%s8547_s14 + $0x38] sm:$0xff] }
 0x550   :  { %v3151_v14 = vadd.f32 %v4902_v55, %v3150_v9  ;;  %v5611_v55 = vpack.c.bf16 %v4976_v23, %v4975_v21  ;;  %v5619_v9 = vpack.c.bf16 %v4984_v4, %v4983_v25  ;;  %v4950_v25 = vld [vmem:[%s8541_s8 + $0xa] ss:$0 sm:$0xff] }
 0x551   :  { %v5392_v34 = vpop.f32.mrb[16].mxu1  ;;  %v3160_v49 = vmax.f32 %v3156_v50, 0.0  ;;  %v4943_v50 = vld [vmem:[%s8543_s10 + $0x8] ss:$0 sm:$0xff] }
 0x552   :  { %v3062_v6 = vadd.f32 %v5392_v34, %v4899_v51  ;;  %v3056_v54 = vpop.f32.mrb[17].mxu1  ;;  %v3159_v61 = vmax.f32 %v3151_v14, 0.0 }
 0x553   :  { %v3057_v7 = vadd.f32 %v4899_v51, %v3056_v54  ;;  %v4940_v51 = vld [vmem:[%s8541_s8 + $0x8] ss:$0 sm:$0xff] }
 0x554   :  { %v3066_v28 = vmax.f32 %v3062_v6, 0.0  ;;  %v4941_v6 = vld [vmem:[%s8544_s9 + $0x1] ss:$0 sm:$0xff] }
 0x555   :  { %v3065_v10 = vmax.f32 %v3057_v7, 0.0 }
 0x556   :  { %v3162_v57 = vadd.f32 %v3160_v49, %v3066_v28 }
 0x557   :  { %v3161_v56 = vadd.f32 %v3159_v61, %v3065_v10  ;;  %v4944_v61 = vld [vmem:[%s8545_s11 + $0x1] ss:$0 sm:$0xff] }
 0x558   :  { %v8193_v13 = vadd.f32 %v3162_v57, %v8846_v53 }
 0x559   :  { %v8197_v30 = vadd.f32 %v3161_v56, %v8848_v58  ;;  %v4946_v56 = vld [vmem:[%s8541_s8 + $0x9] ss:$0 sm:$0xff] }
 0x55b   :  { %v5599_v37 = vpack.c.bf16 %v8193_v13, %v8197_v30 }
 0x55d   :  { %5600 = vmatprep.subr.bf16.mxu1 %v5599_v37  ;;  %5604 = vmatprep.subr.bf16.mxu0 %v5599_v37 }
 0x55e   :  { %5602 = vmatpush3.bf16.msra.mxu1 %v5599_v37  ;;  %5606 = vmatpush3.bf16.msra.mxu0 %v5599_v37 }
 0x55f   :  { %5608 = vmatprep.subr.bf16.mxu1 %v5607_v33  ;;  %5616 = vmatprep.subr.bf16.mxu0 %v5615_v22 }
 0x561   :  { %5409 = vmatmul.mubr.msk.f32.vlgmr.msra.gmra.mrb[18].mxu1 %vm2428_vm7, %v8849_v63  ;;  %5437 = vmatmul.mubr.msk.f32.vlgmr.msra.gmra.mrb[20].mxu0 %vm2428_vm7, %v8850_v20 }
 0x562   :  { %5411 = vmatprep.mubr.msk.f32.mxu1 %vm2428_vm7, %v8851_v15  ;;  %5439 = vmatprep.mubr.msk.f32.mxu0 %vm2428_vm7, %v8852_v52 }
 0x563   :  { %5610 = vmatpush3.bf16.msra.mxu1 %v5607_v33  ;;  %5618 = vmatpush3.bf16.msra.mxu0 %v5615_v22 }
 0x564   :  { %5612 = vmatprep.subr.bf16.mxu1 %v5611_v55  ;;  %5620 = vmatprep.subr.bf16.mxu0 %v5619_v9 }
 0x565   :  { %5412 = vmatmul.mubr.msk.f32.gmra.mrb[20].mxu1 %vm2428_vm7, %v8853_v46  ;;  %5440 = vmatmul.mubr.msk.f32.gmra.mrb[22].mxu0 %vm2428_vm7, %v8854_v31 }
 0x566   :  { %5414 = vmatprep.mubr.msk.f32.mxu1 %vm2428_vm7, %v8855_v48  ;;  %5442 = vmatprep.mubr.msk.f32.mxu0 %vm2428_vm7, %v8856_v47 }
 0x567   :  { %5614 = vmatpush3.bf16.msra.mxu1 %v5611_v55  ;;  %5622 = vmatpush3.bf16.msra.mxu0 %v5619_v9  ;;  %v4952_v55 = vld [vmem:[%s8543_s10 + $0xa] ss:$0 sm:$0xff] }
 0x569   :  { %5415 = vmatmul.mubr.msk.f32.gmra.mrb[22].mxu1 %vm2428_vm7, %v8857_v12  ;;  %5443 = vmatmul.mubr.msk.f32.gmra.mrb[24].mxu0 %vm2428_vm7, %v8858_v39 }
 0x56a   :  { %5417 = vmatprep.mubr.msk.f32.mxu1 %vm2428_vm7, %v8859_v59  ;;  %5445 = vmatprep.mubr.msk.f32.mxu0 %vm2428_vm7, %v8860_v40 }
 0x56d   :  { %5418 = vmatmul.mubr.msk.f32.gmra.mrb[24].mxu1 %vm2428_vm7, %v7562_v27  ;;  %5446 = vmatmul.mubr.msk.f32.gmra.mrb[26].mxu0 %vm2428_vm7, %v7583_v19 }
 0x56e   :  { %5420 = vmatprep.mubr.msk.f32.mxu1 %vm2428_vm7, %v7767_v1  ;;  %5448 = vmatprep.mubr.msk.f32.mxu0 %vm2428_vm7, %v7654_v3 }
 0x571   :  { %5421 = vmatmul.mubr.msk.f32.gmra.mrb[26].mxu1 %vm2428_vm7, %v7769_v45  ;;  %5449 = vmatmul.mubr.msk.f32.gmra.mrb[28].mxu0 %vm2428_vm7, %v7914_v44 }
 0x572   :  { %5423 = vmatprep.mubr.msk.f32.mxu1 %vm2428_vm7, %v7772_v17  ;;  %5451 = vmatprep.mubr.msk.f32.mxu0 %vm2428_vm7, %v7995_v2 }
 0x575   :  { %5424 = vmatmul.mubr.msk.f32.gmra.mrb[28].mxu1 %vm2428_vm7, %v7893_v42  ;;  %5452 = vmatmul.mubr.msk.f32.gmra.mrb[30].mxu0 %vm2428_vm7, %v8019_v43 }
 0x576   :  { %5426 = vmatprep.mubr.msk.f32.mxu1 %vm2428_vm7, %v8042_v41  ;;  %5454 = vmatprep.mubr.msk.f32.mxu0 %vm2428_vm7, %v8062_v5 }
 0x579   :  { %5427 = vmatmul.mubr.msk.f32.gmra.mrb[30].mxu1 %vm2428_vm7, %v8044_v11  ;;  %5455 = vmatmul.mubr.msk.f32.gmra.mrb[32].mxu0 %vm2428_vm7, %v8082_v29 }
 0x57a   :  { %5429 = vmatprep.mubr.msk.f32.mxu1 %vm2428_vm7, %v8094_v36  ;;  %5457 = vmatprep.mubr.msk.f32.mxu0 %vm2428_vm7, %v8110_v18 }
 0x57d   :  { %5430 = vmatmul.mubr.msk.f32.gmra.mrb[32].mxu1 %vm2428_vm7, %v8121_v16  ;;  %5458 = vmatmul.mubr.msk.f32.gmra.mrb[34].mxu0 %vm2428_vm7, %v8112_v26 }
 0x634   :  { %v5410_v14 = vpop.f32.mrb[18].mxu1  ;;  %v5438_v34 = vpop.f32.mrb[20].mxu0 }
 0x635   :  { %v3466_v54 = vmul.f32 %v5410_v14, %v4940_v51  ;;  %v3482_v7 = vmul.f32 %v5438_v34, %v4943_v50  ;;  %v3231_v49 = vpop.f32.mrb[19].mxu1  ;;  %v3376_v28 = vpop.f32.mrb[21].mxu0 }
 0x636   :  { %v3465_v10 = vmul.f32 %v4940_v51, %v3231_v49  ;;  %v3481_v57 = vmul.f32 %v4943_v50, %v3376_v28 }
 0x637   :  { %v3474_v58 = vadd.f32 %v4941_v6, %v3466_v54  ;;  %v3490_v37 = vadd.f32 %v4944_v61, %v3482_v7 }
 0x638   :  { %v5413_v53 = vpop.f32.mrb[20].mxu1  ;;  %v5441_v0 = vpop.f32.mrb[22].mxu0  ;;  %v3473_v62 = vadd.f32 %v4941_v6, %v3465_v10  ;;  %v3489_v22 = vadd.f32 %v4944_v61, %v3481_v57  ;;  %v4954_v10 = vld [vmem:[%s8541_s8 + $0xb] ss:$0 sm:$0xff] }
 0x639   :  { %v3497_v24 = vmul.f32 %v5413_v53, %v4946_v56  ;;  %v3506_v60 = vmul.f32 %v5441_v0, %v4948_v35  ;;  %v3241_v8 = vpop.f32.mrb[21].mxu1  ;;  %v3386_v33 = vpop.f32.mrb[23].mxu0  ;;  %v4956_v57 = vld [vmem:[%s8543_s10 + $0xb] ss:$0 sm:$0xff] }
 0x63a   :  { %v3496_v21 = vmul.f32 %v4946_v56, %v3241_v8  ;;  %v3505_v23 = vmul.f32 %v4948_v35, %v3386_v33 }
 0x63b   :  { %v3499_v4 = vadd.f32 %v3497_v24, %v3474_v58  ;;  %v3508_v9 = vadd.f32 %v3506_v60, %v3490_v37 }
 0x63c   :  { %v3498_v51 = vadd.f32 %v3496_v21, %v3473_v62  ;;  %v3507_v50 = vadd.f32 %v3505_v23, %v3489_v22  ;;  %v5416_v14 = vpop.f32.mrb[22].mxu1  ;;  %v5444_v34 = vpop.f32.mrb[24].mxu0  ;;  %v4958_v21 = vld [vmem:[%s8541_s8 + $0xc] ss:$0 sm:$0xff] }
 0x63d   :  { %v3515_v54 = vmul.f32 %v5416_v14, %v4950_v25  ;;  %v3524_v7 = vmul.f32 %v5444_v34, %v4952_v55  ;;  %v3251_v6 = vpop.f32.mrb[23].mxu1  ;;  %v3396_v49 = vpop.f32.mrb[25].mxu0  ;;  %v4960_v23 = vld [vmem:[%s8543_s10 + $0xc] ss:$0 sm:$0xff] }
 0x63e   :  { %v3514_v28 = vmul.f32 %v4950_v25, %v3251_v6  ;;  %v3523_v61 = vmul.f32 %v4952_v55, %v3396_v49 }
 0x63f   :  { %v3517_v56 = vadd.f32 %v3515_v54, %v3499_v4  ;;  %v3526_v35 = vadd.f32 %v3524_v7, %v3508_v9 }
 0x640   :  { %v3516_v53 = vadd.f32 %v3514_v28, %v3498_v51  ;;  %v3525_v0 = vadd.f32 %v3523_v61, %v3507_v50  ;;  %v5419_v58 = vpop.f32.mrb[24].mxu1  ;;  %v5447_v37 = vpop.f32.mrb[26].mxu0  ;;  %v4962_v28 = vld [vmem:[%s8541_s8 + $0xd] ss:$0 sm:$0xff] }
 0x641   :  { %v3533_v24 = vmul.f32 %v5419_v58, %v4954_v10  ;;  %v3542_v60 = vmul.f32 %v5447_v37, %v4956_v57  ;;  %v3261_v8 = vpop.f32.mrb[25].mxu1  ;;  %v3406_v33 = vpop.f32.mrb[27].mxu0  ;;  %v4964_v61 = vld [vmem:[%s8543_s10 + $0xd] ss:$0 sm:$0xff] }
 0x642   :  { %v3532_v62 = vmul.f32 %v4954_v10, %v3261_v8  ;;  %v3541_v22 = vmul.f32 %v4956_v57, %v3406_v33 }
 0x643   :  { %v3535_v25 = vadd.f32 %v3533_v24, %v3517_v56  ;;  %v3544_v55 = vadd.f32 %v3542_v60, %v3526_v35 }
 0x644   :  { %v3534_v4 = vadd.f32 %v3532_v62, %v3516_v53  ;;  %v3543_v9 = vadd.f32 %v3541_v22, %v3525_v0  ;;  %v5422_v51 = vpop.f32.mrb[26].mxu1  ;;  %v5450_v50 = vpop.f32.mrb[28].mxu0  ;;  %v4966_v62 = vld [vmem:[%s8541_s8 + $0xe] ss:$0 sm:$0xff] }
 0x645   :  { %v3551_v14 = vmul.f32 %v5422_v51, %v4958_v21  ;;  %v3560_v34 = vmul.f32 %v5450_v50, %v4960_v23  ;;  %v3271_v54 = vpop.f32.mrb[27].mxu1  ;;  %v3416_v7 = vpop.f32.mrb[29].mxu0  ;;  %v4968_v22 = vld [vmem:[%s8543_s10 + $0xe] ss:$0 sm:$0xff] }
 0x646   :  { %v3550_v6 = vmul.f32 %v4958_v21, %v3271_v54  ;;  %v3559_v49 = vmul.f32 %v4960_v23, %v3416_v7 }
 0x647   :  { %v3553_v10 = vadd.f32 %v3551_v14, %v3535_v25  ;;  %v3562_v57 = vadd.f32 %v3560_v34, %v3544_v55 }
 0x648   :  { %v3552_v56 = vadd.f32 %v3550_v6, %v3534_v4  ;;  %v3561_v35 = vadd.f32 %v3559_v49, %v3543_v9  ;;  %v5425_v53 = vpop.f32.mrb[28].mxu1  ;;  %v5453_v0 = vpop.f32.mrb[30].mxu0  ;;  %v4970_v6 = vld [vmem:[%s8541_s8 + $0xf] ss:$0 sm:$0xff] }
 0x649   :  { %v3569_v58 = vmul.f32 %v5425_v53, %v4962_v28  ;;  %v3578_v37 = vmul.f32 %v5453_v0, %v4964_v61  ;;  %v3281_v24 = vpop.f32.mrb[29].mxu1  ;;  %v3426_v60 = vpop.f32.mrb[31].mxu0  ;;  %v4972_v49 = vld [vmem:[%s8543_s10 + $0xf] ss:$0 sm:$0xff] }
 0x64a   :  { %v3568_v8 = vmul.f32 %v4962_v28, %v3281_v24  ;;  %v3577_v33 = vmul.f32 %v4964_v61, %v3426_v60 }
 0x64b   :  { %v3571_v21 = vadd.f32 %v3569_v58, %v3553_v10  ;;  %v3580_v23 = vadd.f32 %v3578_v37, %v3562_v57 }
 0x64c   :  { %v3570_v25 = vadd.f32 %v3568_v8, %v3552_v56  ;;  %v3579_v55 = vadd.f32 %v3577_v33, %v3561_v35  ;;  %v5428_v4 = vpop.f32.mrb[30].mxu1  ;;  %v5456_v9 = vpop.f32.mrb[32].mxu0 }
 0x64d   :  { %v3587_v51 = vmul.f32 %v5428_v4, %v4966_v62  ;;  %v3596_v50 = vmul.f32 %v5456_v9, %v4968_v22  ;;  %v3291_v14 = vpop.f32.mrb[31].mxu1  ;;  %v3436_v34 = vpop.f32.mrb[33].mxu0 }
 0x64e   :  { %v3586_v54 = vmul.f32 %v4966_v62, %v3291_v14  ;;  %v3595_v7 = vmul.f32 %v4968_v22, %v3436_v34 }
 0x64f   :  { %v3589_v28 = vadd.f32 %v3587_v51, %v3571_v21  ;;  %v3598_v61 = vadd.f32 %v3596_v50, %v3580_v23  ;;  %v4978_v21 = vld [vmem:[%s8549_s13 + $0x1] ss:$0 sm:$0xff] }
 0x650   :  { %v3588_v10 = vadd.f32 %v3586_v54, %v3570_v25  ;;  %v3597_v57 = vadd.f32 %v3595_v7, %v3579_v55  ;;  %v5431_v56 = vpop.f32.mrb[32].mxu1  ;;  %v5459_v35 = vpop.f32.mrb[34].mxu0  ;;  %v4986_v23 = vld [vmem:[%s8548_s15 + $0x1] ss:$0 sm:$0xff] }
 0x651   :  { %v3605_v53 = vmul.f32 %v5431_v56, %v4970_v6  ;;  %v3614_v0 = vmul.f32 %v5459_v35, %v4972_v49  ;;  %v3301_v58 = vpop.f32.mrb[33].mxu1  ;;  %v3446_v37 = vpop.f32.mrb[35].mxu0 }
 0x652   :  { %v3604_v24 = vmul.f32 %v4970_v6, %v3301_v58  ;;  %v3613_v60 = vmul.f32 %v4972_v49, %v3446_v37  ;;  %v5034_v37 = vld [vmem:[%s8541_s8 + $0x12] ss:$0 sm:$0xff] }
 0x653   :  { %v3607_v8 = vadd.f32 %v3605_v53, %v3589_v28  ;;  %v3616_v33 = vadd.f32 %v3614_v0, %v3598_v61 }
 0x654   :  { %v3606_v62 = vadd.f32 %v3604_v24, %v3588_v10  ;;  %v3615_v22 = vadd.f32 %v3613_v60, %v3597_v57  ;;  %v5036_v24 = vld [vmem:[%s8543_s10 + $0x12] ss:$0 sm:$0xff] }
 0x656   :  { %5468 = vmatprep.mubr.msk.f32.mxu1 %vm2401_vm14, %v3606_v62  ;;  %5479 = vmatprep.mubr.msk.f32.mxu0 %vm2401_vm14, %v3615_v22 }
 0x657   :  { %5469 = vmatmul.mubr.msk.f32.vlgmr.msra.gmra.mrb[34].mxu1 %vm2401_vm14, %v3607_v8  ;;  %5480 = vmatmul.mubr.msk.f32.vlgmr.msra.gmra.mrb[36].mxu0 %vm2401_vm14, %v3616_v33 }
 0x658   :  { %5486 = vmatprep.mubr.msk.f32.mxu1 %vm2428_vm7, %v8844_v32  ;;  %5514 = vmatprep.mubr.msk.f32.mxu0 %vm2428_vm7, %v8843_v38 }
 0x72a   :  { %v5470_v25 = vpop.f32.mrb[34].mxu1  ;;  %v5481_v55 = vpop.f32.mrb[36].mxu0 }
 0x72b   :  { %v3708_v4 = vadd.f32 %v5470_v25, %v4978_v21  ;;  %v3804_v9 = vadd.f32 %v5481_v55, %v4986_v23  ;;  %v3702_v51 = vpop.f32.mrb[35].mxu1  ;;  %v3798_v50 = vpop.f32.mrb[37].mxu0 }
 0x72c   :  { %v3703_v14 = vadd.f32 %v4978_v21, %v3702_v51  ;;  %v3799_v34 = vadd.f32 %v4986_v23, %v3798_v50  ;;  %v5038_v50 = vld [vmem:[%s8541_s8 + $0x13] ss:$0 sm:$0xff] }
 0x72d   :  { %v3712_v32 = vmax.f32 %v3708_v4, 0.0  ;;  %v3808_v54 = vmax.f32 %v3804_v9, 0.0 }
 0x72e   :  { %v3711_v7 = vmax.f32 %v3703_v14, 0.0  ;;  %v3807_v38 = vmax.f32 %v3799_v34, 0.0  ;;  %v5040_v14 = vld [vmem:[%s8543_s10 + $0x13] ss:$0 sm:$0xff] }
 0x72f   :  { %v3810_v6 = vadd.f32 %v3808_v54, %v3712_v32 }
 0x730   :  { %v3809_v49 = vadd.f32 %v3807_v38, %v3711_v7 }
 0x731   :  { %v8354_v28 = vadd.f32 %v3810_v6, %v8193_v13 }
 0x732   :  { %v8357_v61 = vadd.f32 %v3809_v49, %v8197_v30 }
 0x734   :  { %v5623_v10 = vpack.c.bf16 %v8354_v28, %v8357_v61 }
 0x736   :  { %5624 = vmatprep.subr.bf16.mxu1 %v5623_v10  ;;  %5628 = vmatprep.subr.bf16.mxu0 %v5623_v10 }
 0x737   :  { %5626 = vmatpush3.bf16.msra.mxu1 %v5623_v10  ;;  %5630 = vmatpush3.bf16.msra.mxu0 %v5623_v10 }
 0x73a   :  { %5487 = vmatmul.mubr.msk.f32.vlgmr.msra.gmra.mrb[36].mxu1 %vm2428_vm7, %v8849_v63  ;;  %5515 = vmatmul.mubr.msk.f32.vlgmr.msra.gmra.mrb[38].mxu0 %vm2428_vm7, %v8850_v20  ;;  %v5028_v20 = vld [vmem:[%s8545_s11 + $0x2] ss:$0 sm:$0xff] }
 0x73b   :  { %5489 = vmatprep.mubr.msk.f32.mxu1 %vm2428_vm7, %v8851_v15  ;;  %5517 = vmatprep.mubr.msk.f32.mxu0 %vm2428_vm7, %v8852_v52 }
 0x73e   :  { %5490 = vmatmul.mubr.msk.f32.gmra.mrb[38].mxu1 %vm2428_vm7, %v8853_v46  ;;  %5518 = vmatmul.mubr.msk.f32.gmra.mrb[40].mxu0 %vm2428_vm7, %v8854_v31  ;;  %v5030_v46 = vld [vmem:[%s8541_s8 + $0x11] ss:$0 sm:$0xff] }
 0x73f   :  { %5492 = vmatprep.mubr.msk.f32.mxu1 %vm2428_vm7, %v8855_v48  ;;  %5520 = vmatprep.mubr.msk.f32.mxu0 %vm2428_vm7, %v8856_v47  ;;  %v5032_v31 = vld [vmem:[%s8543_s10 + $0x11] ss:$0 sm:$0xff] }
 0x742   :  { %5493 = vmatmul.mubr.msk.f32.gmra.mrb[40].mxu1 %vm2428_vm7, %v8857_v12  ;;  %5521 = vmatmul.mubr.msk.f32.gmra.mrb[42].mxu0 %vm2428_vm7, %v8858_v39 }
 0x743   :  { %5495 = vmatprep.mubr.msk.f32.mxu1 %vm2428_vm7, %v8859_v59  ;;  %5523 = vmatprep.mubr.msk.f32.mxu0 %vm2428_vm7, %v8860_v40 }
 0x746   :  { %5496 = vmatmul.mubr.msk.f32.gmra.mrb[42].mxu1 %vm2428_vm7, %v7562_v27  ;;  %5524 = vmatmul.mubr.msk.f32.gmra.mrb[44].mxu0 %vm2428_vm7, %v7583_v19  ;;  %v5057_v27 = vld [vmem:[%s8546_s12 + $0x40] sm:$0xff]  ;;  %v5058_v19 = vld [vmem:[%s8546_s12 + $0x48] sm:$0xff] }
 0x747   :  { %5498 = vmatprep.mubr.msk.f32.mxu1 %vm2428_vm7, %v7767_v1  ;;  %5526 = vmatprep.mubr.msk.f32.mxu0 %vm2428_vm7, %v7654_v3  ;;  %v5065_v3 = vld [vmem:[%s8547_s14 + $0x40] sm:$0xff]  ;;  %v5631_v1 = vpack.c.bf16 %v5058_v19, %v5057_v27 }
 0x749   :  { %5632 = vmatprep.subr.bf16.mxu1 %v5631_v1 }
 0x74a   :  { %5499 = vmatmul.mubr.msk.f32.gmra.mrb[44].mxu1 %vm2428_vm7, %v7769_v45  ;;  %5527 = vmatmul.mubr.msk.f32.gmra.mrb[46].mxu0 %vm2428_vm7, %v7914_v44  ;;  %v5066_v45 = vld [vmem:[%s8547_s14 + $0x48] sm:$0xff]  ;;  %v5060_v44 = vld [vmem:[%s8546_s12 + $0x58] sm:$0xff] }
 0x74b   :  { %5501 = vmatprep.mubr.msk.f32.mxu1 %vm2428_vm7, %v7772_v17  ;;  %5529 = vmatprep.mubr.msk.f32.mxu0 %vm2428_vm7, %v7995_v2  ;;  %v5639_v17 = vpack.c.bf16 %v5066_v45, %v5065_v3  ;;  %v5067_v2 = vld [vmem:[%s8547_s14 + $0x50] sm:$0xff] }
 0x74c   :  { %5634 = vmatpush3.bf16.msra.mxu1 %v5631_v1  ;;  %v5042_v45 = vld [vmem:[%s8541_s8 + $0x14] ss:$0 sm:$0xff] }
 0x74d   :  { %5640 = vmatprep.subr.bf16.mxu0 %v5639_v17 }
 0x74e   :  { %5502 = vmatmul.mubr.msk.f32.gmra.mrb[46].mxu1 %vm2428_vm7, %v7893_v42  ;;  %5530 = vmatmul.mubr.msk.f32.gmra.mrb[48].mxu0 %vm2428_vm7, %v8019_v43  ;;  %v5059_v42 = vld [vmem:[%s8546_s12 + $0x50] sm:$0xff] }
 0x74f   :  { %5504 = vmatprep.mubr.msk.f32.mxu1 %vm2428_vm7, %v8042_v41  ;;  %5532 = vmatprep.mubr.msk.f32.mxu0 %vm2428_vm7, %v8062_v5  ;;  %v5635_v43 = vpack.c.bf16 %v5060_v44, %v5059_v42  ;;  %v5068_v41 = vld [vmem:[%s8547_s14 + $0x58] sm:$0xff]  ;;  %v5024_v5 = vld [vmem:[%s8541_s8 + $0x10] ss:$0 sm:$0xff] }
 0x750   :  { %5642 = vmatpush3.bf16.msra.mxu0 %v5639_v17  ;;  %v5044_v17 = vld [vmem:[%s8543_s10 + $0x14] ss:$0 sm:$0xff] }
 0x751   :  { %5636 = vmatprep.subr.bf16.mxu1 %v5635_v43 }
 0x752   :  { %5505 = vmatmul.mubr.msk.f32.gmra.mrb[48].mxu1 %vm2428_vm7, %v8044_v11  ;;  %5533 = vmatmul.mubr.msk.f32.gmra.mrb[50].mxu0 %vm2428_vm7, %v8082_v29  ;;  %v5643_v11 = vpack.c.bf16 %v5068_v41, %v5067_v2  ;;  %v5027_v29 = vld [vmem:[%s8543_s10 + $0x10] ss:$0 sm:$0xff] }
 0x753   :  { %5507 = vmatprep.mubr.msk.f32.mxu1 %vm2428_vm7, %v8094_v36  ;;  %5535 = vmatprep.mubr.msk.f32.mxu0 %vm2428_vm7, %v8110_v18 }
 0x754   :  { %5644 = vmatprep.subr.bf16.mxu0 %v5643_v11  ;;  %5638 = vmatpush3.bf16.msra.mxu1 %v5635_v43 }
 0x755   :  { %5646 = vmatpush3.bf16.msra.mxu0 %v5643_v11 }
 0x756   :  { %5508 = vmatmul.mubr.msk.f32.gmra.mrb[50].mxu1 %vm2428_vm7, %v8121_v16  ;;  %5536 = vmatmul.mubr.msk.f32.gmra.mrb[52].mxu0 %vm2428_vm7, %v8112_v26  ;;  %v5025_v26 = vld [vmem:[%s8544_s9 + $0x2] ss:$0 sm:$0xff] }
 0x80d   :  { %v5488_v36 = vpop.f32.mrb[36].mxu1  ;;  %v5516_v18 = vpop.f32.mrb[38].mxu0 }
 0x80e   :  { %v4114_v16 = vmul.f32 %v5488_v36, %v5024_v5  ;;  %v4130_v13 = vmul.f32 %v5516_v18, %v5027_v29  ;;  %v3879_v30 = vpop.f32.mrb[37].mxu1  ;;  %v4024_v63 = vpop.f32.mrb[39].mxu0 }
 0x80f   :  { %v4113_v15 = vmul.f32 %v5024_v5, %v3879_v30  ;;  %v4129_v52 = vmul.f32 %v5027_v29, %v4024_v63  ;;  %v5048_v30 = vld [vmem:[%s8543_s10 + $0x15] ss:$0 sm:$0xff] }
 0x810   :  { %v4122_v12 = vadd.f32 %v5025_v26, %v4114_v16  ;;  %v4138_v39 = vadd.f32 %v5028_v20, %v4130_v13  ;;  %v5046_v13 = vld [vmem:[%s8541_s8 + $0x15] ss:$0 sm:$0xff] }
 0x811   :  { %v5491_v48 = vpop.f32.mrb[38].mxu1  ;;  %v5519_v47 = vpop.f32.mrb[40].mxu0  ;;  %v4121_v35 = vadd.f32 %v5025_v26, %v4113_v15  ;;  %v4137_v53 = vadd.f32 %v5028_v20, %v4129_v52 }
 0x812   :  { %v4145_v59 = vmul.f32 %v5491_v48, %v5030_v46  ;;  %v4154_v40 = vmul.f32 %v5519_v47, %v5032_v31  ;;  %v3889_v57 = vpop.f32.mrb[39].mxu1  ;;  %v4034_v56 = vpop.f32.mrb[41].mxu0 }
 0x813   :  { %v4144_v0 = vmul.f32 %v5030_v46, %v3889_v57  ;;  %v4153_v58 = vmul.f32 %v5032_v31, %v4034_v56  ;;  %v5050_v57 = vld [vmem:[%s8541_s8 + $0x16] ss:$0 sm:$0xff] }
 0x814   :  { %v4147_v60 = vadd.f32 %v4145_v59, %v4122_v12  ;;  %v4156_v8 = vadd.f32 %v4154_v40, %v4138_v39  ;;  %v5052_v56 = vld [vmem:[%s8543_s10 + $0x16] ss:$0 sm:$0xff] }
 0x815   :  { %v4146_v33 = vadd.f32 %v4144_v0, %v4121_v35  ;;  %v4155_v62 = vadd.f32 %v4153_v58, %v4137_v53  ;;  %v5494_v22 = vpop.f32.mrb[40].mxu1  ;;  %v5522_v21 = vpop.f32.mrb[42].mxu0 }
 0x816   :  { %v4163_v23 = vmul.f32 %v5494_v22, %v5034_v37  ;;  %v4172_v25 = vmul.f32 %v5522_v21, %v5036_v24  ;;  %v3899_v55 = vpop.f32.mrb[41].mxu1  ;;  %v4044_v4 = vpop.f32.mrb[43].mxu0 }
 0x817   :  { %v4162_v9 = vmul.f32 %v5034_v37, %v3899_v55  ;;  %v4171_v51 = vmul.f32 %v5036_v24, %v4044_v4 }
 0x818   :  { %v4165_v34 = vadd.f32 %v4163_v23, %v4147_v60  ;;  %v4174_v32 = vadd.f32 %v4172_v25, %v4156_v8  ;;  %v5054_v23 = vld [vmem:[%s8541_s8 + $0x17] ss:$0 sm:$0xff] }
 0x819   :  { %v4164_v54 = vadd.f32 %v4162_v9, %v4146_v33  ;;  %v4173_v7 = vadd.f32 %v4171_v51, %v4155_v62  ;;  %v5497_v38 = vpop.f32.mrb[42].mxu1  ;;  %v5525_v6 = vpop.f32.mrb[44].mxu0  ;;  %v5056_v25 = vld [vmem:[%s8543_s10 + $0x17] ss:$0 sm:$0xff] }
 0x81a   :  { %v4181_v49 = vmul.f32 %v5497_v38, %v5038_v50  ;;  %v4190_v10 = vmul.f32 %v5525_v6, %v5040_v14  ;;  %v3909_v27 = vpop.f32.mrb[43].mxu1  ;;  %v4054_v19 = vpop.f32.mrb[45].mxu0 }
 0x81b   :  { %v4180_v3 = vmul.f32 %v5038_v50, %v3909_v27  ;;  %v4189_v1 = vmul.f32 %v5040_v14, %v4054_v19 }
 0x81c   :  { %v4183_v42 = vadd.f32 %v4181_v49, %v4165_v34  ;;  %v4192_v44 = vadd.f32 %v4190_v10, %v4174_v32 }
 0x81d   :  { %v4182_v2 = vadd.f32 %v4180_v3, %v4164_v54  ;;  %v4191_v43 = vadd.f32 %v4189_v1, %v4173_v7  ;;  %v5500_v41 = vpop.f32.mrb[44].mxu1  ;;  %v5528_v11 = vpop.f32.mrb[46].mxu0  ;;  %v4461_v3 = vld [vmem:[%s8550_s16] sm:$0xff]  ;;  %v4462_v1 = vld [vmem:[%s8550_s16 + $0x8] sm:$0xff] }
 0x81e   :  { %v4199_v5 = vmul.f32 %v5500_v41, %v5042_v45  ;;  %v4208_v29 = vmul.f32 %v5528_v11, %v5044_v17  ;;  %v3919_v36 = vpop.f32.mrb[45].mxu1  ;;  %v4064_v18 = vpop.f32.mrb[47].mxu0 }
 0x81f   :  { %v4198_v26 = vmul.f32 %v5042_v45, %v3919_v36  ;;  %v4207_v16 = vmul.f32 %v5044_v17, %v4064_v18  ;;  %v5647_v45 = vpack.c.bf16 %v4462_v1, %v4461_v3  ;;  %v4463_v17 = vld [vmem:[%s8550_s16 + $0x10] sm:$0xff] }
 0x820   :  { %v4201_v63 = vadd.f32 %v4199_v5, %v4183_v42  ;;  %v4210_v20 = vadd.f32 %v4208_v29, %v4192_v44  ;;  %v4464_v42 = vld [vmem:[%s8550_s16 + $0x18] sm:$0xff] }
 0x821   :  { %v4200_v15 = vadd.f32 %v4198_v26, %v4182_v2  ;;  %v4209_v52 = vadd.f32 %v4207_v16, %v4191_v43  ;;  %v5503_v46 = vpop.f32.mrb[46].mxu1  ;;  %v5531_v31 = vpop.f32.mrb[48].mxu0  ;;  %5648 = vmatprep.subr.bf16.mxu1 %v5647_v45  ;;  %v5651_v44 = vpack.c.bf16 %v4464_v42, %v4463_v17  ;;  %v5062_v2 = vld [vmem:[%s8549_s13 + $0x2] ss:$0 sm:$0xff] }
 0x822   :  { %v4217_v48 = vmul.f32 %v5503_v46, %v5046_v13  ;;  %v4226_v47 = vmul.f32 %v5531_v31, %v5048_v30  ;;  %v3929_v12 = vpop.f32.mrb[47].mxu1  ;;  %v4074_v39 = vpop.f32.mrb[49].mxu0  ;;  %v5070_v43 = vld [vmem:[%s8548_s15 + $0x2] ss:$0 sm:$0xff] }
 0x823   :  { %v4216_v59 = vmul.f32 %v5046_v13, %v3929_v12  ;;  %v4225_v40 = vmul.f32 %v5048_v30, %v4074_v39 }
 0x824   :  { %v4219_v35 = vadd.f32 %v4217_v48, %v4201_v63  ;;  %v4228_v53 = vadd.f32 %v4226_v47, %v4210_v20  ;;  %v5073_v48 = vld [vmem:[%s8551_s17] ss:$0 sm:$0xff] }
 0x825   :  { %v4218_v0 = vadd.f32 %v4216_v59, %v4200_v15  ;;  %v4227_v58 = vadd.f32 %v4225_v40, %v4209_v52  ;;  %v5506_v37 = vpop.f32.mrb[48].mxu1  ;;  %v5534_v24 = vpop.f32.mrb[50].mxu0 }
 0x826   :  { %v4235_v60 = vmul.f32 %v5506_v37, %v5050_v57  ;;  %v4244_v8 = vmul.f32 %v5534_v24, %v5052_v56  ;;  %v3939_v33 = vpop.f32.mrb[49].mxu1  ;;  %v4084_v62 = vpop.f32.mrb[51].mxu0 }
 0x827   :  { %v4234_v22 = vmul.f32 %v5050_v57, %v3939_v33  ;;  %v4243_v21 = vmul.f32 %v5052_v56, %v4084_v62 }
 0x828   :  { %v4237_v55 = vadd.f32 %v4235_v60, %v4219_v35  ;;  %v4246_v4 = vadd.f32 %v4244_v8, %v4228_v53 }
 0x829   :  { %v4236_v9 = vadd.f32 %v4234_v22, %v4218_v0  ;;  %v4245_v51 = vadd.f32 %v4243_v21, %v4227_v58  ;;  %v5509_v50 = vpop.f32.mrb[50].mxu1  ;;  %v5537_v14 = vpop.f32.mrb[52].mxu0 }
 0x82a   :  { %v4253_v34 = vmul.f32 %v5509_v50, %v5054_v23  ;;  %v4262_v32 = vmul.f32 %v5537_v14, %v5056_v25  ;;  %v3949_v54 = vpop.f32.mrb[51].mxu1  ;;  %v4094_v7 = vpop.f32.mrb[53].mxu0 }
 0x82b   :  { %v4252_v38 = vmul.f32 %v5054_v23, %v3949_v54  ;;  %v4261_v6 = vmul.f32 %v5056_v25, %v4094_v7 }
 0x82c   :  { %v4255_v49 = vadd.f32 %v4253_v34, %v4237_v55  ;;  %v4264_v10 = vadd.f32 %v4262_v32, %v4246_v4 }
 0x82d   :  { %v4254_v27 = vadd.f32 %v4252_v38, %v4236_v9  ;;  %v4263_v19 = vadd.f32 %v4261_v6, %v4245_v51 }
 0x82f   :  { %5546 = vmatprep.mubr.msk.f32.mxu1 %vm2401_vm14, %v4254_v27  ;;  %5557 = vmatprep.mubr.msk.f32.mxu0 %vm2401_vm14, %v4263_v19 }
 0x830   :  { %5547 = vmatmul.mubr.msk.f32.vlgmr.msra.gmra.mrb[52].mxu1 %vm2401_vm14, %v4255_v49  ;;  %5558 = vmatmul.mubr.msk.f32.vlgmr.msra.gmra.mrb[54].mxu0 %vm2401_vm14, %v4264_v10 }
 0x831   :  { %5650 = vmatpush3.bf16.msra.mxu1 %v5647_v45 }
 0x832   :  { %5652 = vmatprep.subr.bf16.mxu1 %v5651_v44 }
 0x835   :  { %5654 = vmatpush3.bf16.msra.mxu1 %v5651_v44 }
 0x903   :  { %v5548_v41 = vpop.f32.mrb[52].mxu1  ;;  %v5559_v11 = vpop.f32.mrb[54].mxu0 }
 0x904   :  { %v4356_v5 = vadd.f32 %v5548_v41, %v5062_v2  ;;  %v4452_v29 = vadd.f32 %v5559_v11, %v5070_v43  ;;  %v4350_v36 = vpop.f32.mrb[53].mxu1  ;;  %v4446_v18 = vpop.f32.mrb[55].mxu0 }
 0x905   :  { %v4351_v26 = vadd.f32 %v5062_v2, %v4350_v36  ;;  %v4447_v16 = vadd.f32 %v5070_v43, %v4446_v18 }
 0x906   :  { %v4360_v13 = vmax.f32 %v4356_v5, 0.0  ;;  %v4456_v30 = vmax.f32 %v4452_v29, 0.0 }
 0x907   :  { %v4359_v63 = vmax.f32 %v4351_v26, 0.0  ;;  %v4455_v20 = vmax.f32 %v4447_v16, 0.0 }
 0x908   :  { %v4458_v15 = vadd.f32 %v4456_v30, %v4360_v13 }
 0x909   :  { %v4457_v52 = vadd.f32 %v4455_v20, %v4359_v63 }
 0x90a   :  { %v4460_v31 = vadd.f32 %v4458_v15, %v8354_v28 }
 0x90b   :  { %v4459_v46 = vadd.f32 %v4457_v52, %v8357_v61 }
 0x90d   :  { %5568 = vmatprep.mubr.msk.f32.mxu1 %vm2401_vm14, %v4459_v46 }
 0x90e   :  { %5569 = vmatmul.mubr.msk.f32.vlgmr.msra.gmra.mrb[54].mxu1 %vm2401_vm14, %v4460_v31 }
 0x9e1   :  { %v5570_v47 = vpop.f32.mrb[54].mxu1 }
 0x9e2   :  { %v4550_v12 = vadd.f32 %v5570_v47, %v5073_v48  ;;  %v4544_v39 = vpop.f32.mrb[55].mxu1 }
 0x9e3   :  { %v4545_v59 = vadd.f32 %v5073_v48, %v4544_v39 }
 0x9e4   :  { %4554 = vst [vmem:[%s8552_s18 + $0x8] sm:$0xff] %v4550_v12 }
 0x9e5   :  { %4553 = vst [vmem:[%s8552_s18] sm:$0xff] %v4545_v59 }

</bundles_post_ra>
